<compile_context>
chip_gen: v7x
topology: tpu7x:2x2x1
jax: 0.10.0
libtpu: 0.0.40
codegen_flags: <defaults>
</compile_context>

<pallas_src>
import functools

import jax
import jax.numpy as jnp
from jax import lax
from jax.experimental import pallas as pl
from jax.experimental.pallas import tpu as pltpu


def _round_up(a, b):
    return -(-a // b) * b


# ----------------------------------------------------------------------------
# Weight packing / layout helpers
# ----------------------------------------------------------------------------
def _w_matrix(w_oihw):
    """(Cout, Cin, kh, kw) -> (kh*kw*Cin, Cout) bf16, tap-major (matches the
    in-kernel patch layout)."""
    cout, cin, kh, kw = w_oihw.shape
    return (jnp.transpose(w_oihw, (2, 3, 1, 0))
            .reshape(kh * kw * cin, cout).astype(jnp.bfloat16))


def _w_matrix_4x4_s2d(w_oihw):
    """Express a 4x4 / stride-2 / pad-1 conv as a 3x3 / stride-1 / pad-1 conv
    over the space-to-depth(2) input.  Returns a (9*4*Cin, Cout) bf16 matrix
    whose tap / sub-channel ordering matches the in-kernel patch builder.
    Unused (tap, sub-position) slots are zero."""
    cout, cin, _, _ = w_oihw.shape
    w3 = jnp.zeros((3, 3, 2, 2, cin, cout), jnp.float32)
    for ki in range(4):
        ti, r = (ki - 1) // 2 + 1, (ki - 1) % 2      # 3x3 tap row, intra-block row
        for kj in range(4):
            tj, c = (kj - 1) // 2 + 1, (kj - 1) % 2
            w3 = w3.at[ti, tj, r, c].set(jnp.transpose(w_oihw[:, :, ki, kj]))
    return w3.reshape(9 * 4 * cin, cout).astype(jnp.bfloat16)


def _space_to_depth2(x_nhwc):
    """(N, H, W, C) -> (N, H/2, W/2, 4C) with channel order (r*2+c)*C + ch."""
    N, H, W, C = x_nhwc.shape
    x = x_nhwc.reshape(N, H // 2, 2, W // 2, 2, C)
    x = jnp.transpose(x, (0, 1, 3, 2, 4, 5))
    return x.reshape(N, H // 2, W // 2, 4 * C)


# ----------------------------------------------------------------------------
# Fused conv-chain kernel: a sequence of same-resolution layers per grid step.
#   kinds: tuple of ("c", relu_bool)  -> direct 3x3 conv (possibly an expanded
#                                        4x4/stride-2 conv on a s2d input)
#                   ("r",)            -> ResBlock (ReLU-3x3-ReLU-1x1-+residual)
# ----------------------------------------------------------------------------
def _fused_chain_kernel(H, W, pad_top, kinds, final_relu, *refs):
    HW = H * W
    n_w = sum(2 if k[0] == "c" else 4 for k in kinds)
    x_ref = refs[0]
    w_refs = refs[1:1 + n_w]
    o_ref = refs[1 + n_w]
    xp_scr = refs[2 + n_w]          # (pad_top + HW + pad_bot, Cmax) bf16
    patch_scr = refs[3 + n_w]       # (HW, 9*Cmax_conv_in) bf16

    # Zero ONLY the pad rows; the image region is fully rewritten by every conv.
    xp_scr[:pad_top, :] = jnp.zeros((pad_top, xp_scr.shape[1]), xp_scr.dtype)
    n_bot = xp_scr.shape[0] - pad_top - HW
    xp_scr[pad_top + HW:, :] = jnp.zeros((n_bot, xp_scr.shape[1]), xp_scr.dtype)

    # Column masks for the dj = +/-1 taps (row over/underflow lands in the zero
    # pad rows, so only column wrap needs masking).  Hoisted once per kernel.
    col = lax.broadcasted_iota(jnp.int32, (HW, 1), 0) % W
    not_left = col >= 1
    not_right = col <= W - 2

    def conv3x3(x_bf, w_ref, b_ref):
        """Direct 3x3 / stride-1 / pad-1 conv of a flat (HW, Cin) bf16 tile:
        build the (HW, 9*Cin) patch once in VMEM, then ONE K=9*Cin MXU matmul."""
        cin = x_bf.shape[1]
        xp_scr[pad_top:pad_top + HW, :cin] = x_bf
        tap = 0
        for di in (-1, 0, 1):
            for dj in (-1, 0, 1):
                s = pad_top + di * W + dj
                p = xp_scr[s:s + HW, :cin]
                if dj == -1:
                    p = jnp.where(not_left, p, jnp.zeros_like(p))
                elif dj == 1:
                    p = jnp.where(not_right, p, jnp.zeros_like(p))
                patch_scr[:, tap * cin:(tap + 1) * cin] = p
                tap += 1
        return (jnp.dot(patch_scr[:, :9 * cin], w_ref[...],
                        preferred_element_type=jnp.float32) + b_ref[...])

    x = x_ref[0]                                          # (HW, C0) bf16
    wi = 0
    for k in kinds:
        if k[0] == "c":                                   # conv3x3 [+ ReLU]
            y = conv3x3(x, w_refs[wi], w_refs[wi + 1]); wi += 2
            if k[1]:
                y = jnp.maximum(y, 0.0)
            x = y.astype(jnp.bfloat16)
        else:                                             # ResBlock
            w1, b1, w2, b2 = w_refs[wi:wi + 4]; wi += 4
            h = conv3x3(jnp.maximum(x, 0), w1, b1)        # fused pre-ReLU (exact in bf16)
            h = jnp.maximum(h, 0.0)                       # fused mid-ReLU (f32)
            y = (jnp.dot(h.astype(jnp.bfloat16), w2[...],
                         preferred_element_type=jnp.float32)
                 + b2[...] + x.astype(jnp.float32))       # 1x1 conv + residual
            x = y.astype(jnp.bfloat16)
    if final_relu:                                        # encoder's trailing ReLU
        x = jnp.maximum(x, 0)
    o_ref[0] = x.astype(o_ref.dtype)


def fused_conv_chain(x_nhwc, layers, *, final_relu):
    """Run a chain of same-resolution conv layers as ONE pallas_call.

    layers: list of
      ("c", w_mat (9*Cin, Cout) bf16, bias (Cout,), relu: bool)  direct 3x3 conv
      ("r", w1 (9*C, R) bf16, b1 (R,), w2 (R, C) bf16, b2 (C,))  ResBlock
    """
    N, H, W, C0 = x_nhwc.shape
    HW = H * W
    x3 = x_nhwc.astype(jnp.bfloat16).reshape(N, HW, C0)

    kinds, flat_params, conv_cins = [], [], [C0]
    for lyr in layers:
        if lyr[0] == "c":
            _, w, b, relu = lyr
            kinds.append(("c", bool(relu)))
            flat_params += [w, b.reshape(1, -1).astype(jnp.float32)]
            conv_cins.append(w.shape[0] // 9)
        else:
            _, w1, b1, w2, b2 = lyr
            kinds.append(("r",))
            flat_params += [w1, b1.reshape(1, -1).astype(jnp.float32),
                            w2, b2.reshape(1, -1).astype(jnp.float32)]
            conv_cins.append(w1.shape[0] // 9)
    cout = flat_params[-1].shape[1]
    c_max = max(conv_cins)
    k_max = 9 * max(conv_cins[1:])

    pad_top = _round_up(W + 1, 16)       # 16-aligned image base (packed bf16 sublanes)
    pad_bot = _round_up(W + 1, 8)
    xp_rows = pad_top + HW + pad_bot

    in_specs = [pl.BlockSpec((1, HW, C0), lambda n: (n, 0, 0))]
    in_specs += [pl.BlockSpec(p.shape, lambda n: (0, 0)) for p in flat_params]

    weight_elems = sum(int(w.shape[0]) * int(w.shape[1]) for w in flat_params[0::2])
    out = pl.pallas_call(
        functools.partial(_fused_chain_kernel, H, W, pad_top, tuple(kinds),
                          bool(final_relu)),
        out_shape=jax.ShapeDtypeStruct((N, HW, cout), jnp.bfloat16),
        grid=(N,),
        in_specs=in_specs,
        out_specs=pl.BlockSpec((1, HW, cout), lambda n: (n, 0, 0)),
        scratch_shapes=[pltpu.VMEM((xp_rows, c_max), jnp.bfloat16),
                        pltpu.VMEM((HW, k_max), jnp.bfloat16)],
        compiler_params=pltpu.CompilerParams(
            dimension_semantics=("parallel",)),
        cost_estimate=pl.CostEstimate(
            flops=2 * N * HW * weight_elems,
            transcendentals=0,
            bytes_accessed=2 * N * HW * (C0 + cout)
                           + sum(int(p.size) * p.dtype.itemsize for p in flat_params)),
    )(x3, *flat_params)
    return out.reshape(N, H, W, cout)


# ----------------------------------------------------------------------------
# Parameters (deterministic, PyTorch-style uniform fan-in init)
# ----------------------------------------------------------------------------
def _conv_param(key, cout, cin, k):
    k1, k2 = jax.random.split(key)
    scale = 1.0 / (cin * k * k) ** 0.5
    w = jax.random.uniform(k1, (cout, cin, k, k), jnp.float32, -scale, scale)
    b = jax.random.uniform(k2, (cout,), jnp.float32, -scale, scale)
    return w, b


def init_encoder_params(key, in_channel, channel, n_res_block, n_res_channel, stride):
    params = {}
    keys = jax.random.split(key, 8 + 2 * n_res_block)
    if stride == 4:
        params["conv0"] = _conv_param(keys[0], channel // 2, in_channel, 4)
        params["conv1"] = _conv_param(keys[1], channel, channel // 2, 4)
        params["conv2"] = _conv_param(keys[2], channel, channel, 3)
    elif stride == 2:
        params["conv0"] = _conv_param(keys[0], channel // 2, in_channel, 4)
        params["conv1"] = _conv_param(keys[1], channel, channel // 2, 3)
    else:
        raise ValueError("stride must be 2 or 4")
    for i in range(n_res_block):
        params[f"res{i}_a"] = _conv_param(keys[3 + 2 * i], n_res_channel, channel, 3)
        params[f"res{i}_b"] = _conv_param(keys[4 + 2 * i], channel, n_res_channel, 1)
    return params


# ----------------------------------------------------------------------------
# Encoder forward (mirrors nn.Sequential in the PyTorch module)
# ----------------------------------------------------------------------------
def encoder_forward(params, x_nchw, *, stride, n_res_block):
    x = jnp.transpose(x_nchw, (0, 2, 3, 1)).astype(jnp.bfloat16)     # NCHW -> NHWC bf16

    # call 1: first 4x4/stride-2 downsample (+ReLU), computed as a direct
    # in-kernel 3x3 conv over the space-to-depth(2) input (no im2col).
    w0, b0 = params["conv0"]
    x = fused_conv_chain(_space_to_depth2(x),
                         [("c", _w_matrix_4x4_s2d(w0), b0, True)],
                         final_relu=False)

    if stride == 4:
        w1, b1 = params["conv1"]
        w2, b2 = params["conv2"]
        tail = [("c", _w_matrix_4x4_s2d(w1), b1, True),   # 2nd downsample + ReLU
                ("c", _w_matrix(w2), b2, False)]          # trunk 3x3 conv
        x = _space_to_depth2(x)
    elif stride == 2:
        w1, b1 = params["conv1"]
        tail = [("c", _w_matrix(w1), b1, False)]          # trunk 3x3 conv
    else:
        raise ValueError("stride must be 2 or 4")
    for i in range(n_res_block):
        wa, ba = params[f"res{i}_a"]
        wb, bb = params[f"res{i}_b"]
        tail.append(("r", _w_matrix(wa), ba, _w_matrix(wb), bb))

    # call 2: everything after the first downsample (2nd downsample for
    # stride=4, trunk 3x3, all ResBlocks, trailing ReLU) is ONE pallas_call.
    x = fused_conv_chain(x, tail, final_relu=True)
    return jnp.transpose(x.astype(jnp.float32), (0, 3, 1, 2))        # NHWC -> NCHW


# ----------------------------------------------------------------------------
# Pure-JAX f32 reference (correctness check only)
# ----------------------------------------------------------------------------
def _ref_conv(x_nhwc, w_oihw, b, stride, padding):
    y = lax.conv_general_dilated(
        x_nhwc, jnp.transpose(w_oihw, (2, 3, 1, 0)),
        window_strides=(stride, stride),
        padding=((padding, padding), (padding, padding)),
        dimension_numbers=("NHWC", "HWIO", "NHWC"))
    return y + b


def reference_forward(params, x_nchw, *, stride, n_res_block):
    x = jnp.transpose(x_nchw, (0, 2, 3, 1))
    if stride == 4:
        x = jax.nn.relu(_ref_conv(x, *params["conv0"], 2, 1))
        x = jax.nn.relu(_ref_conv(x, *params["conv1"], 2, 1))
        x = _ref_conv(x, *params["conv2"], 1, 1)
    else:
        x = jax.nn.relu(_ref_conv(x, *params["conv0"], 2, 1))
        x = _ref_conv(x, *params["conv1"], 1, 1)
    for i in range(n_res_block):
        h = _ref_conv(jax.nn.relu(x), *params[f"res{i}_a"], 1, 1)
        h = _ref_conv(jax.nn.relu(h), *params[f"res{i}_b"], 1, 0)
        x = x + h
    x = jax.nn.relu(x)
    return jnp.transpose(x, (0, 3, 1, 2))


# ----------------------------------------------------------------------------
if __name__ == "__main__":
    in_channel, channel, n_res_block, n_res_channel, stride = 4, 32, 2, 8, 4
    key = jax.random.PRNGKey(0)
    k_param, k_x = jax.random.split(key)

    params = init_encoder_params(k_param, in_channel, channel,
                                 n_res_block, n_res_channel, stride)
    x = jax.random.normal(k_x, (2, in_channel, 16, 16), jnp.float32)  # NCHW

    fwd = jax.jit(functools.partial(encoder_forward,
                                    stride=stride, n_res_block=n_res_block))
    out = jax.block_until_ready(fwd(params, x))

    ref = reference_forward(params, x, stride=stride, n_res_block=n_res_block)
    assert out.shape == (2, channel, 4, 4), out.shape
    max_err = float(jnp.max(jnp.abs(out - ref)))
    # bf16 operands / activations with f32 accumulation -> loosened tolerance.
    assert jnp.allclose(out, ref, atol=5e-2, rtol=5e-2), max_err

    print("KERNEL_OK")
</pallas_src>

<mosaic_0001>
module attributes {stable_mosaic.version = 11 : i64} {
  func.func @_fused_chain_kernel(%arg0: i32, %arg1: memref<1x64x16xbf16, #tpu.memory_space<vmem>>, %arg2: memref<144x16xbf16, #tpu.memory_space<vmem>>, %arg3: memref<1x16xf32, #tpu.memory_space<vmem>>, %arg4: memref<1x64x16xbf16, #tpu.memory_space<vmem>>, %arg5: memref<96x16xbf16, #tpu.memory_space<vmem>>, %arg6: memref<64x144xbf16, #tpu.memory_space<vmem>>) attributes {dimension_semantics = [#tpu.dimension_semantics<parallel>], iteration_bounds = array<i64: 2>, scalar_prefetch = 0 : i64, scratch_operands = 2 : i64, tpu.core_type = #tpu.core_type<tc>, window_params = [{transform_indices = @transform_0, window_bounds = array<i64: 1, 64, 16>}, {pipeline_mode = #tpu.pipeline_mode<synchronous>, transform_indices = @transform_1, window_bounds = array<i64: 144, 16>}, {pipeline_mode = #tpu.pipeline_mode<synchronous>, transform_indices = @transform_2, window_bounds = array<i64: 1, 16>}, {transform_indices = @transform_3, window_bounds = array<i64: 1, 64, 16>}]} {
    %cst = arith.constant 0.000000e+00 : bf16
    %0 = vector.broadcast %cst : bf16 to vector<16x16xbf16>
    %c0 = arith.constant 0 : index
    %c0_0 = arith.constant 0 : index
    %1 = vector.load %arg5[%c0, %c0_0] : memref<96x16xbf16, #tpu.memory_space<vmem>>, vector<16x16xbf16>
    tpu.vector_store %arg5[%c0, %c0_0], %0 {strides = array<i32>} : memref<96x16xbf16, #tpu.memory_space<vmem>>, vector<16x16xbf16>,
    %cst_1 = arith.constant 0.000000e+00 : bf16
    %2 = vector.broadcast %cst_1 : bf16 to vector<16x16xbf16>
    %c80 = arith.constant 80 : index
    %c0_2 = arith.constant 0 : index
    %3 = vector.load %arg5[%c80, %c0_2] : memref<96x16xbf16, #tpu.memory_space<vmem>>, vector<16x16xbf16>
    tpu.vector_store %arg5[%c80, %c0_2], %2 {strides = array<i32>} : memref<96x16xbf16, #tpu.memory_space<vmem>>, vector<16x16xbf16>,
    %4 = tpu.iota {dimensions = array<i32: 0>} : vector<64x1xi32>
    %c8_i32 = arith.constant 8 : i32
    %c0_i32 = arith.constant 0 : i32
    %5 = arith.cmpi eq, %c8_i32, %c0_i32 : i32
    %c1_i32 = arith.constant 1 : i32
    %6 = arith.select %5, %c1_i32, %c8_i32 : i32
    %7 = vector.broadcast %6 : i32 to vector<64x1xi32>
    %8 = arith.remsi %4, %7 : vector<64x1xi32>
    %c0_i32_3 = arith.constant 0 : i32
    %9 = vector.broadcast %c0_i32_3 : i32 to vector<64x1xi32>
    %10 = arith.cmpi ne, %8, %9 : vector<64x1xi32>
    %c0_i32_4 = arith.constant 0 : i32
    %11 = vector.broadcast %c0_i32_4 : i32 to vector<64x1xi32>
    %12 = arith.cmpi slt, %8, %11 : vector<64x1xi32>
    %c0_i32_5 = arith.constant 0 : i32
    %13 = arith.cmpi slt, %6, %c0_i32_5 : i32
    %14 = vector.broadcast %13 : i1 to vector<64x1xi1>
    %15 = vector.broadcast %14 : vector<64x1xi1> to vector<64x1xi1>
    %16 = arith.xori %12, %15 : vector<64x1xi1>
    %17 = arith.andi %16, %10 : vector<64x1xi1>
    %18 = vector.broadcast %6 : i32 to vector<64x1xi32>
    %19 = arith.addi %8, %18 : vector<64x1xi32>
    %20 = arith.select %17, %19, %8 : vector<64x1xi1>, vector<64x1xi32>
    %c1_i32_6 = arith.constant 1 : i32
    %21 = vector.broadcast %c1_i32_6 : i32 to vector<64x1xi32>
    %22 = arith.cmpi sge, %20, %21 : vector<64x1xi32>
    %c6_i32 = arith.constant 6 : i32
    %23 = vector.broadcast %c6_i32 : i32 to vector<64x1xi32>
    %24 = arith.cmpi sle, %20, %23 : vector<64x1xi32>
    %c0_7 = arith.constant 0 : index
    %c0_8 = arith.constant 0 : index
    %c0_9 = arith.constant 0 : index
    %25 = vector.load %arg1[%c0_7, %c0_8, %c0_9] : memref<1x64x16xbf16, #tpu.memory_space<vmem>>, vector<1x64x16xbf16>
    %26 = vector.shape_cast %25 : vector<1x64x16xbf16> to vector<64x16xbf16>
    %c16 = arith.constant 16 : index
    %c0_10 = arith.constant 0 : index
    %27 = vector.load %arg5[%c16, %c0_10] : memref<96x16xbf16, #tpu.memory_space<vmem>>, vector<64x16xbf16>
    tpu.vector_store %arg5[%c16, %c0_10], %26 {strides = array<i32>} : memref<96x16xbf16, #tpu.memory_space<vmem>>, vector<64x16xbf16>,
    %c7 = arith.constant 7 : index
    %c0_11 = arith.constant 0 : index
    %28 = vector.load %arg5[%c7, %c0_11] : memref<96x16xbf16, #tpu.memory_space<vmem>>, vector<64x16xbf16>
    %cst_12 = arith.constant 0.000000e+00 : bf16
    %29 = vector.broadcast %cst_12 : bf16 to vector<64x16xbf16>
    %30 = vector.shape_cast %22 : vector<64x1xi1> to vector<64x1xi1>
    %31 = vector.broadcast %30 : vector<64x1xi1> to vector<64x16xi1>
    %32 = arith.select %31, %28, %29 : vector<64x16xi1>, vector<64x16xbf16>
    %c0_13 = arith.constant 0 : index
    %c0_14 = arith.constant 0 : index
    %33 = vector.load %arg6[%c0_13, %c0_14] : memref<64x144xbf16, #tpu.memory_space<vmem>>, vector<64x16xbf16>
    tpu.vector_store %arg6[%c0_13, %c0_14], %32 {strides = array<i32>} : memref<64x144xbf16, #tpu.memory_space<vmem>>, vector<64x16xbf16>,
    %c8 = arith.constant 8 : index
    %c0_15 = arith.constant 0 : index
    %34 = vector.load %arg5[%c8, %c0_15] : memref<96x16xbf16, #tpu.memory_space<vmem>>, vector<64x16xbf16>
    %c0_16 = arith.constant 0 : index
    %c16_17 = arith.constant 16 : index
    %35 = vector.load %arg6[%c0_16, %c16_17] : memref<64x144xbf16, #tpu.memory_space<vmem>>, vector<64x16xbf16>
    tpu.vector_store %arg6[%c0_16, %c16_17], %34 {strides = array<i32>} : memref<64x144xbf16, #tpu.memory_space<vmem>>, vector<64x16xbf16>,
    %c9 = arith.constant 9 : index
    %c0_18 = arith.constant 0 : index
    %36 = vector.load %arg5[%c9, %c0_18] : memref<96x16xbf16, #tpu.memory_space<vmem>>, vector<64x16xbf16>
    %cst_19 = arith.constant 0.000000e+00 : bf16
    %37 = vector.broadcast %cst_19 : bf16 to vector<64x16xbf16>
    %38 = vector.shape_cast %24 : vector<64x1xi1> to vector<64x1xi1>
    %39 = vector.broadcast %38 : vector<64x1xi1> to vector<64x16xi1>
    %40 = arith.select %39, %36, %37 : vector<64x16xi1>, vector<64x16xbf16>
    %c0_20 = arith.constant 0 : index
    %c32 = arith.constant 32 : index
    %41 = vector.load %arg6[%c0_20, %c32] : memref<64x144xbf16, #tpu.memory_space<vmem>>, vector<64x16xbf16>
    tpu.vector_store %arg6[%c0_20, %c32], %40 {strides = array<i32>} : memref<64x144xbf16, #tpu.memory_space<vmem>>, vector<64x16xbf16>,
    %c15 = arith.constant 15 : index
    %c0_21 = arith.constant 0 : index
    %42 = vector.load %arg5[%c15, %c0_21] : memref<96x16xbf16, #tpu.memory_space<vmem>>, vector<64x16xbf16>
    %cst_22 = arith.constant 0.000000e+00 : bf16
    %43 = vector.broadcast %cst_22 : bf16 to vector<64x16xbf16>
    %44 = vector.shape_cast %22 : vector<64x1xi1> to vector<64x1xi1>
    %45 = vector.broadcast %44 : vector<64x1xi1> to vector<64x16xi1>
    %46 = arith.select %45, %42, %43 : vector<64x16xi1>, vector<64x16xbf16>
    %c0_23 = arith.constant 0 : index
    %c48 = arith.constant 48 : index
    %47 = vector.load %arg6[%c0_23, %c48] : memref<64x144xbf16, #tpu.memory_space<vmem>>, vector<64x16xbf16>
    tpu.vector_store %arg6[%c0_23, %c48], %46 {strides = array<i32>} : memref<64x144xbf16, #tpu.memory_space<vmem>>, vector<64x16xbf16>,
    %c16_24 = arith.constant 16 : index
    %c0_25 = arith.constant 0 : index
    %48 = vector.load %arg5[%c16_24, %c0_25] : memref<96x16xbf16, #tpu.memory_space<vmem>>, vector<64x16xbf16>
    %c0_26 = arith.constant 0 : index
    %c64 = arith.constant 64 : index
    %49 = vector.load %arg6[%c0_26, %c64] : memref<64x144xbf16, #tpu.memory_space<vmem>>, vector<64x16xbf16>
    tpu.vector_store %arg6[%c0_26, %c64], %48 {strides = array<i32>} : memref<64x144xbf16, #tpu.memory_space<vmem>>, vector<64x16xbf16>,
    %c17 = arith.constant 17 : index
    %c0_27 = arith.constant 0 : index
    %50 = vector.load %arg5[%c17, %c0_27] : memref<96x16xbf16, #tpu.memory_space<vmem>>, vector<64x16xbf16>
    %cst_28 = arith.constant 0.000000e+00 : bf16
    %51 = vector.broadcast %cst_28 : bf16 to vector<64x16xbf16>
    %52 = vector.shape_cast %24 : vector<64x1xi1> to vector<64x1xi1>
    %53 = vector.broadcast %52 : vector<64x1xi1> to vector<64x16xi1>
    %54 = arith.select %53, %50, %51 : vector<64x16xi1>, vector<64x16xbf16>
    %c0_29 = arith.constant 0 : index
    %c80_30 = arith.constant 80 : index
    %55 = vector.load %arg6[%c0_29, %c80_30] : memref<64x144xbf16, #tpu.memory_space<vmem>>, vector<64x16xbf16>
    tpu.vector_store %arg6[%c0_29, %c80_30], %54 {strides = array<i32>} : memref<64x144xbf16, #tpu.memory_space<vmem>>, vector<64x16xbf16>,
    %c23 = arith.constant 23 : index
    %c0_31 = arith.constant 0 : index
    %56 = vector.load %arg5[%c23, %c0_31] : memref<96x16xbf16, #tpu.memory_space<vmem>>, vector<64x16xbf16>
    %cst_32 = arith.constant 0.000000e+00 : bf16
    %57 = vector.broadcast %cst_32 : bf16 to vector<64x16xbf16>
    %58 = vector.shape_cast %22 : vector<64x1xi1> to vector<64x1xi1>
    %59 = vector.broadcast %58 : vector<64x1xi1> to vector<64x16xi1>
    %60 = arith.select %59, %56, %57 : vector<64x16xi1>, vector<64x16xbf16>
    %c0_33 = arith.constant 0 : index
    %c96 = arith.constant 96 : index
    %61 = vector.load %arg6[%c0_33, %c96] : memref<64x144xbf16, #tpu.memory_space<vmem>>, vector<64x16xbf16>
    tpu.vector_store %arg6[%c0_33, %c96], %60 {strides = array<i32>} : memref<64x144xbf16, #tpu.memory_space<vmem>>, vector<64x16xbf16>,
    %c24 = arith.constant 24 : index
    %c0_34 = arith.constant 0 : index
    %62 = vector.load %arg5[%c24, %c0_34] : memref<96x16xbf16, #tpu.memory_space<vmem>>, vector<64x16xbf16>
    %c0_35 = arith.constant 0 : index
    %c112 = arith.constant 112 : index
    %63 = vector.load %arg6[%c0_35, %c112] : memref<64x144xbf16, #tpu.memory_space<vmem>>, vector<64x16xbf16>
    tpu.vector_store %arg6[%c0_35, %c112], %62 {strides = array<i32>} : memref<64x144xbf16, #tpu.memory_space<vmem>>, vector<64x16xbf16>,
    %c25 = arith.constant 25 : index
    %c0_36 = arith.constant 0 : index
    %64 = vector.load %arg5[%c25, %c0_36] : memref<96x16xbf16, #tpu.memory_space<vmem>>, vector<64x16xbf16>
    %cst_37 = arith.constant 0.000000e+00 : bf16
    %65 = vector.broadcast %cst_37 : bf16 to vector<64x16xbf16>
    %66 = vector.shape_cast %24 : vector<64x1xi1> to vector<64x1xi1>
    %67 = vector.broadcast %66 : vector<64x1xi1> to vector<64x16xi1>
    %68 = arith.select %67, %64, %65 : vector<64x16xi1>, vector<64x16xbf16>
    %c0_38 = arith.constant 0 : index
    %c128 = arith.constant 128 : index
    %69 = vector.load %arg6[%c0_38, %c128] : memref<64x144xbf16, #tpu.memory_space<vmem>>, vector<64x16xbf16>
    tpu.vector_store %arg6[%c0_38, %c128], %68 {strides = array<i32>} : memref<64x144xbf16, #tpu.memory_space<vmem>>, vector<64x16xbf16>,
    %c0_39 = arith.constant 0 : index
    %c0_40 = arith.constant 0 : index
    %70 = vector.load %arg6[%c0_39, %c0_40] : memref<64x144xbf16, #tpu.memory_space<vmem>>, vector<64x144xbf16>
    %c0_41 = arith.constant 0 : index
    %c0_42 = arith.constant 0 : index
    %71 = vector.load %arg2[%c0_41, %c0_42] : memref<144x16xbf16, #tpu.memory_space<vmem>>, vector<144x16xbf16>
    %cst_43 = arith.constant dense<0.000000e+00> : vector<64x16xf32>
    %72 = tpu.matmul %70, %71, %cst_43 {dimension_numbers = #tpu.dot_dimension_numbers<[1], [0], [0], [1], [0, 0, 1, 1], [], []>} : vector<64x144xbf16>, vector<144x16xbf16>, vector<64x16xf32> -> vector<64x16xf32>
    %c0_44 = arith.constant 0 : index
    %c0_45 = arith.constant 0 : index
    %73 = vector.load %arg3[%c0_44, %c0_45] : memref<1x16xf32, #tpu.memory_space<vmem>>, vector<1x16xf32>
    %74 = vector.broadcast %73 : vector<1x16xf32> to vector<64x16xf32>
    %75 = arith.addf %72, %74 : vector<64x16xf32>
    %cst_46 = arith.constant 0.000000e+00 : f32
    %76 = vector.broadcast %cst_46 : f32 to vector<64x16xf32>
    %77 = arith.maximumf %75, %76 : vector<64x16xf32>
    %78 = arith.truncf %77 : vector<64x16xf32> to vector<64x16xbf16>
    %c0_47 = arith.constant 0 : index
    %c0_48 = arith.constant 0 : index
    %c0_49 = arith.constant 0 : index
    %79 = vector.load %arg4[%c0_47, %c0_48, %c0_49] : memref<1x64x16xbf16, #tpu.memory_space<vmem>>, vector<1x64x16xbf16>
    %80 = vector.shape_cast %79 : vector<1x64x16xbf16> to vector<64x16xbf16>
    %81 = vector.shape_cast %78 : vector<64x16xbf16> to vector<1x64x16xbf16>
    tpu.vector_store %arg4[%c0_47, %c0_48, %c0_49], %81 {strides = array<i32>} : memref<1x64x16xbf16, #tpu.memory_space<vmem>>, vector<1x64x16xbf16>,
    return
  }
  func.func @transform_0(%arg0: i32) -> (i32, i32, i32) {
    %c0_i32 = arith.constant 0 : i32
    %c0_i32_0 = arith.constant 0 : i32
    %c0_i32_1 = arith.constant 0 : i32
    return %arg0, %c0_i32, %c0_i32_0 : i32, i32, i32
  }
  func.func @transform_1(%arg0: i32) -> (i32, i32) {
    %c0_i32 = arith.constant 0 : i32
    %c0_i32_0 = arith.constant 0 : i32
    %c0_i32_1 = arith.constant 0 : i32
    return %c0_i32, %c0_i32_0 : i32, i32
  }
  func.func @transform_2(%arg0: i32) -> (i32, i32) {
    %c0_i32 = arith.constant 0 : i32
    %c0_i32_0 = arith.constant 0 : i32
    %c0_i32_1 = arith.constant 0 : i32
    return %c0_i32, %c0_i32_0 : i32, i32
  }
  func.func @transform_3(%arg0: i32) -> (i32, i32, i32) {
    %c0_i32 = arith.constant 0 : i32
    %c0_i32_0 = arith.constant 0 : i32
    %c0_i32_1 = arith.constant 0 : i32
    return %arg0, %c0_i32, %c0_i32_0 : i32, i32, i32
  }
}

module attributes {stable_mosaic.version = 11 : i64} {
  func.func @_fused_chain_kernel(%arg0: i32, %arg1: memref<1x16x64xbf16, #tpu.memory_space<vmem>>, %arg2: memref<576x32xbf16, #tpu.memory_space<vmem>>, %arg3: memref<1x32xf32, #tpu.memory_space<vmem>>, %arg4: memref<288x32xbf16, #tpu.memory_space<vmem>>, %arg5: memref<1x32xf32, #tpu.memory_space<vmem>>, %arg6: memref<288x8xbf16, #tpu.memory_space<vmem>>, %arg7: memref<1x8xf32, #tpu.memory_space<vmem>>, %arg8: memref<8x32xbf16, #tpu.memory_space<vmem>>, %arg9: memref<1x32xf32, #tpu.memory_space<vmem>>, %arg10: memref<288x8xbf16, #tpu.memory_space<vmem>>, %arg11: memref<1x8xf32, #tpu.memory_space<vmem>>, %arg12: memref<8x32xbf16, #tpu.memory_space<vmem>>, %arg13: memref<1x32xf32, #tpu.memory_space<vmem>>, %arg14: memref<1x16x32xbf16, #tpu.memory_space<vmem>>, %arg15: memref<40x64xbf16, #tpu.memory_space<vmem>>, %arg16: memref<16x576xbf16, #tpu.memory_space<vmem>>) attributes {dimension_semantics = [#tpu.dimension_semantics<parallel>], iteration_bounds = array<i64: 2>, scalar_prefetch = 0 : i64, scratch_operands = 2 : i64, tpu.core_type = #tpu.core_type<tc>, window_params = [{transform_indices = @transform_0, window_bounds = array<i64: 1, 16, 64>}, {pipeline_mode = #tpu.pipeline_mode<synchronous>, transform_indices = @transform_1, window_bounds = array<i64: 576, 32>}, {pipeline_mode = #tpu.pipeline_mode<synchronous>, transform_indices = @transform_2, window_bounds = array<i64: 1, 32>}, {pipeline_mode = #tpu.pipeline_mode<synchronous>, transform_indices = @transform_3, window_bounds = array<i64: 288, 32>}, {pipeline_mode = #tpu.pipeline_mode<synchronous>, transform_indices = @transform_4, window_bounds = array<i64: 1, 32>}, {pipeline_mode = #tpu.pipeline_mode<synchronous>, transform_indices = @transform_5, window_bounds = array<i64: 288, 8>}, {pipeline_mode = #tpu.pipeline_mode<synchronous>, transform_indices = @transform_6, window_bounds = array<i64: 1, 8>}, {pipeline_mode = #tpu.pipeline_mode<synchronous>, transform_indices = @transform_7, window_bounds = array<i64: 8, 32>}, {pipeline_mode = #tpu.pipeline_mode<synchronous>, transform_indices = @transform_8, window_bounds = array<i64: 1, 32>}, {pipeline_mode = #tpu.pipeline_mode<synchronous>, transform_indices = @transform_9, window_bounds = array<i64: 288, 8>}, {pipeline_mode = #tpu.pipeline_mode<synchronous>, transform_indices = @transform_10, window_bounds = array<i64: 1, 8>}, {pipeline_mode = #tpu.pipeline_mode<synchronous>, transform_indices = @transform_11, window_bounds = array<i64: 8, 32>}, {pipeline_mode = #tpu.pipeline_mode<synchronous>, transform_indices = @transform_12, window_bounds = array<i64: 1, 32>}, {transform_indices = @transform_13, window_bounds = array<i64: 1, 16, 32>}]} {
    %cst = arith.constant 0.000000e+00 : bf16
    %0 = vector.broadcast %cst : bf16 to vector<16x64xbf16>
    %c0 = arith.constant 0 : index
    %c0_0 = arith.constant 0 : index
    %1 = vector.load %arg15[%c0, %c0_0] : memref<40x64xbf16, #tpu.memory_space<vmem>>, vector<16x64xbf16>
    tpu.vector_store %arg15[%c0, %c0_0], %0 {strides = array<i32>} : memref<40x64xbf16, #tpu.memory_space<vmem>>, vector<16x64xbf16>,
    %cst_1 = arith.constant 0.000000e+00 : bf16
    %2 = vector.broadcast %cst_1 : bf16 to vector<8x64xbf16>
    %c32 = arith.constant 32 : index
    %c0_2 = arith.constant 0 : index
    %3 = vector.load %arg15[%c32, %c0_2] : memref<40x64xbf16, #tpu.memory_space<vmem>>, vector<8x64xbf16>
    tpu.vector_store %arg15[%c32, %c0_2], %2 {strides = array<i32>} : memref<40x64xbf16, #tpu.memory_space<vmem>>, vector<8x64xbf16>,
    %4 = tpu.iota {dimensions = array<i32: 0>} : vector<16x1xi32>
    %c4_i32 = arith.constant 4 : i32
    %c0_i32 = arith.constant 0 : i32
    %5 = arith.cmpi eq, %c4_i32, %c0_i32 : i32
    %c1_i32 = arith.constant 1 : i32
    %6 = arith.select %5, %c1_i32, %c4_i32 : i32
    %7 = vector.broadcast %6 : i32 to vector<16x1xi32>
    %8 = arith.remsi %4, %7 : vector<16x1xi32>
    %c0_i32_3 = arith.constant 0 : i32
    %9 = vector.broadcast %c0_i32_3 : i32 to vector<16x1xi32>
    %10 = arith.cmpi ne, %8, %9 : vector<16x1xi32>
    %c0_i32_4 = arith.constant 0 : i32
    %11 = vector.broadcast %c0_i32_4 : i32 to vector<16x1xi32>
    %12 = arith.cmpi slt, %8, %11 : vector<16x1xi32>
    %c0_i32_5 = arith.constant 0 : i32
    %13 = arith.cmpi slt, %6, %c0_i32_5 : i32
    %14 = vector.broadcast %13 : i1 to vector<16x1xi1>
    %15 = vector.broadcast %14 : vector<16x1xi1> to vector<16x1xi1>
    %16 = arith.xori %12, %15 : vector<16x1xi1>
    %17 = arith.andi %16, %10 : vector<16x1xi1>
    %18 = vector.broadcast %6 : i32 to vector<16x1xi32>
    %19 = arith.addi %8, %18 : vector<16x1xi32>
    %20 = arith.select %17, %19, %8 : vector<16x1xi1>, vector<16x1xi32>
    %c1_i32_6 = arith.constant 1 : i32
    %21 = vector.broadcast %c1_i32_6 : i32 to vector<16x1xi32>
    %22 = arith.cmpi sge, %20, %21 : vector<16x1xi32>
    %c2_i32 = arith.constant 2 : i32
    %23 = vector.broadcast %c2_i32 : i32 to vector<16x1xi32>
    %24 = arith.cmpi sle, %20, %23 : vector<16x1xi32>
    %c0_7 = arith.constant 0 : index
    %c0_8 = arith.constant 0 : index
    %c0_9 = arith.constant 0 : index
    %25 = vector.load %arg1[%c0_7, %c0_8, %c0_9] : memref<1x16x64xbf16, #tpu.memory_space<vmem>>, vector<1x16x64xbf16>
    %26 = vector.shape_cast %25 : vector<1x16x64xbf16> to vector<16x64xbf16>
    %c16 = arith.constant 16 : index
    %c0_10 = arith.constant 0 : index
    %27 = vector.load %arg15[%c16, %c0_10] : memref<40x64xbf16, #tpu.memory_space<vmem>>, vector<16x64xbf16>
    tpu.vector_store %arg15[%c16, %c0_10], %26 {strides = array<i32>} : memref<40x64xbf16, #tpu.memory_space<vmem>>, vector<16x64xbf16>,
    %c11 = arith.constant 11 : index
    %c0_11 = arith.constant 0 : index
    %28 = vector.load %arg15[%c11, %c0_11] : memref<40x64xbf16, #tpu.memory_space<vmem>>, vector<16x64xbf16>
    %cst_12 = arith.constant 0.000000e+00 : bf16
    %29 = vector.broadcast %cst_12 : bf16 to vector<16x64xbf16>
    %30 = vector.shape_cast %22 : vector<16x1xi1> to vector<16x1xi1>
    %31 = vector.broadcast %30 : vector<16x1xi1> to vector<16x64xi1>
    %32 = arith.select %31, %28, %29 : vector<16x64xi1>, vector<16x64xbf16>
    %c0_13 = arith.constant 0 : index
    %c0_14 = arith.constant 0 : index
    %33 = vector.load %arg16[%c0_13, %c0_14] : memref<16x576xbf16, #tpu.memory_space<vmem>>, vector<16x64xbf16>
    tpu.vector_store %arg16[%c0_13, %c0_14], %32 {strides = array<i32>} : memref<16x576xbf16, #tpu.memory_space<vmem>>, vector<16x64xbf16>,
    %c12 = arith.constant 12 : index
    %c0_15 = arith.constant 0 : index
    %34 = vector.load %arg15[%c12, %c0_15] : memref<40x64xbf16, #tpu.memory_space<vmem>>, vector<16x64xbf16>
    %c0_16 = arith.constant 0 : index
    %c64 = arith.constant 64 : index
    %35 = vector.load %arg16[%c0_16, %c64] : memref<16x576xbf16, #tpu.memory_space<vmem>>, vector<16x64xbf16>
    tpu.vector_store %arg16[%c0_16, %c64], %34 {strides = array<i32>} : memref<16x576xbf16, #tpu.memory_space<vmem>>, vector<16x64xbf16>,
    %c13 = arith.constant 13 : index
    %c0_17 = arith.constant 0 : index
    %36 = vector.load %arg15[%c13, %c0_17] : memref<40x64xbf16, #tpu.memory_space<vmem>>, vector<16x64xbf16>
    %cst_18 = arith.constant 0.000000e+00 : bf16
    %37 = vector.broadcast %cst_18 : bf16 to vector<16x64xbf16>
    %38 = vector.shape_cast %24 : vector<16x1xi1> to vector<16x1xi1>
    %39 = vector.broadcast %38 : vector<16x1xi1> to vector<16x64xi1>
    %40 = arith.select %39, %36, %37 : vector<16x64xi1>, vector<16x64xbf16>
    %c0_19 = arith.constant 0 : index
    %c128 = arith.constant 128 : index
    %41 = vector.load %arg16[%c0_19, %c128] : memref<16x576xbf16, #tpu.memory_space<vmem>>, vector<16x64xbf16>
    tpu.vector_store %arg16[%c0_19, %c128], %40 {strides = array<i32>} : memref<16x576xbf16, #tpu.memory_space<vmem>>, vector<16x64xbf16>,
    %c15 = arith.constant 15 : index
    %c0_20 = arith.constant 0 : index
    %42 = vector.load %arg15[%c15, %c0_20] : memref<40x64xbf16, #tpu.memory_space<vmem>>, vector<16x64xbf16>
    %cst_21 = arith.constant 0.000000e+00 : bf16
    %43 = vector.broadcast %cst_21 : bf16 to vector<16x64xbf16>
    %44 = vector.shape_cast %22 : vector<16x1xi1> to vector<16x1xi1>
    %45 = vector.broadcast %44 : vector<16x1xi1> to vector<16x64xi1>
    %46 = arith.select %45, %42, %43 : vector<16x64xi1>, vector<16x64xbf16>
    %c0_22 = arith.constant 0 : index
    %c192 = arith.constant 192 : index
    %47 = vector.load %arg16[%c0_22, %c192] : memref<16x576xbf16, #tpu.memory_space<vmem>>, vector<16x64xbf16>
    tpu.vector_store %arg16[%c0_22, %c192], %46 {strides = array<i32>} : memref<16x576xbf16, #tpu.memory_space<vmem>>, vector<16x64xbf16>,
    %c16_23 = arith.constant 16 : index
    %c0_24 = arith.constant 0 : index
    %48 = vector.load %arg15[%c16_23, %c0_24] : memref<40x64xbf16, #tpu.memory_space<vmem>>, vector<16x64xbf16>
    %c0_25 = arith.constant 0 : index
    %c256 = arith.constant 256 : index
    %49 = vector.load %arg16[%c0_25, %c256] : memref<16x576xbf16, #tpu.memory_space<vmem>>, vector<16x64xbf16>
    tpu.vector_store %arg16[%c0_25, %c256], %48 {strides = array<i32>} : memref<16x576xbf16, #tpu.memory_space<vmem>>, vector<16x64xbf16>,
    %c17 = arith.constant 17 : index
    %c0_26 = arith.constant 0 : index
    %50 = vector.load %arg15[%c17, %c0_26] : memref<40x64xbf16, #tpu.memory_space<vmem>>, vector<16x64xbf16>
    %cst_27 = arith.constant 0.000000e+00 : bf16
    %51 = vector.broadcast %cst_27 : bf16 to vector<16x64xbf16>
    %52 = vector.shape_cast %24 : vector<16x1xi1> to vector<16x1xi1>
    %53 = vector.broadcast %52 : vector<16x1xi1> to vector<16x64xi1>
    %54 = arith.select %53, %50, %51 : vector<16x64xi1>, vector<16x64xbf16>
    %c0_28 = arith.constant 0 : index
    %c320 = arith.constant 320 : index
    %55 = vector.load %arg16[%c0_28, %c320] : memref<16x576xbf16, #tpu.memory_space<vmem>>, vector<16x64xbf16>
    tpu.vector_store %arg16[%c0_28, %c320], %54 {strides = array<i32>} : memref<16x576xbf16, #tpu.memory_space<vmem>>, vector<16x64xbf16>,
    %c19 = arith.constant 19 : index
    %c0_29 = arith.constant 0 : index
    %56 = vector.load %arg15[%c19, %c0_29] : memref<40x64xbf16, #tpu.memory_space<vmem>>, vector<16x64xbf16>
    %cst_30 = arith.constant 0.000000e+00 : bf16
    %57 = vector.broadcast %cst_30 : bf16 to vector<16x64xbf16>
    %58 = vector.shape_cast %22 : vector<16x1xi1> to vector<16x1xi1>
    %59 = vector.broadcast %58 : vector<16x1xi1> to vector<16x64xi1>
    %60 = arith.select %59, %56, %57 : vector<16x64xi1>, vector<16x64xbf16>
    %c0_31 = arith.constant 0 : index
    %c384 = arith.constant 384 : index
    %61 = vector.load %arg16[%c0_31, %c384] : memref<16x576xbf16, #tpu.memory_space<vmem>>, vector<16x64xbf16>
    tpu.vector_store %arg16[%c0_31, %c384], %60 {strides = array<i32>} : memref<16x576xbf16, #tpu.memory_space<vmem>>, vector<16x64xbf16>,
    %c20 = arith.constant 20 : index
    %c0_32 = arith.constant 0 : index
    %62 = vector.load %arg15[%c20, %c0_32] : memref<40x64xbf16, #tpu.memory_space<vmem>>, vector<16x64xbf16>
    %c0_33 = arith.constant 0 : index
    %c448 = arith.constant 448 : index
    %63 = vector.load %arg16[%c0_33, %c448] : memref<16x576xbf16, #tpu.memory_space<vmem>>, vector<16x64xbf16>
    tpu.vector_store %arg16[%c0_33, %c448], %62 {strides = array<i32>} : memref<16x576xbf16, #tpu.memory_space<vmem>>, vector<16x64xbf16>,
    %c21 = arith.constant 21 : index
    %c0_34 = arith.constant 0 : index
    %64 = vector.load %arg15[%c21, %c0_34] : memref<40x64xbf16, #tpu.memory_space<vmem>>, vector<16x64xbf16>
    %cst_35 = arith.constant 0.000000e+00 : bf16
    %65 = vector.broadcast %cst_35 : bf16 to vector<16x64xbf16>
    %66 = vector.shape_cast %24 : vector<16x1xi1> to vector<16x1xi1>
    %67 = vector.broadcast %66 : vector<16x1xi1> to vector<16x64xi1>
    %68 = arith.select %67, %64, %65 : vector<16x64xi1>, vector<16x64xbf16>
    %c0_36 = arith.constant 0 : index
    %c512 = arith.constant 512 : index
    %69 = vector.load %arg16[%c0_36, %c512] : memref<16x576xbf16, #tpu.memory_space<vmem>>, vector<16x64xbf16>
    tpu.vector_store %arg16[%c0_36, %c512], %68 {strides = array<i32>} : memref<16x576xbf16, #tpu.memory_space<vmem>>, vector<16x64xbf16>,
    %c0_37 = arith.constant 0 : index
    %c0_38 = arith.constant 0 : index
    %70 = vector.load %arg16[%c0_37, %c0_38] : memref<16x576xbf16, #tpu.memory_space<vmem>>, vector<16x576xbf16>
    %c0_39 = arith.constant 0 : index
    %c0_40 = arith.constant 0 : index
    %71 = vector.load %arg2[%c0_39, %c0_40] : memref<576x32xbf16, #tpu.memory_space<vmem>>, vector<576x32xbf16>
    %cst_41 = arith.constant dense<0.000000e+00> : vector<16x32xf32>
    %72 = tpu.matmul %70, %71, %cst_41 {dimension_numbers = #tpu.dot_dimension_numbers<[1], [0], [0], [1], [0, 0, 1, 1], [], []>} : vector<16x576xbf16>, vector<576x32xbf16>, vector<16x32xf32> -> vector<16x32xf32>
    %c0_42 = arith.constant 0 : index
    %c0_43 = arith.constant 0 : index
    %73 = vector.load %arg3[%c0_42, %c0_43] : memref<1x32xf32, #tpu.memory_space<vmem>>, vector<1x32xf32>
    %74 = vector.broadcast %73 : vector<1x32xf32> to vector<16x32xf32>
    %75 = arith.addf %72, %74 : vector<16x32xf32>
    %cst_44 = arith.constant 0.000000e+00 : f32
    %76 = vector.broadcast %cst_44 : f32 to vector<16x32xf32>
    %77 = arith.maximumf %75, %76 : vector<16x32xf32>
    %78 = arith.truncf %77 : vector<16x32xf32> to vector<16x32xbf16>
    %c16_45 = arith.constant 16 : index
    %c0_46 = arith.constant 0 : index
    %79 = vector.load %arg15[%c16_45, %c0_46] : memref<40x64xbf16, #tpu.memory_space<vmem>>, vector<16x32xbf16>
    tpu.vector_store %arg15[%c16_45, %c0_46], %78 {strides = array<i32>} : memref<40x64xbf16, #tpu.memory_space<vmem>>, vector<16x32xbf16>,
    %c11_47 = arith.constant 11 : index
    %c0_48 = arith.constant 0 : index
    %80 = vector.load %arg15[%c11_47, %c0_48] : memref<40x64xbf16, #tpu.memory_space<vmem>>, vector<16x32xbf16>
    %cst_49 = arith.constant 0.000000e+00 : bf16
    %81 = vector.broadcast %cst_49 : bf16 to vector<16x32xbf16>
    %82 = vector.shape_cast %22 : vector<16x1xi1> to vector<16x1xi1>
    %83 = vector.broadcast %82 : vector<16x1xi1> to vector<16x32xi1>
    %84 = arith.select %83, %80, %81 : vector<16x32xi1>, vector<16x32xbf16>
    %c0_50 = arith.constant 0 : index
    %c0_51 = arith.constant 0 : index
    %85 = vector.load %arg16[%c0_50, %c0_51] : memref<16x576xbf16, #tpu.memory_space<vmem>>, vector<16x32xbf16>
    tpu.vector_store %arg16[%c0_50, %c0_51], %84 {strides = array<i32>} : memref<16x576xbf16, #tpu.memory_space<vmem>>, vector<16x32xbf16>,
    %c12_52 = arith.constant 12 : index
    %c0_53 = arith.constant 0 : index
    %86 = vector.load %arg15[%c12_52, %c0_53] : memref<40x64xbf16, #tpu.memory_space<vmem>>, vector<16x32xbf16>
    %c0_54 = arith.constant 0 : index
    %c32_55 = arith.constant 32 : index
    %87 = vector.load %arg16[%c0_54, %c32_55] : memref<16x576xbf16, #tpu.memory_space<vmem>>, vector<16x32xbf16>
    tpu.vector_store %arg16[%c0_54, %c32_55], %86 {strides = array<i32>} : memref<16x576xbf16, #tpu.memory_space<vmem>>, vector<16x32xbf16>,
    %c13_56 = arith.constant 13 : index
    %c0_57 = arith.constant 0 : index
    %88 = vector.load %arg15[%c13_56, %c0_57] : memref<40x64xbf16, #tpu.memory_space<vmem>>, vector<16x32xbf16>
    %cst_58 = arith.constant 0.000000e+00 : bf16
    %89 = vector.broadcast %cst_58 : bf16 to vector<16x32xbf16>
    %90 = vector.shape_cast %24 : vector<16x1xi1> to vector<16x1xi1>
    %91 = vector.broadcast %90 : vector<16x1xi1> to vector<16x32xi1>
    %92 = arith.select %91, %88, %89 : vector<16x32xi1>, vector<16x32xbf16>
    %c0_59 = arith.constant 0 : index
    %c64_60 = arith.constant 64 : index
    %93 = vector.load %arg16[%c0_59, %c64_60] : memref<16x576xbf16, #tpu.memory_space<vmem>>, vector<16x32xbf16>
    tpu.vector_store %arg16[%c0_59, %c64_60], %92 {strides = array<i32>} : memref<16x576xbf16, #tpu.memory_space<vmem>>, vector<16x32xbf16>,
    %c15_61 = arith.constant 15 : index
    %c0_62 = arith.constant 0 : index
    %94 = vector.load %arg15[%c15_61, %c0_62] : memref<40x64xbf16, #tpu.memory_space<vmem>>, vector<16x32xbf16>
    %cst_63 = arith.constant 0.000000e+00 : bf16
    %95 = vector.broadcast %cst_63 : bf16 to vector<16x32xbf16>
    %96 = vector.shape_cast %22 : vector<16x1xi1> to vector<16x1xi1>
    %97 = vector.broadcast %96 : vector<16x1xi1> to vector<16x32xi1>
    %98 = arith.select %97, %94, %95 : vector<16x32xi1>, vector<16x32xbf16>
    %c0_64 = arith.constant 0 : index
    %c96 = arith.constant 96 : index
    %99 = vector.load %arg16[%c0_64, %c96] : memref<16x576xbf16, #tpu.memory_space<vmem>>, vector<16x32xbf16>
    tpu.vector_store %arg16[%c0_64, %c96], %98 {strides = array<i32>} : memref<16x576xbf16, #tpu.memory_space<vmem>>, vector<16x32xbf16>,
    %c16_65 = arith.constant 16 : index
    %c0_66 = arith.constant 0 : index
    %100 = vector.load %arg15[%c16_65, %c0_66] : memref<40x64xbf16, #tpu.memory_space<vmem>>, vector<16x32xbf16>
    %c0_67 = arith.constant 0 : index
    %c128_68 = arith.constant 128 : index
    %101 = vector.load %arg16[%c0_67, %c128_68] : memref<16x576xbf16, #tpu.memory_space<vmem>>, vector<16x32xbf16>
    tpu.vector_store %arg16[%c0_67, %c128_68], %100 {strides = array<i32>} : memref<16x576xbf16, #tpu.memory_space<vmem>>, vector<16x32xbf16>,
    %c17_69 = arith.constant 17 : index
    %c0_70 = arith.constant 0 : index
    %102 = vector.load %arg15[%c17_69, %c0_70] : memref<40x64xbf16, #tpu.memory_space<vmem>>, vector<16x32xbf16>
    %cst_71 = arith.constant 0.000000e+00 : bf16
    %103 = vector.broadcast %cst_71 : bf16 to vector<16x32xbf16>
    %104 = vector.shape_cast %24 : vector<16x1xi1> to vector<16x1xi1>
    %105 = vector.broadcast %104 : vector<16x1xi1> to vector<16x32xi1>
    %106 = arith.select %105, %102, %103 : vector<16x32xi1>, vector<16x32xbf16>
    %c0_72 = arith.constant 0 : index
    %c160 = arith.constant 160 : index
    %107 = vector.load %arg16[%c0_72, %c160] : memref<16x576xbf16, #tpu.memory_space<vmem>>, vector<16x32xbf16>
    tpu.vector_store %arg16[%c0_72, %c160], %106 {strides = array<i32>} : memref<16x576xbf16, #tpu.memory_space<vmem>>, vector<16x32xbf16>,
    %c19_73 = arith.constant 19 : index
    %c0_74 = arith.constant 0 : index
    %108 = vector.load %arg15[%c19_73, %c0_74] : memref<40x64xbf16, #tpu.memory_space<vmem>>, vector<16x32xbf16>
    %cst_75 = arith.constant 0.000000e+00 : bf16
    %109 = vector.broadcast %cst_75 : bf16 to vector<16x32xbf16>
    %110 = vector.shape_cast %22 : vector<16x1xi1> to vector<16x1xi1>
    %111 = vector.broadcast %110 : vector<16x1xi1> to vector<16x32xi1>
    %112 = arith.select %111, %108, %109 : vector<16x32xi1>, vector<16x32xbf16>
    %c0_76 = arith.constant 0 : index
    %c192_77 = arith.constant 192 : index
    %113 = vector.load %arg16[%c0_76, %c192_77] : memref<16x576xbf16, #tpu.memory_space<vmem>>, vector<16x32xbf16>
    tpu.vector_store %arg16[%c0_76, %c192_77], %112 {strides = array<i32>} : memref<16x576xbf16, #tpu.memory_space<vmem>>, vector<16x32xbf16>,
    %c20_78 = arith.constant 20 : index
    %c0_79 = arith.constant 0 : index
    %114 = vector.load %arg15[%c20_78, %c0_79] : memref<40x64xbf16, #tpu.memory_space<vmem>>, vector<16x32xbf16>
    %c0_80 = arith.constant 0 : index
    %c224 = arith.constant 224 : index
    %115 = vector.load %arg16[%c0_80, %c224] : memref<16x576xbf16, #tpu.memory_space<vmem>>, vector<16x32xbf16>
    tpu.vector_store %arg16[%c0_80, %c224], %114 {strides = array<i32>} : memref<16x576xbf16, #tpu.memory_space<vmem>>, vector<16x32xbf16>,
    %c21_81 = arith.constant 21 : index
    %c0_82 = arith.constant 0 : index
    %116 = vector.load %arg15[%c21_81, %c0_82] : memref<40x64xbf16, #tpu.memory_space<vmem>>, vector<16x32xbf16>
    %cst_83 = arith.constant 0.000000e+00 : bf16
    %117 = vector.broadcast %cst_83 : bf16 to vector<16x32xbf16>
    %118 = vector.shape_cast %24 : vector<16x1xi1> to vector<16x1xi1>
    %119 = vector.broadcast %118 : vector<16x1xi1> to vector<16x32xi1>
    %120 = arith.select %119, %116, %117 : vector<16x32xi1>, vector<16x32xbf16>
    %c0_84 = arith.constant 0 : index
    %c256_85 = arith.constant 256 : index
    %121 = vector.load %arg16[%c0_84, %c256_85] : memref<16x576xbf16, #tpu.memory_space<vmem>>, vector<16x32xbf16>
    tpu.vector_store %arg16[%c0_84, %c256_85], %120 {strides = array<i32>} : memref<16x576xbf16, #tpu.memory_space<vmem>>, vector<16x32xbf16>,
    %c0_86 = arith.constant 0 : index
    %c0_87 = arith.constant 0 : index
    %122 = vector.load %arg16[%c0_86, %c0_87] : memref<16x576xbf16, #tpu.memory_space<vmem>>, vector<16x288xbf16>
    %c0_88 = arith.constant 0 : index
    %c0_89 = arith.constant 0 : index
    %123 = vector.load %arg4[%c0_88, %c0_89] : memref<288x32xbf16, #tpu.memory_space<vmem>>, vector<288x32xbf16>
    %cst_90 = arith.constant dense<0.000000e+00> : vector<16x32xf32>
    %124 = tpu.matmul %122, %123, %cst_90 {dimension_numbers = #tpu.dot_dimension_numbers<[1], [0], [0], [1], [0, 0, 1, 1], [], []>} : vector<16x288xbf16>, vector<288x32xbf16>, vector<16x32xf32> -> vector<16x32xf32>
    %c0_91 = arith.constant 0 : index
    %c0_92 = arith.constant 0 : index
    %125 = vector.load %arg5[%c0_91, %c0_92] : memref<1x32xf32, #tpu.memory_space<vmem>>, vector<1x32xf32>
    %126 = vector.broadcast %125 : vector<1x32xf32> to vector<16x32xf32>
    %127 = arith.addf %124, %126 : vector<16x32xf32>
    %128 = arith.truncf %127 : vector<16x32xf32> to vector<16x32xbf16>
    %cst_93 = arith.constant 0.000000e+00 : bf16
    %129 = vector.broadcast %cst_93 : bf16 to vector<16x32xbf16>
    %130 = arith.maximumf %128, %129 : vector<16x32xbf16>
    %c16_94 = arith.constant 16 : index
    %c0_95 = arith.constant 0 : index
    %131 = vector.load %arg15[%c16_94, %c0_95] : memref<40x64xbf16, #tpu.memory_space<vmem>>, vector<16x32xbf16>
    tpu.vector_store %arg15[%c16_94, %c0_95], %130 {strides = array<i32>} : memref<40x64xbf16, #tpu.memory_space<vmem>>, vector<16x32xbf16>,
    %c11_96 = arith.constant 11 : index
    %c0_97 = arith.constant 0 : index
    %132 = vector.load %arg15[%c11_96, %c0_97] : memref<40x64xbf16, #tpu.memory_space<vmem>>, vector<16x32xbf16>
    %cst_98 = arith.constant 0.000000e+00 : bf16
    %133 = vector.broadcast %cst_98 : bf16 to vector<16x32xbf16>
    %134 = vector.shape_cast %22 : vector<16x1xi1> to vector<16x1xi1>
    %135 = vector.broadcast %134 : vector<16x1xi1> to vector<16x32xi1>
    %136 = arith.select %135, %132, %133 : vector<16x32xi1>, vector<16x32xbf16>
    %c0_99 = arith.constant 0 : index
    %c0_100 = arith.constant 0 : index
    %137 = vector.load %arg16[%c0_99, %c0_100] : memref<16x576xbf16, #tpu.memory_space<vmem>>, vector<16x32xbf16>
    tpu.vector_store %arg16[%c0_99, %c0_100], %136 {strides = array<i32>} : memref<16x576xbf16, #tpu.memory_space<vmem>>, vector<16x32xbf16>,
    %c12_101 = arith.constant 12 : index
    %c0_102 = arith.constant 0 : index
    %138 = vector.load %arg15[%c12_101, %c0_102] : memref<40x64xbf16, #tpu.memory_space<vmem>>, vector<16x32xbf16>
    %c0_103 = arith.constant 0 : index
    %c32_104 = arith.constant 32 : index
    %139 = vector.load %arg16[%c0_103, %c32_104] : memref<16x576xbf16, #tpu.memory_space<vmem>>, vector<16x32xbf16>
    tpu.vector_store %arg16[%c0_103, %c32_104], %138 {strides = array<i32>} : memref<16x576xbf16, #tpu.memory_space<vmem>>, vector<16x32xbf16>,
    %c13_105 = arith.constant 13 : index
    %c0_106 = arith.constant 0 : index
    %140 = vector.load %arg15[%c13_105, %c0_106] : memref<40x64xbf16, #tpu.memory_space<vmem>>, vector<16x32xbf16>
    %cst_107 = arith.constant 0.000000e+00 : bf16
    %141 = vector.broadcast %cst_107 : bf16 to vector<16x32xbf16>
    %142 = vector.shape_cast %24 : vector<16x1xi1> to vector<16x1xi1>
    %143 = vector.broadcast %142 : vector<16x1xi1> to vector<16x32xi1>
    %144 = arith.select %143, %140, %141 : vector<16x32xi1>, vector<16x32xbf16>
    %c0_108 = arith.constant 0 : index
    %c64_109 = arith.constant 64 : index
    %145 = vector.load %arg16[%c0_108, %c64_109] : memref<16x576xbf16, #tpu.memory_space<vmem>>, vector<16x32xbf16>
    tpu.vector_store %arg16[%c0_108, %c64_109], %144 {strides = array<i32>} : memref<16x576xbf16, #tpu.memory_space<vmem>>, vector<16x32xbf16>,
    %c15_110 = arith.constant 15 : index
    %c0_111 = arith.constant 0 : index
    %146 = vector.load %arg15[%c15_110, %c0_111] : memref<40x64xbf16, #tpu.memory_space<vmem>>, vector<16x32xbf16>
    %cst_112 = arith.constant 0.000000e+00 : bf16
    %147 = vector.broadcast %cst_112 : bf16 to vector<16x32xbf16>
    %148 = vector.shape_cast %22 : vector<16x1xi1> to vector<16x1xi1>
    %149 = vector.broadcast %148 : vector<16x1xi1> to vector<16x32xi1>
    %150 = arith.select %149, %146, %147 : vector<16x32xi1>, vector<16x32xbf16>
    %c0_113 = arith.constant 0 : index
    %c96_114 = arith.constant 96 : index
    %151 = vector.load %arg16[%c0_113, %c96_114] : memref<16x576xbf16, #tpu.memory_space<vmem>>, vector<16x32xbf16>
    tpu.vector_store %arg16[%c0_113, %c96_114], %150 {strides = array<i32>} : memref<16x576xbf16, #tpu.memory_space<vmem>>, vector<16x32xbf16>,
    %c16_115 = arith.constant 16 : index
    %c0_116 = arith.constant 0 : index
    %152 = vector.load %arg15[%c16_115, %c0_116] : memref<40x64xbf16, #tpu.memory_space<vmem>>, vector<16x32xbf16>
    %c0_117 = arith.constant 0 : index
    %c128_118 = arith.constant 128 : index
    %153 = vector.load %arg16[%c0_117, %c128_118] : memref<16x576xbf16, #tpu.memory_space<vmem>>, vector<16x32xbf16>
    tpu.vector_store %arg16[%c0_117, %c128_118], %152 {strides = array<i32>} : memref<16x576xbf16, #tpu.memory_space<vmem>>, vector<16x32xbf16>,
    %c17_119 = arith.constant 17 : index
    %c0_120 = arith.constant 0 : index
    %154 = vector.load %arg15[%c17_119, %c0_120] : memref<40x64xbf16, #tpu.memory_space<vmem>>, vector<16x32xbf16>
    %cst_121 = arith.constant 0.000000e+00 : bf16
    %155 = vector.broadcast %cst_121 : bf16 to vector<16x32xbf16>
    %156 = vector.shape_cast %24 : vector<16x1xi1> to vector<16x1xi1>
    %157 = vector.broadcast %156 : vector<16x1xi1> to vector<16x32xi1>
    %158 = arith.select %157, %154, %155 : vector<16x32xi1>, vector<16x32xbf16>
    %c0_122 = arith.constant 0 : index
    %c160_123 = arith.constant 160 : index
    %159 = vector.load %arg16[%c0_122, %c160_123] : memref<16x576xbf16, #tpu.memory_space<vmem>>, vector<16x32xbf16>
    tpu.vector_store %arg16[%c0_122, %c160_123], %158 {strides = array<i32>} : memref<16x576xbf16, #tpu.memory_space<vmem>>, vector<16x32xbf16>,
    %c19_124 = arith.constant 19 : index
    %c0_125 = arith.constant 0 : index
    %160 = vector.load %arg15[%c19_124, %c0_125] : memref<40x64xbf16, #tpu.memory_space<vmem>>, vector<16x32xbf16>
    %cst_126 = arith.constant 0.000000e+00 : bf16
    %161 = vector.broadcast %cst_126 : bf16 to vector<16x32xbf16>
    %162 = vector.shape_cast %22 : vector<16x1xi1> to vector<16x1xi1>
    %163 = vector.broadcast %162 : vector<16x1xi1> to vector<16x32xi1>
    %164 = arith.select %163, %160, %161 : vector<16x32xi1>, vector<16x32xbf16>
    %c0_127 = arith.constant 0 : index
    %c192_128 = arith.constant 192 : index
    %165 = vector.load %arg16[%c0_127, %c192_128] : memref<16x576xbf16, #tpu.memory_space<vmem>>, vector<16x32xbf16>
    tpu.vector_store %arg16[%c0_127, %c192_128], %164 {strides = array<i32>} : memref<16x576xbf16, #tpu.memory_space<vmem>>, vector<16x32xbf16>,
    %c20_129 = arith.constant 20 : index
    %c0_130 = arith.constant 0 : index
    %166 = vector.load %arg15[%c20_129, %c0_130] : memref<40x64xbf16, #tpu.memory_space<vmem>>, vector<16x32xbf16>
    %c0_131 = arith.constant 0 : index
    %c224_132 = arith.constant 224 : index
    %167 = vector.load %arg16[%c0_131, %c224_132] : memref<16x576xbf16, #tpu.memory_space<vmem>>, vector<16x32xbf16>
    tpu.vector_store %arg16[%c0_131, %c224_132], %166 {strides = array<i32>} : memref<16x576xbf16, #tpu.memory_space<vmem>>, vector<16x32xbf16>,
    %c21_133 = arith.constant 21 : index
    %c0_134 = arith.constant 0 : index
    %168 = vector.load %arg15[%c21_133, %c0_134] : memref<40x64xbf16, #tpu.memory_space<vmem>>, vector<16x32xbf16>
    %cst_135 = arith.constant 0.000000e+00 : bf16
    %169 = vector.broadcast %cst_135 : bf16 to vector<16x32xbf16>
    %170 = vector.shape_cast %24 : vector<16x1xi1> to vector<16x1xi1>
    %171 = vector.broadcast %170 : vector<16x1xi1> to vector<16x32xi1>
    %172 = arith.select %171, %168, %169 : vector<16x32xi1>, vector<16x32xbf16>
    %c0_136 = arith.constant 0 : index
    %c256_137 = arith.constant 256 : index
    %173 = vector.load %arg16[%c0_136, %c256_137] : memref<16x576xbf16, #tpu.memory_space<vmem>>, vector<16x32xbf16>
    tpu.vector_store %arg16[%c0_136, %c256_137], %172 {strides = array<i32>} : memref<16x576xbf16, #tpu.memory_space<vmem>>, vector<16x32xbf16>,
    %c0_138 = arith.constant 0 : index
    %c0_139 = arith.constant 0 : index
    %174 = vector.load %arg16[%c0_138, %c0_139] : memref<16x576xbf16, #tpu.memory_space<vmem>>, vector<16x288xbf16>
    %c0_140 = arith.constant 0 : index
    %c0_141 = arith.constant 0 : index
    %175 = vector.load %arg6[%c0_140, %c0_141] : memref<288x8xbf16, #tpu.memory_space<vmem>>, vector<288x8xbf16>
    %cst_142 = arith.constant dense<0.000000e+00> : vector<16x8xf32>
    %176 = tpu.matmul %174, %175, %cst_142 {dimension_numbers = #tpu.dot_dimension_numbers<[1], [0], [0], [1], [0, 0, 1, 1], [], []>} : vector<16x288xbf16>, vector<288x8xbf16>, vector<16x8xf32> -> vector<16x8xf32>
    %c0_143 = arith.constant 0 : index
    %c0_144 = arith.constant 0 : index
    %177 = vector.load %arg7[%c0_143, %c0_144] : memref<1x8xf32, #tpu.memory_space<vmem>>, vector<1x8xf32>
    %178 = vector.broadcast %177 : vector<1x8xf32> to vector<16x8xf32>
    %179 = arith.addf %176, %178 : vector<16x8xf32>
    %cst_145 = arith.constant 0.000000e+00 : f32
    %180 = vector.broadcast %cst_145 : f32 to vector<16x8xf32>
    %181 = arith.maximumf %179, %180 : vector<16x8xf32>
    %182 = arith.truncf %181 : vector<16x8xf32> to vector<16x8xbf16>
    %c0_146 = arith.constant 0 : index
    %c0_147 = arith.constant 0 : index
    %183 = vector.load %arg8[%c0_146, %c0_147] : memref<8x32xbf16, #tpu.memory_space<vmem>>, vector<8x32xbf16>
    %cst_148 = arith.constant dense<0.000000e+00> : vector<16x32xf32>
    %184 = tpu.matmul %182, %183, %cst_148 {dimension_numbers = #tpu.dot_dimension_numbers<[1], [0], [0], [1], [0, 0, 1, 1], [], []>} : vector<16x8xbf16>, vector<8x32xbf16>, vector<16x32xf32> -> vector<16x32xf32>
    %c0_149 = arith.constant 0 : index
    %c0_150 = arith.constant 0 : index
    %185 = vector.load %arg9[%c0_149, %c0_150] : memref<1x32xf32, #tpu.memory_space<vmem>>, vector<1x32xf32>
    %186 = vector.broadcast %185 : vector<1x32xf32> to vector<16x32xf32>
    %187 = arith.addf %184, %186 : vector<16x32xf32>
    %188 = arith.extf %128 : vector<16x32xbf16> to vector<16x32xf32>
    %189 = arith.addf %187, %188 : vector<16x32xf32>
    %190 = arith.truncf %189 : vector<16x32xf32> to vector<16x32xbf16>
    %cst_151 = arith.constant 0.000000e+00 : bf16
    %191 = vector.broadcast %cst_151 : bf16 to vector<16x32xbf16>
    %192 = arith.maximumf %190, %191 : vector<16x32xbf16>
    %c16_152 = arith.constant 16 : index
    %c0_153 = arith.constant 0 : index
    %193 = vector.load %arg15[%c16_152, %c0_153] : memref<40x64xbf16, #tpu.memory_space<vmem>>, vector<16x32xbf16>
    tpu.vector_store %arg15[%c16_152, %c0_153], %192 {strides = array<i32>} : memref<40x64xbf16, #tpu.memory_space<vmem>>, vector<16x32xbf16>,
    %c11_154 = arith.constant 11 : index
    %c0_155 = arith.constant 0 : index
    %194 = vector.load %arg15[%c11_154, %c0_155] : memref<40x64xbf16, #tpu.memory_space<vmem>>, vector<16x32xbf16>
    %cst_156 = arith.constant 0.000000e+00 : bf16
    %195 = vector.broadcast %cst_156 : bf16 to vector<16x32xbf16>
    %196 = vector.shape_cast %22 : vector<16x1xi1> to vector<16x1xi1>
    %197 = vector.broadcast %196 : vector<16x1xi1> to vector<16x32xi1>
    %198 = arith.select %197, %194, %195 : vector<16x32xi1>, vector<16x32xbf16>
    %c0_157 = arith.constant 0 : index
    %c0_158 = arith.constant 0 : index
    %199 = vector.load %arg16[%c0_157, %c0_158] : memref<16x576xbf16, #tpu.memory_space<vmem>>, vector<16x32xbf16>
    tpu.vector_store %arg16[%c0_157, %c0_158], %198 {strides = array<i32>} : memref<16x576xbf16, #tpu.memory_space<vmem>>, vector<16x32xbf16>,
    %c12_159 = arith.constant 12 : index
    %c0_160 = arith.constant 0 : index
    %200 = vector.load %arg15[%c12_159, %c0_160] : memref<40x64xbf16, #tpu.memory_space<vmem>>, vector<16x32xbf16>
    %c0_161 = arith.constant 0 : index
    %c32_162 = arith.constant 32 : index
    %201 = vector.load %arg16[%c0_161, %c32_162] : memref<16x576xbf16, #tpu.memory_space<vmem>>, vector<16x32xbf16>
    tpu.vector_store %arg16[%c0_161, %c32_162], %200 {strides = array<i32>} : memref<16x576xbf16, #tpu.memory_space<vmem>>, vector<16x32xbf16>,
    %c13_163 = arith.constant 13 : index
    %c0_164 = arith.constant 0 : index
    %202 = vector.load %arg15[%c13_163, %c0_164] : memref<40x64xbf16, #tpu.memory_space<vmem>>, vector<16x32xbf16>
    %cst_165 = arith.constant 0.000000e+00 : bf16
    %203 = vector.broadcast %cst_165 : bf16 to vector<16x32xbf16>
    %204 = vector.shape_cast %24 : vector<16x1xi1> to vector<16x1xi1>
    %205 = vector.broadcast %204 : vector<16x1xi1> to vector<16x32xi1>
    %206 = arith.select %205, %202, %203 : vector<16x32xi1>, vector<16x32xbf16>
    %c0_166 = arith.constant 0 : index
    %c64_167 = arith.constant 64 : index
    %207 = vector.load %arg16[%c0_166, %c64_167] : memref<16x576xbf16, #tpu.memory_space<vmem>>, vector<16x32xbf16>
    tpu.vector_store %arg16[%c0_166, %c64_167], %206 {strides = array<i32>} : memref<16x576xbf16, #tpu.memory_space<vmem>>, vector<16x32xbf16>,
    %c15_168 = arith.constant 15 : index
    %c0_169 = arith.constant 0 : index
    %208 = vector.load %arg15[%c15_168, %c0_169] : memref<40x64xbf16, #tpu.memory_space<vmem>>, vector<16x32xbf16>
    %cst_170 = arith.constant 0.000000e+00 : bf16
    %209 = vector.broadcast %cst_170 : bf16 to vector<16x32xbf16>
    %210 = vector.shape_cast %22 : vector<16x1xi1> to vector<16x1xi1>
    %211 = vector.broadcast %210 : vector<16x1xi1> to vector<16x32xi1>
    %212 = arith.select %211, %208, %209 : vector<16x32xi1>, vector<16x32xbf16>
    %c0_171 = arith.constant 0 : index
    %c96_172 = arith.constant 96 : index
    %213 = vector.load %arg16[%c0_171, %c96_172] : memref<16x576xbf16, #tpu.memory_space<vmem>>, vector<16x32xbf16>
    tpu.vector_store %arg16[%c0_171, %c96_172], %212 {strides = array<i32>} : memref<16x576xbf16, #tpu.memory_space<vmem>>, vector<16x32xbf16>,
    %c16_173 = arith.constant 16 : index
    %c0_174 = arith.constant 0 : index
    %214 = vector.load %arg15[%c16_173, %c0_174] : memref<40x64xbf16, #tpu.memory_space<vmem>>, vector<16x32xbf16>
    %c0_175 = arith.constant 0 : index
    %c128_176 = arith.constant 128 : index
    %215 = vector.load %arg16[%c0_175, %c128_176] : memref<16x576xbf16, #tpu.memory_space<vmem>>, vector<16x32xbf16>
    tpu.vector_store %arg16[%c0_175, %c128_176], %214 {strides = array<i32>} : memref<16x576xbf16, #tpu.memory_space<vmem>>, vector<16x32xbf16>,
    %c17_177 = arith.constant 17 : index
    %c0_178 = arith.constant 0 : index
    %216 = vector.load %arg15[%c17_177, %c0_178] : memref<40x64xbf16, #tpu.memory_space<vmem>>, vector<16x32xbf16>
    %cst_179 = arith.constant 0.000000e+00 : bf16
    %217 = vector.broadcast %cst_179 : bf16 to vector<16x32xbf16>
    %218 = vector.shape_cast %24 : vector<16x1xi1> to vector<16x1xi1>
    %219 = vector.broadcast %218 : vector<16x1xi1> to vector<16x32xi1>
    %220 = arith.select %219, %216, %217 : vector<16x32xi1>, vector<16x32xbf16>
    %c0_180 = arith.constant 0 : index
    %c160_181 = arith.constant 160 : index
    %221 = vector.load %arg16[%c0_180, %c160_181] : memref<16x576xbf16, #tpu.memory_space<vmem>>, vector<16x32xbf16>
    tpu.vector_store %arg16[%c0_180, %c160_181], %220 {strides = array<i32>} : memref<16x576xbf16, #tpu.memory_space<vmem>>, vector<16x32xbf16>,
    %c19_182 = arith.constant 19 : index
    %c0_183 = arith.constant 0 : index
    %222 = vector.load %arg15[%c19_182, %c0_183] : memref<40x64xbf16, #tpu.memory_space<vmem>>, vector<16x32xbf16>
    %cst_184 = arith.constant 0.000000e+00 : bf16
    %223 = vector.broadcast %cst_184 : bf16 to vector<16x32xbf16>
    %224 = vector.shape_cast %22 : vector<16x1xi1> to vector<16x1xi1>
    %225 = vector.broadcast %224 : vector<16x1xi1> to vector<16x32xi1>
    %226 = arith.select %225, %222, %223 : vector<16x32xi1>, vector<16x32xbf16>
    %c0_185 = arith.constant 0 : index
    %c192_186 = arith.constant 192 : index
    %227 = vector.load %arg16[%c0_185, %c192_186] : memref<16x576xbf16, #tpu.memory_space<vmem>>, vector<16x32xbf16>
    tpu.vector_store %arg16[%c0_185, %c192_186], %226 {strides = array<i32>} : memref<16x576xbf16, #tpu.memory_space<vmem>>, vector<16x32xbf16>,
    %c20_187 = arith.constant 20 : index
    %c0_188 = arith.constant 0 : index
    %228 = vector.load %arg15[%c20_187, %c0_188] : memref<40x64xbf16, #tpu.memory_space<vmem>>, vector<16x32xbf16>
    %c0_189 = arith.constant 0 : index
    %c224_190 = arith.constant 224 : index
    %229 = vector.load %arg16[%c0_189, %c224_190] : memref<16x576xbf16, #tpu.memory_space<vmem>>, vector<16x32xbf16>
    tpu.vector_store %arg16[%c0_189, %c224_190], %228 {strides = array<i32>} : memref<16x576xbf16, #tpu.memory_space<vmem>>, vector<16x32xbf16>,
    %c21_191 = arith.constant 21 : index
    %c0_192 = arith.constant 0 : index
    %230 = vector.load %arg15[%c21_191, %c0_192] : memref<40x64xbf16, #tpu.memory_space<vmem>>, vector<16x32xbf16>
    %cst_193 = arith.constant 0.000000e+00 : bf16
    %231 = vector.broadcast %cst_193 : bf16 to vector<16x32xbf16>
    %232 = vector.shape_cast %24 : vector<16x1xi1> to vector<16x1xi1>
    %233 = vector.broadcast %232 : vector<16x1xi1> to vector<16x32xi1>
    %234 = arith.select %233, %230, %231 : vector<16x32xi1>, vector<16x32xbf16>
    %c0_194 = arith.constant 0 : index
    %c256_195 = arith.constant 256 : index
    %235 = vector.load %arg16[%c0_194, %c256_195] : memref<16x576xbf16, #tpu.memory_space<vmem>>, vector<16x32xbf16>
    tpu.vector_store %arg16[%c0_194, %c256_195], %234 {strides = array<i32>} : memref<16x576xbf16, #tpu.memory_space<vmem>>, vector<16x32xbf16>,
    %c0_196 = arith.constant 0 : index
    %c0_197 = arith.constant 0 : index
    %236 = vector.load %arg16[%c0_196, %c0_197] : memref<16x576xbf16, #tpu.memory_space<vmem>>, vector<16x288xbf16>
    %c0_198 = arith.constant 0 : index
    %c0_199 = arith.constant 0 : index
    %237 = vector.load %arg10[%c0_198, %c0_199] : memref<288x8xbf16, #tpu.memory_space<vmem>>, vector<288x8xbf16>
    %cst_200 = arith.constant dense<0.000000e+00> : vector<16x8xf32>
    %238 = tpu.matmul %236, %237, %cst_200 {dimension_numbers = #tpu.dot_dimension_numbers<[1], [0], [0], [1], [0, 0, 1, 1], [], []>} : vector<16x288xbf16>, vector<288x8xbf16>, vector<16x8xf32> -> vector<16x8xf32>
    %c0_201 = arith.constant 0 : index
    %c0_202 = arith.constant 0 : index
    %239 = vector.load %arg11[%c0_201, %c0_202] : memref<1x8xf32, #tpu.memory_space<vmem>>, vector<1x8xf32>
    %240 = vector.broadcast %239 : vector<1x8xf32> to vector<16x8xf32>
    %241 = arith.addf %238, %240 : vector<16x8xf32>
    %cst_203 = arith.constant 0.000000e+00 : f32
    %242 = vector.broadcast %cst_203 : f32 to vector<16x8xf32>
    %243 = arith.maximumf %241, %242 : vector<16x8xf32>
    %244 = arith.truncf %243 : vector<16x8xf32> to vector<16x8xbf16>
    %c0_204 = arith.constant 0 : index
    %c0_205 = arith.constant 0 : index
    %245 = vector.load %arg12[%c0_204, %c0_205] : memref<8x32xbf16, #tpu.memory_space<vmem>>, vector<8x32xbf16>
    %cst_206 = arith.constant dense<0.000000e+00> : vector<16x32xf32>
    %246 = tpu.matmul %244, %245, %cst_206 {dimension_numbers = #tpu.dot_dimension_numbers<[1], [0], [0], [1], [0, 0, 1, 1], [], []>} : vector<16x8xbf16>, vector<8x32xbf16>, vector<16x32xf32> -> vector<16x32xf32>
    %c0_207 = arith.constant 0 : index
    %c0_208 = arith.constant 0 : index
    %247 = vector.load %arg13[%c0_207, %c0_208] : memref<1x32xf32, #tpu.memory_space<vmem>>, vector<1x32xf32>
    %248 = vector.broadcast %247 : vector<1x32xf32> to vector<16x32xf32>
    %249 = arith.addf %246, %248 : vector<16x32xf32>
    %250 = arith.extf %190 : vector<16x32xbf16> to vector<16x32xf32>
    %251 = arith.addf %249, %250 : vector<16x32xf32>
    %252 = arith.truncf %251 : vector<16x32xf32> to vector<16x32xbf16>
    %cst_209 = arith.constant 0.000000e+00 : bf16
    %253 = vector.broadcast %cst_209 : bf16 to vector<16x32xbf16>
    %254 = arith.maximumf %252, %253 : vector<16x32xbf16>
    %c0_210 = arith.constant 0 : index
    %c0_211 = arith.constant 0 : index
    %c0_212 = arith.constant 0 : index
    %255 = vector.load %arg14[%c0_210, %c0_211, %c0_212] : memref<1x16x32xbf16, #tpu.memory_space<vmem>>, vector<1x16x32xbf16>
    %256 = vector.shape_cast %255 : vector<1x16x32xbf16> to vector<16x32xbf16>
    %257 = vector.shape_cast %254 : vector<16x32xbf16> to vector<1x16x32xbf16>
    tpu.vector_store %arg14[%c0_210, %c0_211, %c0_212], %257 {strides = array<i32>} : memref<1x16x32xbf16, #tpu.memory_space<vmem>>, vector<1x16x32xbf16>,
    return
  }
  func.func @transform_0(%arg0: i32) -> (i32, i32, i32) {
    %c0_i32 = arith.constant 0 : i32
    %c0_i32_0 = arith.constant 0 : i32
    %c0_i32_1 = arith.constant 0 : i32
    return %arg0, %c0_i32, %c0_i32_0 : i32, i32, i32
  }
  func.func @transform_1(%arg0: i32) -> (i32, i32) {
    %c0_i32 = arith.constant 0 : i32
    %c0_i32_0 = arith.constant 0 : i32
    %c0_i32_1 = arith.constant 0 : i32
    return %c0_i32, %c0_i32_0 : i32, i32
  }
  func.func @transform_2(%arg0: i32) -> (i32, i32) {
    %c0_i32 = arith.constant 0 : i32
    %c0_i32_0 = arith.constant 0 : i32
    %c0_i32_1 = arith.constant 0 : i32
    return %c0_i32, %c0_i32_0 : i32, i32
  }
  func.func @transform_3(%arg0: i32) -> (i32, i32) {
    %c0_i32 = arith.constant 0 : i32
    %c0_i32_0 = arith.constant 0 : i32
    %c0_i32_1 = arith.constant 0 : i32
    return %c0_i32, %c0_i32_0 : i32, i32
  }
  func.func @transform_4(%arg0: i32) -> (i32, i32) {
    %c0_i32 = arith.constant 0 : i32
    %c0_i32_0 = arith.constant 0 : i32
    %c0_i32_1 = arith.constant 0 : i32
    return %c0_i32, %c0_i32_0 : i32, i32
  }
  func.func @transform_5(%arg0: i32) -> (i32, i32) {
    %c0_i32 = arith.constant 0 : i32
    %c0_i32_0 = arith.constant 0 : i32
    %c0_i32_1 = arith.constant 0 : i32
    return %c0_i32, %c0_i32_0 : i32, i32
  }
  func.func @transform_6(%arg0: i32) -> (i32, i32) {
    %c0_i32 = arith.constant 0 : i32
    %c0_i32_0 = arith.constant 0 : i32
    %c0_i32_1 = arith.constant 0 : i32
    return %c0_i32, %c0_i32_0 : i32, i32
  }
  func.func @transform_7(%arg0: i32) -> (i32, i32) {
    %c0_i32 = arith.constant 0 : i32
    %c0_i32_0 = arith.constant 0 : i32
    %c0_i32_1 = arith.constant 0 : i32
    return %c0_i32, %c0_i32_0 : i32, i32
  }
  func.func @transform_8(%arg0: i32) -> (i32, i32) {
    %c0_i32 = arith.constant 0 : i32
    %c0_i32_0 = arith.constant 0 : i32
    %c0_i32_1 = arith.constant 0 : i32
    return %c0_i32, %c0_i32_0 : i32, i32
  }
  func.func @transform_9(%arg0: i32) -> (i32, i32) {
    %c0_i32 = arith.constant 0 : i32
    %c0_i32_0 = arith.constant 0 : i32
    %c0_i32_1 = arith.constant 0 : i32
    return %c0_i32, %c0_i32_0 : i32, i32
  }
  func.func @transform_10(%arg0: i32) -> (i32, i32) {
    %c0_i32 = arith.constant 0 : i32
    %c0_i32_0 = arith.constant 0 : i32
    %c0_i32_1 = arith.constant 0 : i32
    return %c0_i32, %c0_i32_0 : i32, i32
  }
  func.func @transform_11(%arg0: i32) -> (i32, i32) {
    %c0_i32 = arith.constant 0 : i32
    %c0_i32_0 = arith.constant 0 : i32
    %c0_i32_1 = arith.constant 0 : i32
    return %c0_i32, %c0_i32_0 : i32, i32
  }
  func.func @transform_12(%arg0: i32) -> (i32, i32) {
    %c0_i32 = arith.constant 0 : i32
    %c0_i32_0 = arith.constant 0 : i32
    %c0_i32_1 = arith.constant 0 : i32
    return %c0_i32, %c0_i32_0 : i32, i32
  }
  func.func @transform_13(%arg0: i32) -> (i32, i32, i32) {
    %c0_i32 = arith.constant 0 : i32
    %c0_i32_0 = arith.constant 0 : i32
    %c0_i32_1 = arith.constant 0 : i32
    return %arg0, %c0_i32, %c0_i32_0 : i32, i32, i32
  }
}

</mosaic_0001>

<bundles_post_ra>
// kernel: encoder_forward.2
= control target key start
LH: loop header
LB: loop body
LE: loop exit
PB: predicated region body
PF: predicated region fallthrough
CT: control target
= control target key end

     0   :  { %s1434_s12 = smov 0   ;;  %s2089_s0 = inlined_call_operand.vmem [shape: bf16[2,64,16], index: 0, kind: input, shape index: {}]   ;;  %s2090_s1 = inlined_call_operand.vmem [shape: bf16[144,16], index: 1, kind: input, shape index: {}]   ;;  %s2091_s2 = inlined_call_operand.vmem [shape: f32[1,16], index: 2, kind: input, shape index: {}]   ;;  %s2092_s3 = inlined_call_operand.vmem [shape: bf16[2,64,16], index: 3, kind: output, shape index: {}]  }
   0x1 LB: > { %s1296_s13 = sadd.s32 4294967295, %s1404_s12   ;;  %p1300_p0 = scmp.ge.s32.totalorder %s1404_s12, 1  ;;  %s1404_s12 = sphi %s1434_s12, %s13_s12  }
   0x2   : > { %p137_p1 = scmp.lt.s32.totalorder %s1404_s12, 3 }
   0x4   : > { %p138_p2 = pnand %p1300_p0, %p137_p1 }
   0x5   : > { %p161_p3 = scmp.lt.s32.totalorder (!%p138_p2), %s1296_s13, 1  ;;  %vm2093_vm0 = vcmask (!%p138_p2), 130048   ;;  %v177_v0 = vlaneseq (!%p138_p2)  ;;  %v1406_v1 = vmov (!%p138_p2), 0   ;;  %v1389_v11 = vld [vmem:[%s2090_s1] sm:$0xff] (!%p138_p2)   ;;  %v1390_v21 = vld [vmem:[%s2090_s1 + $0x8] sm:$0xff] (!%p138_p2)   ;;  %vm492_vm7 = vcmask (!%p138_p2), 1043456  }
   0x6   : > { %141 = sbr.rel (%p138_p2) target bundleno = 454 (0x1c6), region = 32  ;;  %175 = vst.msk [vmem:[#allocation2] sm:$0xff] (!%p138_p2), %vm2093_vm0, %v1406_v1  ;;  %176 = vst.msk [vmem:[#allocation2 + $0x28] sm:$0xff] (!%p138_p2), %vm2093_vm0, %v1406_v1  ;;  %1127 = vmatprep.subr.bf16.mxu0 (!%p138_p2), %v1406_v1  ;;  %1351 = vmatprep.subr.bf16.mxu1 (!%p138_p2), %v1406_v1  ;;  %v1391_v35 = vld [vmem:[%s2090_s1 + $0x10] sm:$0xff] (!%p138_p2)   ;;  %s1407_s24 = smov (!%p138_p2), 64   ;;  %v1393_v56 = vld [vmem:[%s2090_s1 + $0x20] sm:$0xff] (!%p138_p2)  }
   0x7   : > { %v1450_v2 = vshrl.u32 (!%p138_p2), %v177_v0, 7  ;;  %1128 = vmatpush1.bf16.msra.mxu0 (!%p138_p2), %v1389_v11  ;;  %1360 = vmatpush1.bf16.msra.mxu1 (!%p138_p2), %v1389_v11  ;;  %s1408_s25 = smov (!%p138_p2), 112   ;;  %s1409_s26 = smov (!%p138_p2), 16  }
   0x8   : > { %1129 = vmatprep.subr.bf16.mxu0 (!%p138_p2), %v1406_v1  ;;  %1352 = vmatprep.subr.bf16.mxu1 (!%p138_p2), %v1406_v1  ;;  %s1410_s4 = smov (!%p138_p2), 32   ;;  %s1411_s7 = smov (!%p138_p2), 48  }
   0x9   : > { %v1454_v3 = vadd.s32 (!%p138_p2), 8, %v1450_v2  ;;  %v180_v4 = vadd.s32 (!%p138_p2), 16, %v1450_v2  ;;  %v1458_v5 = vadd.s32 (!%p138_p2), 24, %v1450_v2  ;;  %v190_v6 = vand.u32 (!%p138_p2), 7, %v1450_v2  ;;  %s1412_s8 = smov (!%p138_p2), 80   ;;  %s1413_s18 = smov (!%p138_p2), 96  }
   0xa   : > { %v1467_v7 = vadd.s32 (!%p138_p2), 32, %v1450_v2  ;;  %v1470_v8 = vadd.s32 (!%p138_p2), 40, %v1450_v2  ;;  %v1473_v9 = vadd.s32 (!%p138_p2), 48, %v1450_v2  ;;  %v1476_v10 = vadd.s32 (!%p138_p2), 56, %v1450_v2 }
   0xb   : > { %v197_v13 = vand.u32 (!%p138_p2), 7, %v1454_v3  ;;  %v204_v15 = vand.u32 (!%p138_p2), 7, %v180_v4  ;;  %v211_v17 = vand.u32 (!%p138_p2), 7, %v1458_v5  ;;  %vm290_vm1 = vcmp.le.s32.totalorder (!%p138_p2), %v190_v6, 6  ;;  %1130 = vmatpush1.bf16.msra.mxu0 (!%p138_p2), %v1390_v21  ;;  %1361 = vmatpush1.bf16.msra.mxu1 (!%p138_p2), %v1390_v21 }
   0xc   : > { %vm540_vm5 = vmpackc.low (!%p138_p2), %vm290_vm1, %vm290_vm1  ;;  %v218_v24 = vand.u32 (!%p138_p2), 7, %v1467_v7  ;;  %v225_v25 = vand.u32 (!%p138_p2), 7, %v1470_v8  ;;  %v232_v26 = vand.u32 (!%p138_p2), 7, %v1473_v9  ;;  %v239_v28 = vand.u32 (!%p138_p2), 7, %v1476_v10  ;;  %1131 = vmatprep.subr.bf16.mxu0 (!%p138_p2), %v1406_v1  ;;  %1353 = vmatprep.subr.bf16.mxu1 (!%p138_p2), %v1406_v1 }
   0xd   : > { %s2143_s13 = smov (!%p161_p3, %s1296_s13), 1  ;;  %vm1492_vm2 = vcmp.le.s32.totalorder %v197_v13, 6  ;;  %vm1496_vm3 = vcmp.le.s32.totalorder %v204_v15, 6  ;;  %v482_v22 = vld [vmem:[#allocation2] sm:$0xf0]  ;;  %vm1503_vm4 = vcmp.le.s32.totalorder %v211_v17, 6 }
   0xe   : > { %s1341_s14 = sshll.u32 %s2143_s13, 5  ;;  %vm541_vm6 = vmpackc.low %vm1492_vm2, %vm1492_vm2  ;;  %v548_v27 = vsel %vm540_vm5, 65537, %v1406_v1  ;;  %vm1520_vm9 = vcmp.le.s32.totalorder %v218_v24, 6  ;;  %v493_v31 = vrot.slane %v482_v22, 4  ;;  %vm1532_vm12 = vcmp.ge.s32.totalorder %v204_v15, 1  ;;  %v1392_v22 = vld [vmem:[%s2090_s1 + $0x18] sm:$0xff]  }
   0xf   : > { %s165_s17 = scalar_lea.vmem %s2089_s0, %s1341_s14  ;;  %vm542_vm8 = vmpackc.low %vm1496_vm3, %vm1496_vm3  ;;  %v549_v29 = vsel %vm541_vm6, 65537, %v1406_v1  ;;  %vm1542_vm13 = vcmp.le.s32.totalorder %v225_v25, 6  ;;  %vm1546_vm14 = vcmp.le.s32.totalorder %v232_v26, 6  ;;  %vm1550_vm15 = vcmp.le.s32.totalorder %v239_v28, 6  ;;  %1132 = vmatpush1.bf16.msra.mxu0 %v1391_v35  ;;  %1362 = vmatpush1.bf16.msra.mxu1 %v1391_v35  ;;  %v519_v5 = vld [vmem:[#allocation2] sm:$0xf0]  ;;  %s2068_s23 = scalar_lea.vmem %s2092_s3, %s1341_s14 }
  0x10   : > { %v1385_v12 = vld [vmem:[%s165_s17 + $0x10] sm:$0xff]   ;;  %v1386_v14 = vld [vmem:[%s165_s17] sm:$0xff]   ;;  %v1387_v16 = vld [vmem:[%s165_s17 + $0x18] sm:$0xff]   ;;  %v550_v32 = vsel %vm542_vm8, 65537, %v1406_v1  ;;  %v1530_v33 = vcombine.low %v548_v27, %v549_v29  ;;  %vm1566_vm2 = vcmp.ge.s32.totalorder %v211_v17, 1  ;;  %vm1575_vm3 = vcmp.ge.s32.totalorder %v218_v24, 1  ;;  %1133 = vmatprep.subr.bf16.mxu0 %v1406_v1  ;;  %1354 = vmatprep.subr.bf16.mxu1 %v1406_v1 }
  0x11   : > { %332 = vst.msk [vmem:[#allocation2 + $0x18] sm:$0xff] %vm2093_vm0, %v1385_v12  ;;  %330 = vst.msk [vmem:[#allocation2 + $0x8] sm:$0xff] %vm2093_vm0, %v1386_v14  ;;  %v1388_v18 = vld [vmem:[%s165_s17 + $0x8] sm:$0xff]   ;;  %vm1587_vm5 = vcmp.ge.s32.totalorder %v225_v25, 1  ;;  %vm1603_vm8 = vcmp.ge.s32.totalorder %v232_v26, 1 }
  0x12   : > { %333 = vst.msk [vmem:[#allocation2 + $0x20] sm:$0xff] %vm2093_vm0, %v1387_v16  ;;  %331 = vst.msk [vmem:[#allocation2 + $0x10] sm:$0xff] %vm2093_vm0, %v1388_v18  ;;  %v569_v44 = vshrl.u32 %v1530_v33, 16  ;;  %v572_v45 = vshll.u32 %v1530_v33, 16  ;;  %vm1617_vm0 = vcmp.ge.s32.totalorder %v239_v28, 1 }
  0x13   : > { %vm543_vm11 = vmpackc.low %vm1503_vm4, %vm1503_vm4  ;;  %1134 = vmatpush1.bf16.msra.mxu0 %v1392_v22  ;;  %1363 = vmatpush1.bf16.msra.mxu1 %v1392_v22 }
  0x14   : > { %v551_v37 = vsel %vm543_vm11, 65537, %v1406_v1  ;;  %vm544_vm1 = vmpackc.low %vm1520_vm9, %vm1520_vm9  ;;  %v571_v54 = vrot.slane %v569_v44, 3  ;;  %v574_v55 = vrot.slane %v572_v45, 4  ;;  %1135 = vmatprep.subr.bf16.mxu0 %v1406_v1  ;;  %1355 = vmatprep.subr.bf16.mxu1 %v1406_v1 }
  0x15   : > { %v1559_v43 = vcombine.low %v550_v32, %v551_v37  ;;  %vm545_vm4 = vmpackc.low %vm1542_vm13, %vm1542_vm13  ;;  %v552_v12 = vsel %vm544_vm1, 65537, %v1406_v1  ;;  %vm383_vm13 = vsmask.f32 3328 }
  0x16   : > { %vm546_vm6 = vmpackc.low %vm1546_vm14, %vm1546_vm14  ;;  %v575_v7 = vor.u32 %v574_v55, %v571_v54  ;;  %v553_v14 = vsel %vm545_vm4, 65537, %v1406_v1 }
  0x17   : > { %v577_v59 = vshrl.u32 %v1559_v43, 16  ;;  %v580_v60 = vshll.u32 %v1559_v43, 16  ;;  %vm547_vm11 = vmpackc.low %vm1550_vm15, %vm1550_vm15  ;;  %v554_v17 = vsel %vm546_vm6, 65537, %v1406_v1  ;;  %v1670_v28 = vcombine.low %v552_v12, %v553_v14  ;;  %1136 = vmatpush1.bf16.msra.mxu0 %v1393_v56  ;;  %1364 = vmatpush1.bf16.msra.mxu1 %v1393_v56 }
  0x18   : > { %v1539_v36 = vld [vmem:[#allocation2 + $0x18] sm:$0xff]  ;;  %v1556_v41 = vld [vmem:[#allocation2 + $0x8] sm:$0xff]  ;;  %vm603_vm10 = vcmp.ne.s16.totalorder %v575_v7, 0  ;;  %vm357_vm9 = vmpackc.low %vm1532_vm12, %vm1532_vm12  ;;  %v555_v21 = vsel %vm547_vm11, 65537, %v1406_v1  ;;  %1137 = vmatprep.subr.bf16.mxu0 %v1406_v1  ;;  %1356 = vmatprep.subr.bf16.mxu1 %v1406_v1  ;;  %v785_v56 = vrot.slane %v569_v44, 7 }
  0x19   : > { %767 = vrot.lane.b32.xlu1 %v1539_v36, %s1407_s24  ;;  %v943_v42 = vrot.slane %v1539_v36, 4  ;;  %763 = vrot.lane.b32.xlu0 %v1556_v41, %s1407_s24  ;;  %v1572_v47 = vld [vmem:[#allocation2 + $0x20] sm:$0xff]  ;;  %v494_v48 = vrot.slane %v1556_v41, 4  ;;  %v930_v50 = vld [vmem:[#allocation2 + $0x8] sm:$0xf0]  ;;  %v1596_v58 = vld [vmem:[#allocation2 + $0x10] sm:$0xff]  ;;  %v1672_v29 = vcombine.low %v554_v17, %v555_v21 }
  0x1a   : > { %v486_v49 = vld [vmem:[#allocation2 + $0x20] sm:$0xf]  ;;  %v945_v52 = vrot.slane %v1572_v47, 4  ;;  %v940_v61 = vrot.slane %v930_v50, 4  ;;  %v1612_v4 = vrot.slane %v1596_v58, 4  ;;  %v579_v10 = vrot.slane %v577_v59, 3  ;;  %vm358_vm15 = vmpackc.low %vm1566_vm2, %vm1566_vm2 }
  0x1b   : > { %v500_v53 = vrot.slane %v486_v49, 4  ;;  %v495_v57 = vsel %vm492_vm7, %v493_v31, %v494_v48  ;;  %v966_v8 = vld [vmem:[#allocation2 + $0x8] sm:$0xf0]  ;;  %v582_v11 = vrot.slane %v580_v60, 4  ;;  %v608_v19 = vsel %vm603_vm10, %v519_v5, 0  ;;  %vm359_vm12 = vmpackc.low %vm1575_vm3, %vm1575_vm3 }
  0x1c   : > { %v946_v63 = vsel %vm492_vm7, %v943_v42, %v945_v52  ;;  %v1641_v15 = vsel %vm492_vm7, %v1612_v4, %v943_v42  ;;  %v942_v16 = vsel %vm492_vm7, %v940_v61, %v1612_v4  ;;  %v971_v20 = vsel %vm603_vm10, %v966_v8, 0  ;;  %vm360_vm1 = vmpackc.low %vm1587_vm5, %vm1587_vm5 }
  0x1d   : > { %v501_v0 = vsel %vm492_vm7, %v943_v42, %v500_v53  ;;  %953 = vrot.lane.b32.xlu1 %v946_v63, %s1408_s25  ;;  %502 = vrot.lane.b32.xlu0 %v495_v57, %s1409_s26  ;;  %v1654_v18 = vor.u32 %v582_v11, %v579_v10  ;;  %v614_v23 = vshrl.u32 %v608_v19, 16  ;;  %v617_v24 = vshll.u32 %v608_v19, 16  ;;  %vm361_vm4 = vmpackc.low %vm1603_vm8, %vm1603_vm8 }
  0x1e   : > { %v977_v25 = vshrl.u32 %v971_v20, 16  ;;  %v980_v26 = vshll.u32 %v971_v20, 16  ;;  %vm2120_vm10 = vsmask.f32 4352  ;;  %v365_v30 = vsel %vm357_vm9, 65537, %v1406_v1  ;;  %vm362_vm6 = vmpackc.low %vm1617_vm0, %vm1617_vm0 }
  0x1f   : > { %v584_v27 = vsel %vm2120_vm10, %v575_v7, %v1654_v18  ;;  %v616_v31 = vrot.slane %v614_v23, 4  ;;  %v619_v32 = vrot.slane %v617_v24, 5  ;;  %v586_v40 = vshrl.u32 %v1670_v28, 16  ;;  %vm2121_vm0 = vmmov %vm2120_vm10 }
  0x20   : > { %vm604_vm14 = vcmp.ne.s16.totalorder %v584_v27, 0  ;;  %v979_v35 = vrot.slane %v977_v25, 4  ;;  %v982_v39 = vrot.slane %v980_v26, 5  ;;  %v589_v57 = vshll.u32 %v1670_v28, 16  ;;  %vm2123_vm5 = vmmov %vm2121_vm0 }
  0x21   : > { %508 = vrot.lane.b32.xlu1 %v501_v0, %s1409_s26  ;;  %506 = vrot.lane.b32.xlu0 %v1641_v15, %s1409_s26  ;;  %v609_v37 = vsel %vm604_vm14, %v1556_v41, 0  ;;  %v972_v38 = vsel %vm604_vm14, %v1596_v58, 0  ;;  %v620_v34 = vor.u32 %v619_v32, %v616_v31  ;;  %v588_v55 = vrot.slane %v586_v40, 3 }
  0x22   : > { %v622_v42 = vshrl.u32 %v609_v37, 16  ;;  %v625_v49 = vshll.u32 %v609_v37, 16  ;;  %v985_v50 = vshrl.u32 %v972_v38, 16  ;;  %v983_v53 = vor.u32 %v982_v39, %v979_v35 }
  0x23   : > { %v988_v54 = vshll.u32 %v972_v38, 16  ;;  %v595_v5 = vshrl.u32 %v1672_v29, 16  ;;  %v591_v8 = vrot.slane %v589_v57, 4  ;;  %v598_v10 = vshll.u32 %v1672_v29, 16 }
  0x24   : > { %v624_v61 = vrot.slane %v622_v42, 4  ;;  %v627_v63 = vrot.slane %v625_v49, 5  ;;  %v987_v0 = vrot.slane %v985_v50, 4  ;;  %v497_v11 = vsel %vm492_vm7, %v494_v48, %v1612_v4 }
  0x25   : > { %949 = vrot.lane.b32.xlu0 %v942_v16, %s1408_s25  ;;  %v990_v7 = vrot.slane %v988_v54, 5  ;;  %v597_v14 = vrot.slane %v595_v5, 3  ;;  %v366_v16 = vsel %vm358_vm15, 65537, %v1406_v1  ;;  %v367_v48 = vsel %vm359_vm12, 65537, %v1406_v1 }
  0x26   : > { %v1712_v12 = vor.u32 %v627_v63, %v624_v61  ;;  %v592_v9 = vor.u32 %v591_v8, %v588_v55  ;;  %v600_v17 = vrot.slane %v598_v10, 4  ;;  %v368_v46 = vsel %vm360_vm1, 65537, %v1406_v1 }
  0x27   : > { %v991_v4 = vor.u32 %v990_v7, %v987_v0  ;;  %v369_v51 = vsel %vm361_vm4, 65537, %v1406_v1  ;;  %v370_v20 = vsel %vm362_vm6, 65537, %v1406_v1  ;;  %v1746_v21 = vcombine.low %v365_v30, %v366_v16 }
  0x28   : > { %v629_v19 = vsel %vm383_vm13, %v620_v34, %v1712_v12  ;;  %v593_v23 = vsel %vm2121_vm0, %v1654_v18, %v592_v9  ;;  %v1755_v24 = vor.u32 %v600_v17, %v597_v14  ;;  %v1757_v62 = vcombine.low %v367_v48, %v368_v46 }
  0x29   : > { %504 = vrot.lane.b32.xlu0 %v497_v11, %s1409_s26  ;;  %v992_v22 = vsel %vm383_vm13, %v983_v53, %v991_v4  ;;  %657 = vrot.lane.b32.xlu1 %v629_v19, %s1410_s4  ;;  %vm2122_vm2 = vcmask 130048   ;;  %vm605_vm3 = vcmp.ne.s16.totalorder %v593_v23, 0  ;;  %v1760_v25 = vcombine.low %v369_v51, %v370_v20 }
  0x2a   : > { %1024 = vst.msk [vmem:[#allocation3 + $0x8] sm:$0xff] %vm2122_vm2, %v992_v22  ;;  %v393_v26 = vshrl.u32 %v1746_v21, 16  ;;  %v396_v27 = vshll.u32 %v1746_v21, 16  ;;  %v602_v30 = vsel %vm2123_vm5, %v592_v9, %v1755_v24  ;;  %v610_v18 = vsel %vm605_vm3, %v1596_v58, 0  ;;  %vm2124_vm10 = vmmov %vm2122_vm2 }
  0x2b   : > { %v973_v31 = vsel %vm605_vm3, %v1539_v36, 0  ;;  %v402_v32 = vshrl.u32 %v1757_v62, 16  ;;  %vm679_vm8 = vsmask.f32 7424  ;;  %vm606_vm11 = vcmp.ne.s16.totalorder %v602_v30, 0  ;;  %vm2125_vm14 = vmmov %vm2122_vm2 }
  0x2c   : > { %v631_v35 = vshrl.u32 %v610_v18, 16  ;;  %v634_v37 = vshll.u32 %v610_v18, 16  ;;  %v994_v38 = vshrl.u32 %v973_v31, 16  ;;  %vm701_vm9 = vsmask.f32 256 }
  0x2d   : > { %v611_v39 = vsel %vm606_vm11, %v1539_v36, 0  ;;  %v974_v34 = vsel %vm606_vm11, %v1572_v47, 0  ;;  %v997_v42 = vshll.u32 %v973_v31, 16  ;;  %v405_v49 = vshll.u32 %v1757_v62, 16  ;;  %v1394_v31 = vld [vmem:[%s2090_s1 + $0x28] sm:$0xff]  }
  0x2e   : > { %v633_v50 = vrot.slane %v631_v35, 4  ;;  %v636_v53 = vrot.slane %v634_v37, 5  ;;  %v640_v54 = vshrl.u32 %v611_v39, 16  ;;  %v643_v55 = vshll.u32 %v611_v39, 16  ;;  %1138 = vmatpush1.bf16.msra.mxu0 %v1394_v31  ;;  %1365 = vmatpush1.bf16.msra.mxu1 %v1394_v31 }
  0x2f   : > { %v996_v61 = vrot.slane %v994_v38, 4  ;;  %v999_v63 = vrot.slane %v997_v42, 5  ;;  %v1003_v0 = vshrl.u32 %v974_v34, 16  ;;  %v1006_v7 = vshll.u32 %v974_v34, 16  ;;  %1139 = vmatprep.subr.bf16.mxu0 %v1406_v1  ;;  %1357 = vmatprep.subr.bf16.mxu1 %v1406_v1 }
  0x30   : > { %v1774_v8 = vor.u32 %v636_v53, %v633_v50  ;;  %v642_v11 = vrot.slane %v640_v54, 4  ;;  %v645_v14 = vrot.slane %v643_v55, 5  ;;  %v414_v16 = vshll.u32 %v1760_v25, 16 }
  0x31   : > { %v1000_v48 = vor.u32 %v999_v63, %v996_v61  ;;  %v1005_v9 = vrot.slane %v1003_v0, 4  ;;  %v1008_v17 = vrot.slane %v1006_v7, 5  ;;  %v1779_v46 = vrot.slane %v396_v27, 1 }
  0x32   : > { %v1781_v19 = vor.u32 %v645_v14, %v642_v11  ;;  %v685_v51 = vrot.slane %v405_v49, 1  ;;  %v1787_v20 = vrot.slane %v414_v16, 1  ;;  %v787_v18 = vrot.slane %v577_v59, 7 }
  0x33   : > { %v1001_v22 = vsel %vm383_vm13, %v991_v4, %v1000_v48  ;;  %v1792_v23 = vor.u32 %v1008_v17, %v1005_v9  ;;  %v684_v30 = vor.u32 %v1779_v46, %v393_v26  ;;  %v786_v4 = vor.u32 %v785_v56, %v572_v45 }
  0x34   : > { %v647_v35 = vsel %vm383_vm13, %v1774_v8, %v1781_v19  ;;  %1025 = vst.msk [vmem:[#allocation3 + $0x18] sm:$0xff] %vm2124_vm10, %v1001_v22  ;;  %v687_v44 = vor.u32 %v685_v51, %v402_v32  ;;  %v790_v37 = vrot.slane %v586_v40, 7  ;;  %v788_v39 = vor.u32 %v787_v18, %v580_v60 }
  0x35   : > { %v1010_v59 = vsel %vm383_vm13, %v1000_v48, %v1792_v23  ;;  %661 = vrot.lane.b32.xlu1 %v647_v35, %s1410_s4  ;;  %v686_v38 = vsel %vm679_vm8, %v684_v30, %v685_v51  ;;  %v1820_v34 = vrot.slane %v595_v5, 7  ;;  %vm796_vm12 = vcmp.ne.s16.totalorder %v786_v4, 0 }
  0x36   : > { %1026 = vst.msk [vmem:[#allocation3 + $0x28] sm:$0xff] %vm2125_vm14, %v1010_v59  ;;  %v689_v33 = vsel %vm679_vm8, %v687_v44, %v1787_v20  ;;  %vm693_vm15 = vcmp.ne.s16.totalorder %v686_v38, 0  ;;  %v791_v45 = vor.u32 %v790_v37, %v589_v57  ;;  %v789_v60 = vsel %vm701_vm9, %v785_v56, %v788_v39 }
  0x37   : > { %vm694_vm1 = vcmp.ne.s16.totalorder %v689_v33, 0  ;;  %v1829_v43 = vsel %vm693_vm15, %v1596_v58, 0  ;;  %v801_v40 = vsel %vm796_vm12, %v1556_v41, 0  ;;  %vm797_vm4 = vcmp.ne.s16.totalorder %v789_v60, 0  ;;  %v523_v60 = vld [vmem:[#allocation2 + $0x20] sm:$0x1f] }
  0x38   : > { %v699_v5 = vsel %vm694_vm1, %v1539_v36, 0  ;;  %v715_v42 = vshrl.u32 %v1829_v43, 16  ;;  %v807_v28 = vshrl.u32 %v801_v40, 16  ;;  %v1837_v53 = vsel %vm797_vm4, %v1596_v58, 0 }
  0x39   : > { %v723_v57 = vshrl.u32 %v699_v5, 16  ;;  %v726_v50 = vshll.u32 %v699_v5, 16  ;;  %v809_v54 = vshll.u32 %v801_v40, 16  ;;  %v814_v61 = vshll.u32 %v1837_v53, 16 }
  0x3a   : > { %v1839_v55 = vrot.slane %v715_v42, 7  ;;  %v792_v63 = vsel %vm701_vm9, %v787_v18, %v791_v45  ;;  %v794_v0 = vor.u32 %v1820_v34, %v598_v10  ;;  %vm282_vm0 = vcmp.ge.s32.totalorder %v190_v6, 1 }
  0x3b   : > { %v1846_v7 = vrot.slane %v723_v57, 7  ;;  %v811_v11 = vrot.slane %v809_v54, 1  ;;  %vm798_vm6 = vcmp.ne.s16.totalorder %v792_v63, 0  ;;  %v1850_v14 = vrot.slane %v814_v61, 1  ;;  %vm355_vm3 = vmpackc.low %vm282_vm0, %vm282_vm0 }
  0x3c   : > { %v795_v48 = vsel %vm701_vm9, %v790_v37, %v794_v0  ;;  %v803_v9 = vsel %vm798_vm6, %v1539_v36, 0  ;;  %vm283_vm2 = vcmp.ge.s32.totalorder %v197_v13, 1  ;;  %v363_v6 = vsel %vm355_vm3, 65537, %v1406_v1 }
  0x3d   : > { %v728_v29 = vor.u32 %v726_v50, %v1846_v7  ;;  %v812_v10 = vor.u32 %v811_v11, %v807_v28  ;;  %vm799_vm5 = vcmp.ne.s16.totalorder %v795_v48, 0  ;;  %v822_v17 = vshll.u32 %v803_v9, 16  ;;  %vm356_vm11 = vmpackc.low %vm283_vm2, %vm283_vm2  ;;  %v1395_v50 = vld [vmem:[%s2090_s1 + $0x30] sm:$0xff]  }
  0x3e   : > { %v1858_v51 = vsel %vm799_vm5, %v1572_v47, 0  ;;  %v826_v2 = vshrl.u32 %v803_v9, 16  ;;  %v364_v56 = vsel %vm356_vm11, 65537, %v1406_v1  ;;  %v395_v31 = vrot.slane %v393_v26, 4  ;;  %1140 = vmatpush1.bf16.msra.mxu0 %v1395_v50  ;;  %1366 = vmatpush1.bf16.msra.mxu1 %v1395_v50 }
  0x3f   : > { %v729_v22 = vsel %vm701_vm9, %v1839_v55, %v728_v29  ;;  %v817_v3 = vsel %vm679_vm8, %v812_v10, %v1850_v14  ;;  %v1866_v13 = vrot.slane %v822_v17, 1  ;;  %v830_v30 = vshll.u32 %v1858_v51, 16  ;;  %1141 = vmatprep.subr.bf16.mxu0 %v1406_v1  ;;  %1358 = vmatprep.subr.bf16.mxu1 %v1406_v1 }
  0x40   : > { %742 = vrot.lane.b32.xlu1 %v729_v22, %s1411_s7  ;;  %842 = vrot.lane.b32.xlu0 %v817_v3, %s1412_s8  ;;  %v1309_v18 = vcombine.low %v363_v6, %v364_v56  ;;  %v398_v35 = vrot.slane %v396_v27, 5  ;;  %v404_v44 = vrot.slane %v402_v32, 4  ;;  %v407_v59 = vrot.slane %v405_v49, 5  ;;  %v674_v49 = vld [vmem:[#allocation2] sm:$0x80]  ;;  %v1396_v22 = vld [vmem:[%s2090_s1 + $0x38] sm:$0xff]  }
  0x41   : > { %v828_v4 = vor.u32 %v826_v2, %v1866_v13  ;;  %v1878_v37 = vrot.slane %v830_v30, 1  ;;  %v411_v38 = vshrl.u32 %v1760_v25, 16  ;;  %v416_v26 = vrot.slane %v414_v16, 5 }
  0x42   : > { %v385_v39 = vshrl.u32 %v1309_v18, 16  ;;  %v388_v33 = vshll.u32 %v1309_v18, 16  ;;  %v399_v45 = vor.u32 %v398_v35, %v395_v31  ;;  %v408_v27 = vor.u32 %v407_v59, %v404_v44  ;;  %v859_v35 = vld [vmem:[#allocation2 + $0x8] sm:$0xf8]  ;;  %1142 = vmatpush1.bf16.msra.mxu0 %v1396_v22  ;;  %1367 = vmatpush1.bf16.msra.mxu1 %v1396_v22 }
  0x43   : > { %v833_v21 = vsel %vm679_vm8, %v828_v4, %v1878_v37  ;;  %v413_v32 = vrot.slane %v411_v38, 4  ;;  %vm607_vm10 = vcmp.ne.s16.totalorder %v1755_v24, 0  ;;  %1143 = vmatprep.subr.bf16.mxu0 %v1406_v1  ;;  %1359 = vmatprep.subr.bf16.mxu1 %v1406_v1  ;;  %vm2126_vm0 = vsmask.f32 4352 }
  0x44   : > { %846 = vrot.lane.b32.xlu1 %v833_v21, %s1412_s8  ;;  %v390_v62 = vrot.slane %v388_v33, 5  ;;  %v680_v40 = vrot.slane %v388_v33, 1  ;;  %v387_v5 = vrot.slane %v385_v39, 4  ;;  %v1892_v42 = vsel %vm383_vm13, %v399_v45, %v408_v27  ;;  %v970_v21 = vld [vmem:[#allocation2 + $0x28] sm:$0x1f] }
  0x45   : > { %v1894_v16 = vor.u32 %v416_v26, %v413_v32  ;;  %vm421_vm15 = vcmp.ne.s16.totalorder %v1892_v42, 0  ;;  %v612_v57 = vsel %vm607_vm10, %v523_v60, 0  ;;  %v1397_v60 = vld [vmem:[%s2090_s1 + $0x40] sm:$0xff]   ;;  %v975_v50 = vsel %vm607_vm10, %v970_v21, 0  ;;  %vm2129_vm10 = vmmov %vm2126_vm0 }
  0x46   : > { %v681_v28 = vor.u32 %v680_v40, %v385_v39  ;;  %vm691_vm14 = vcmp.ne.s16.totalorder %v680_v40, 0  ;;  %v866_v63 = vsel %vm421_vm15, %v1539_v36, 0  ;;  %v1909_v0 = vor.u32 %v390_v62, %v387_v5  ;;  %1144 = vmatpush1.bf16.msra.mxu0 %v1397_v60  ;;  %1368 = vmatpush1.bf16.msra.mxu1 %v1397_v60 }
  0x47   : > { %v696_v54 = vsel %vm691_vm14, %v674_v49, 0  ;;  %v1904_v61 = vsel %vm383_vm13, %v408_v27, %v1894_v16  ;;  %v887_v9 = vshrl.u32 %v866_v63, 16  ;;  %v890_v10 = vshll.u32 %v866_v63, 16 }
  0x48   : > { %v683_v11 = vsel %vm679_vm8, %v681_v28, %v1779_v46  ;;  %v703_v48 = vshrl.u32 %v696_v54, 16  ;;  %vm422_vm12 = vcmp.ne.s16.totalorder %v1904_v61, 0  ;;  %v649_v17 = vshrl.u32 %v612_v57, 16 }
  0x49   : > { %vm692_vm1 = vcmp.ne.s16.totalorder %v683_v11, 0  ;;  %v867_v29 = vsel %vm422_vm12, %v1572_v47, 0  ;;  %v889_v46 = vrot.slane %v887_v9, 3  ;;  %v652_v56 = vshll.u32 %v612_v57, 16  ;;  %v1029_v9 = vld [vmem:[#allocation3 + $0x8] sm:$0xff] }
  0x4a   : > { %v697_v2 = vsel %vm692_vm1, %v1556_v41, 0  ;;  %v896_v6 = vshrl.u32 %v867_v29, 16  ;;  %v892_v18 = vrot.slane %v890_v10, 4  ;;  %v899_v31 = vshll.u32 %v867_v29, 16 }
  0x4b   : > { %v707_v3 = vshrl.u32 %v697_v2, 16  ;;  %v710_v30 = vshll.u32 %v697_v2, 16  ;;  %v705_v44 = vrot.slane %v703_v48, 7  ;;  %v1925_v59 = vsel %vm383_vm13, %v1909_v0, %v399_v45  ;;  %v1033_v2 = vld [vmem:[#allocation3 + $0x28] sm:$0xff] }
  0x4c   : > { %v898_v4 = vrot.slane %v896_v6, 3  ;;  %vm419_vm4 = vcmp.ne.s16.totalorder %v1909_v0, 0  ;;  %v1930_v33 = vor.u32 %v892_v18, %v889_v46  ;;  %v901_v26 = vrot.slane %v899_v31, 4  ;;  %v334_v46 = vld [vmem:[#allocation2] sm:$0xf8] }
  0x4d   : > { %v1928_v39 = vrot.slane %v707_v3, 7  ;;  %vm420_vm6 = vcmp.ne.s16.totalorder %v1925_v59, 0  ;;  %v864_v45 = vsel %vm419_vm4, %v859_v35, 0  ;;  %v651_v32 = vrot.slane %v649_v17, 4  ;;  %v784_v3 = vld [vmem:[#allocation2 + $0x28] sm:$0x1] }
  0x4e   : > { %v865_v27 = vsel %vm420_vm6, %v1596_v58, 0  ;;  %v1944_v49 = vor.u32 %v901_v26, %v898_v4  ;;  %v870_v40 = vshrl.u32 %v864_v45, 16  ;;  %v873_v5 = vshll.u32 %v864_v45, 16  ;;  %v863_v26 = vld [vmem:[#allocation2 + $0x28] sm:$0xf] }
  0x4f   : > { %v712_v62 = vor.u32 %v710_v30, %v1928_v39  ;;  %v878_v28 = vshrl.u32 %v865_v27, 16  ;;  %v881_v1 = vshll.u32 %v865_v27, 16  ;;  %v654_v57 = vrot.slane %v652_v56, 5 }
  0x50   : > { %v903_v63 = vsel %vm2126_vm0, %v1930_v33, %v1944_v49  ;;  %v872_v11 = vrot.slane %v870_v40, 3  ;;  %v875_v48 = vrot.slane %v873_v5, 4  ;;  %v1012_v17 = vshrl.u32 %v975_v50, 16  ;;  %v338_v40 = vld [vmem:[#allocation2 + $0x20] sm:$0xf] }
  0x51   : > { %v713_v54 = vsel %vm701_vm9, %v705_v44, %v712_v62  ;;  %917 = vrot.lane.b32.xlu1 %v903_v63, %s1413_s18  ;;  %v880_v29 = vrot.slane %v878_v28, 3  ;;  %v883_v10 = vrot.slane %v881_v1, 4  ;;  %v655_v24 = vor.u32 %v654_v57, %v651_v32 }
  0x52   : > { %738 = vrot.lane.b32.xlu0 %v713_v54, %s1411_s7  ;;  %v876_v6 = vor.u32 %v875_v48, %v872_v11  ;;  %v1015_v56 = vshll.u32 %v975_v50, 16  ;;  %v690_v22 = vor.u32 %v1787_v20, %v411_v38  ;;  %vm2127_vm2 = vcmask 130048  }
  0x53   : > { %1327 = vmatprep.mubr.msk.bf16.mxu0 %vm2127_vm2, %v1029_v9  ;;  %vm2128_vm3 = vmmov %vm2127_vm2  ;;  %v1959_v30 = vor.u32 %v883_v10, %v880_v29  ;;  %v656_v18 = vsel %vm383_vm13, %v1781_v19, %v655_v24  ;;  %v1014_v31 = vrot.slane %v1012_v17, 4  ;;  %v718_v35 = vshll.u32 %v1829_v43, 16 }
  0x54   : > { %1329 = vmatprep.mubr.msk.bf16.mxu1 %vm2128_vm3, %v1033_v2  ;;  %v1017_v44 = vrot.slane %v1015_v56, 5  ;;  %vm695_vm5 = vcmp.ne.s16.totalorder %v690_v22, 0  ;;  %vm800_vm11 = vcmp.ne.s16.totalorder %v1820_v34, 0  ;;  %v424_v25 = vsel %vm419_vm4, %v334_v46, 0  ;;  %vm2130_vm1 = vmmov %vm2127_vm2 }
  0x55   : > { %v885_v20 = vsel %vm2129_vm10, %v876_v6, %v1959_v30  ;;  %663 = vrot.lane.b32.xlu1 %v656_v18, %s1410_s4  ;;  %v700_v38 = vsel %vm695_vm5, %v1572_v47, 0  ;;  %v805_v4 = vsel %vm800_vm11, %v784_v3, 0  ;;  %v638_v43 = vsel %vm383_vm13, %v1712_v12, %v1774_v8  ;;  %vm2136_vm4 = vmmov %vm2126_vm0 }
  0x56   : > { %913 = vrot.lane.b32.xlu0 %v885_v20, %s1413_s18  ;;  %v1018_v19 = vor.u32 %v1017_v44, %v1014_v31  ;;  %v731_v34 = vshrl.u32 %v700_v38, 16  ;;  %v734_v21 = vshll.u32 %v700_v38, 16  ;;  %v720_v0 = vor.u32 %v718_v35, %v1839_v55  ;;  %v934_v44 = vld [vmem:[#allocation2 + $0x28] sm:$0xf]  ;;  %vm2138_vm2 = vmmov %vm2130_vm1 }
  0x57   : > { %v834_v45 = vshrl.u32 %v1858_v51, 16  ;;  %v838_v27 = vshll.u32 %v805_v4, 16  ;;  %vm423_vm14 = vcmp.ne.s16.totalorder %v1894_v16, 0  ;;  %v818_v62 = vshrl.u32 %v1837_v53, 16  ;;  %vm2139_vm3 = vmmov %vm2130_vm1 }
  0x58   : > { %v1019_v32 = vsel %vm383_vm13, %v1792_v23, %v1018_v19  ;;  %v733_v60 = vrot.slane %v731_v34, 7  ;;  %v868_v5 = vsel %vm423_vm14, %v863_v26, 0  ;;  %v426_v12 = vsel %vm421_vm15, %v1596_v58, 0  ;;  %vm2131_vm13 = vmmov %vm2126_vm0 }
  0x59   : > { %1027 = vst.msk [vmem:[#allocation3 + $0x38] sm:$0xff] %vm2130_vm1, %v1019_v32  ;;  %v905_v8 = vshrl.u32 %v868_v5, 16  ;;  %v908_v55 = vshll.u32 %v868_v5, 16  ;;  %v427_v51 = vsel %vm422_vm12, %v1539_v36, 0  ;;  %v425_v23 = vsel %vm420_vm6, %v1556_v41, 0  ;;  %vm2133_vm15 = vmmov %vm2126_vm0 }
  0x5a   : > { %659 = vrot.lane.b32.xlu0 %v638_v43, %s1410_s4  ;;  %v736_v53 = vor.u32 %v734_v21, %v733_v60  ;;  %v431_v28 = vshrl.u32 %v424_v25, 16  ;;  %v721_v42 = vsel %vm701_vm9, %v1928_v39, %v720_v0  ;;  %v836_v1 = vor.u32 %v834_v45, %v1878_v37  ;;  %vm2134_vm12 = vmmov %vm2126_vm0 }
  0x5b   : > { %v840_v57 = vrot.slane %v838_v27, 1  ;;  %v428_v50 = vsel %vm423_vm14, %v338_v40, 0  ;;  %v820_v61 = vor.u32 %v818_v62, %v1850_v14  ;;  %v434_v41 = vshll.u32 %v424_v25, 16  ;;  %vm2137_vm6 = vmmov %vm2126_vm0 }
  0x5c   : > { %v737_v36 = vsel %vm701_vm9, %v1846_v7, %v736_v53  ;;  %v433_v59 = vrot.slane %v431_v28, 3  ;;  %v907_v54 = vrot.slane %v905_v8, 3  ;;  %v910_v63 = vrot.slane %v908_v55, 4  ;;  %vm2132_vm9 = vmmov %vm2130_vm1 }
  0x5d   : > { %744 = vrot.lane.b32.xlu1 %v737_v36, %s1411_s7  ;;  %v439_v11 = vshrl.u32 %v425_v23, 16  ;;  %v442_v48 = vshll.u32 %v425_v23, 16  ;;  %v436_v37 = vrot.slane %v434_v41, 4  ;;  %v466_v39 = vshrl.u32 %v428_v50, 16 }
  0x5e   : > { %740 = vrot.lane.b32.xlu0 %v721_v42, %s1411_s7  ;;  %v469_v9 = vshll.u32 %v428_v50, 16  ;;  %v457_v16 = vshrl.u32 %v427_v51, 16  ;;  %v460_v24 = vshll.u32 %v427_v51, 16  ;;  %v448_v56 = vshrl.u32 %v426_v12, 16 }
  0x5f   : > { %v441_v29 = vrot.slane %v439_v11, 3  ;;  %v444_v10 = vrot.slane %v442_v48, 4  ;;  %v437_v7 = vor.u32 %v436_v37, %v433_v59  ;;  %v468_v17 = vrot.slane %v466_v39, 3 }
  0x60   : > { %v471_v14 = vrot.slane %v469_v9, 4  ;;  %v459_v2 = vrot.slane %v457_v16, 3  ;;  %v462_v6 = vrot.slane %v460_v24, 4  ;;  %v451_v22 = vshll.u32 %v426_v12, 16  ;;  %v1035_v23 = vld [vmem:[#allocation3 + $0x38] sm:$0xff] }
  0x61   : > { %769 = vrot.lane.b32.xlu1 %v1572_v47, %s1407_s24  ;;  %v445_v46 = vor.u32 %v444_v10, %v441_v29  ;;  %v841_v3 = vsel %vm679_vm8, %v836_v1, %v840_v57  ;;  %v825_v18 = vsel %vm679_vm8, %v820_v61, %v1866_v13  ;;  %v911_v31 = vor.u32 %v910_v63, %v907_v54  ;;  %vm2135_vm8 = vmmov %vm2130_vm1  ;;  %v1031_v57 = vld [vmem:[#allocation3 + $0x18] sm:$0xff]  ;;  %v1317_v9 = vld [vmem:[%s2091_s2] ss:$0 sm:$0xff] }
  0x62   : > { %765 = vrot.lane.b32.xlu0 %v1596_v58, %s1407_s24  ;;  %v472_v35 = vor.u32 %v471_v14, %v468_v17  ;;  %v463_v20 = vor.u32 %v462_v6, %v459_v2  ;;  %v450_v38 = vrot.slane %v448_v56, 3  ;;  %v453_v4 = vrot.slane %v451_v22, 4 }
  0x63   : > { %v446_v25 = vsel %vm2131_vm13, %v437_v7, %v445_v46  ;;  %v912_v13 = vsel %vm2134_vm12, %v1944_v49, %v911_v31  ;;  %v947_v19 = vrot.slane %v934_v44, 4  ;;  %v894_v43 = vsel %vm2136_vm4, %v1959_v30, %v1930_v33 }
  0x64   : > { %478 = vst.msk [vmem:[#allocation3] sm:$0xff] %vm2132_vm9, %v446_v25  ;;  %v473_v26 = vsel %vm2133_vm15, %v463_v20, %v472_v35  ;;  %v454_v58 = vor.u32 %v453_v4, %v450_v38  ;;  %vm514_vm5 = vcmask 261248   ;;  %vm669_vm11 = vcmask 392448   ;;  %vm2140_vm9 = vmmov %vm2138_vm2 }
  0x65   : > { %848 = vrot.lane.b32.xlu1 %v841_v3, %s1412_s8  ;;  %481 = vst.msk [vmem:[#allocation3 + $0x30] sm:$0xff] %vm2135_vm8, %v473_v26  ;;  %v948_v49 = vsel %vm492_vm7, %v945_v52, %v947_v19  ;;  %vm750_vm7 = vcmask 523648   ;;  %vm775_vm10 = vcmask 654848   ;;  %vm854_vm14 = vcmask 786048   ;;  %vm2141_vm15 = vmmov %vm2138_vm2 }
  0x66   : > { %844 = vrot.lane.b32.xlu0 %v825_v18, %s1412_s8  ;;  %v464_v34 = vsel %vm2137_vm6, %v454_v58, %v463_v20  ;;  %v455_v21 = vsel %vm2126_vm0, %v445_v46, %v454_v58  ;;  %vm925_vm1 = vcmask 917248   ;;  %vm961_vm13 = vcmask 1048448  }
  0x67   : > { %480 = vst.msk [vmem:[#allocation3 + $0x20] sm:$0xff] %vm2138_vm2, %v464_v34  ;;  %vm1232_vm12 = vcmask 125952  }
  0x68   : > { %479 = vst.msk [vmem:[#allocation3 + $0x10] sm:$0xff] %vm2139_vm3, %v455_v21 }
  0x69   : > { %919 = vrot.lane.b32.xlu1 %v912_v13, %s1413_s18 }
  0x6a   : > { %915 = vrot.lane.b32.xlu0 %v894_v43, %s1413_s18 }
  0x6d   : > { %955 = vrot.lane.b32.xlu1 %v948_v49, %s1408_s25 }
  0x6e   : > { %951 = vrot.lane.b32.xlu0 %v1641_v15, %s1408_s25 }
  0x8b   : > { %v768_v33 = vpop.permute.xlu1 %767  ;;  %v764_v30 = vpop.permute.xlu0 %763 }
  0x8f   : > { %v954_v0 = vpop.permute.xlu1 %953  ;;  %v503_v45 = vpop.permute.xlu0 %502 }
  0x90   : > { %515 = vst.msk [vmem:[#allocation3] sm:$0xff] %vm514_vm5, %v503_v45 }
  0x93   : > { %v509_v27 = vpop.permute.xlu1 %508  ;;  %v507_v32 = vpop.permute.xlu0 %506 }
  0x94   : > { %518 = vst.msk [vmem:[#allocation3 + $0x30] sm:$0xff] %vm514_vm5, %v509_v27  ;;  %517 = vst.msk [vmem:[#allocation3 + $0x20] sm:$0xff] %vm514_vm5, %v507_v32 }
  0x97   : > { %v950_v60 = vpop.permute.xlu0 %949 }
  0x9b   : > { %v505_v47 = vpop.permute.xlu0 %504  ;;  %v658_v52 = vpop.permute.xlu1 %657 }
  0x9c   : > { %516 = vst.msk [vmem:[#allocation3 + $0x10] sm:$0xff] %vm514_vm5, %v505_v47 }
  0x9d   : > { %670 = vst.msk [vmem:[#allocation3] sm:$0xff] %vm669_vm11, %v658_v52 }
  0xa7   : > { %v662_v62 = vpop.permute.xlu1 %661 }
  0xa8   : > { %672 = vst.msk [vmem:[#allocation3 + $0x20] sm:$0xff] %vm669_vm11, %v662_v62 }
  0xb2   : > { %v743_v15 = vpop.permute.xlu1 %742  ;;  %v843_v5 = vpop.permute.xlu0 %842 }
  0xb3   : > { %753 = vst.msk [vmem:[#allocation3 + $0x20] sm:$0xff] %vm750_vm7, %v743_v15 }
  0xb4   : > { %778 = vst.msk [vmem:[#allocation3 + $0x20] sm:$0xff] %vm775_vm10, %v768_v33 }
  0xb6   : > { %v847_v40 = vpop.permute.xlu1 %846 }
  0xb7   : > { %857 = vst.msk [vmem:[#allocation3 + $0x20] sm:$0xff] %vm854_vm14, %v847_v40 }
  0xc3   : > { %v918_v8 = vpop.permute.xlu1 %917 }
  0xc4   : > { %v739_v12 = vpop.permute.xlu0 %738  ;;  %928 = vst.msk [vmem:[#allocation3 + $0x20] sm:$0xff] %vm925_vm1, %v918_v8 }
  0xc5   : > { %751 = vst.msk [vmem:[#allocation3] sm:$0xff] %vm750_vm7, %v739_v12 }
  0xc6   : > { %776 = vst.msk [vmem:[#allocation3] sm:$0xff] %vm775_vm10, %v764_v30 }
  0xc7   : > { %964 = vst.msk [vmem:[#allocation3 + $0x20] sm:$0xff] %vm961_vm13, %v954_v0  ;;  %v664_v55 = vpop.permute.xlu1 %663 }
  0xc8   : > { %855 = vst.msk [vmem:[#allocation3] sm:$0xff] %vm854_vm14, %v843_v5  ;;  %v914_v51 = vpop.permute.xlu0 %913 }
  0xc9   : > { %673 = vst.msk [vmem:[#allocation3 + $0x30] sm:$0xff] %vm669_vm11, %v664_v55 }
  0xca   : > { %926 = vst.msk [vmem:[#allocation3] sm:$0xff] %vm925_vm1, %v914_v51 }
  0xcb   : > { %962 = vst.msk [vmem:[#allocation3] sm:$0xff] %vm961_vm13, %v950_v60 }
  0xcc   : > { %v660_v53 = vpop.permute.xlu0 %659 }
  0xcd   : > { %671 = vst.msk [vmem:[#allocation3 + $0x10] sm:$0xff] %vm669_vm11, %v660_v53 }
  0xce   : > { %v1032_v28 = vld [vmem:[#allocation3 + $0x20] sm:$0xff] }
  0xcf   : > { %1176 = vmatmul.mubr.bf16.vlgmr.msra.gmra.mrb[0].mxu1 %v1032_v28  ;;  %v745_v42 = vpop.permute.xlu1 %744 }
  0xd0   : > { %1330 = vmatprep.mubr.msk.bf16.mxu1 %vm2140_vm9, %v1035_v23  ;;  %754 = vst.msk [vmem:[#allocation3 + $0x30] sm:$0xff] %vm750_vm7, %v745_v42  ;;  %v741_v1 = vpop.permute.xlu0 %740 }
  0xd1   : > { %752 = vst.msk [vmem:[#allocation3 + $0x10] sm:$0xff] %vm750_vm7, %v741_v1 }
  0xd2   : > { %v1028_v50 = vld [vmem:[#allocation3] sm:$0xff] }
  0xd3   : > { %1160 = vmatmul.mubr.bf16.vlgmr.msra.gmra.mrb[0].mxu0 %v1028_v50  ;;  %v770_v36 = vpop.permute.xlu1 %769 }
  0xd4   : > { %1328 = vmatprep.mubr.msk.bf16.mxu0 %vm2141_vm15, %v1031_v57  ;;  %779 = vst.msk [vmem:[#allocation3 + $0x30] sm:$0xff] %vm775_vm10, %v770_v36  ;;  %v766_v61 = vpop.permute.xlu0 %765 }
  0xd5   : > { %777 = vst.msk [vmem:[#allocation3 + $0x10] sm:$0xff] %vm775_vm10, %v766_v61 }
  0xd7   : > { %v849_v59 = vpop.permute.xlu1 %848 }
  0xd8   : > { %858 = vst.msk [vmem:[#allocation3 + $0x30] sm:$0xff] %vm854_vm14, %v849_v59  ;;  %v845_v41 = vpop.permute.xlu0 %844 }
  0xd9   : > { %856 = vst.msk [vmem:[#allocation3 + $0x10] sm:$0xff] %vm854_vm14, %v845_v41 }
  0xdb   : > { %v920_v54 = vpop.permute.xlu1 %919 }
  0xdc   : > { %929 = vst.msk [vmem:[#allocation3 + $0x30] sm:$0xff] %vm925_vm1, %v920_v54  ;;  %v916_v63 = vpop.permute.xlu0 %915 }
  0xdd   : > { %927 = vst.msk [vmem:[#allocation3 + $0x10] sm:$0xff] %vm925_vm1, %v916_v63 }
  0xdf   : > { %v956_v11 = vpop.permute.xlu1 %955 }
  0xe0   : > { %965 = vst.msk [vmem:[#allocation3 + $0x30] sm:$0xff] %vm961_vm13, %v956_v11  ;;  %v952_v48 = vpop.permute.xlu0 %951 }
  0xe1   : > { %963 = vst.msk [vmem:[#allocation3 + $0x10] sm:$0xff] %vm961_vm13, %v952_v48 }
  0xe7   : > { %v1034_v37 = vld [vmem:[#allocation3 + $0x30] sm:$0xff] }
  0xe8   : > { %v1030_v39 = vld [vmem:[#allocation3 + $0x10] sm:$0xff]  ;;  %1184 = vmatmul.mubr.bf16.gmra.mrb[4].mxu1 %v1034_v37 }
  0xe9   : > { %1168 = vmatmul.mubr.bf16.gmra.mrb[4].mxu0 %v1030_v39 }
 0x1a2   : > { %v1177_v16 = vpop.f32.mrb[0].mxu1 }
 0x1a3   : > { %v1178_v29 = vadd.f32 %v1317_v9, %v1177_v16  ;;  %v1179_v10 = vpop.f32.mrb[1].mxu1 }
 0x1a4   : > { %v1180_v24 = vpop.f32.mrb[2].mxu1 }
 0x1a5   : > { %v1196_v7 = vmax.f32 %v1178_v29, 0.0  ;;  %v1181_v17 = vadd.f32 %v1317_v9, %v1180_v24  ;;  %v1182_v14 = vpop.f32.mrb[3].mxu1 }
 0x1a6   : > { %v1161_v2 = vpop.f32.mrb[0].mxu0 }
 0x1a7   : > { %v1347_v46 = vpack.c.bf16 %v1196_v7, %v1196_v7  ;;  %v1197_v6 = vmax.f32 %v1181_v17, 0.0  ;;  %v1162_v56 = vadd.f32 %v1317_v9, %v1161_v2  ;;  %v1163_v22 = vpop.f32.mrb[1].mxu0 }
 0x1a8   : > { %v1164_v3 = vpop.f32.mrb[2].mxu0 }
 0x1a9   : > { %1237 = vst.msk [vmem:[%s2068_s23 + $0x10] sm:$0xf] %vm1232_vm12, %v1347_v46  ;;  %v1348_v18 = vpack.c.bf16 %v1197_v6, %v1197_v6  ;;  %v1192_v31 = vmax.f32 %v1162_v56, 0.0  ;;  %v1165_v35 = vadd.f32 %v1317_v9, %v1164_v3  ;;  %v1166_v44 = vpop.f32.mrb[3].mxu0 }
 0x1ab   : > { %1238 = vst.msk [vmem:[%s2068_s23 + $0x14] sm:$0xf] %vm1232_vm12, %v1348_v18  ;;  %v1343_v25 = vpack.c.bf16 %v1192_v31, %v1192_v31  ;;  %v1193_v20 = vmax.f32 %v1165_v35, 0.0 }
 0x1ad   : > { %1233 = vst.msk [vmem:[%s2068_s23] sm:$0xf] %vm1232_vm12, %v1343_v25  ;;  %v1344_v38 = vpack.c.bf16 %v1193_v20, %v1193_v20 }
 0x1af   : > { %1234 = vst.msk [vmem:[%s2068_s23 + $0x4] sm:$0xf] %vm1232_vm12, %v1344_v38 }
 0x1bb   : > { %v1185_v4 = vpop.f32.mrb[4].mxu1 }
 0x1bc   : > { %v1169_v26 = vpop.f32.mrb[4].mxu0  ;;  %v1186_v58 = vadd.f32 %v1317_v9, %v1185_v4  ;;  %v1187_v13 = vpop.f32.mrb[5].mxu1 }
 0x1bd   : > { %v1170_v19 = vadd.f32 %v1317_v9, %v1169_v26  ;;  %v1171_v43 = vpop.f32.mrb[5].mxu0  ;;  %v1188_v34 = vpop.f32.mrb[6].mxu1 }
 0x1be   : > { %v1198_v21 = vmax.f32 %v1186_v58, 0.0  ;;  %v1172_v49 = vpop.f32.mrb[6].mxu0  ;;  %v1189_v33 = vadd.f32 %v1317_v9, %v1188_v34  ;;  %v1190_v30 = vpop.f32.mrb[7].mxu1 }
 0x1bf   : > { %v1194_v0 = vmax.f32 %v1170_v19, 0.0  ;;  %v1173_v45 = vadd.f32 %v1317_v9, %v1172_v49  ;;  %v1174_v27 = vpop.f32.mrb[7].mxu0 }
 0x1c0   : > { %v1349_v32 = vpack.c.bf16 %v1198_v21, %v1198_v21  ;;  %v1199_v60 = vmax.f32 %v1189_v33, 0.0 }
 0x1c1   : > { %v1345_v47 = vpack.c.bf16 %v1194_v0, %v1194_v0  ;;  %v1195_v52 = vmax.f32 %v1173_v45, 0.0 }
 0x1c2   : > { %1239 = vst.msk [vmem:[%s2068_s23 + $0x18] sm:$0xf] %vm1232_vm12, %v1349_v32  ;;  %v1350_v62 = vpack.c.bf16 %v1199_v60, %v1199_v60 }
 0x1c3   : > { %1235 = vst.msk [vmem:[%s2068_s23 + $0x8] sm:$0xf] %vm1232_vm12, %v1345_v47  ;;  %v1346_v15 = vpack.c.bf16 %v1195_v52, %v1195_v52 }
 0x1c4   : > { %1240 = vst.msk [vmem:[%s2068_s23 + $0x1c] sm:$0xf] %vm1232_vm12, %v1350_v62 }
 0x1c5   : > { %1236 = vst.msk [vmem:[%s2068_s23 + $0xc] sm:$0xf] %vm1232_vm12, %v1346_v15 }
 0x1c6 PF: > { %s13_s12 = sadd.s32 1, %s1404_s12  }
 0x1c7   : > { %p10_p4 = scmp.ge.s32.totalorder %s13_s12, 4  }
 0x1c9   :  { %12 = sbr.rel (!%p10_p4) target bundleno = 1 (0x1), region = 62 }

// kernel: encoder_forward.3
= control target key start
LH: loop header
LB: loop body
LE: loop exit
PB: predicated region body
PF: predicated region fallthrough
CT: control target
= control target key end

     0   :  { %s3515_s25 = smov 0   ;;  %s4298_s0 = inlined_call_operand.vmem [shape: bf16[2,16,64], index: 0, kind: input, shape index: {}]   ;;  %s4299_s1 = inlined_call_operand.vmem [shape: bf16[576,32], index: 1, kind: input, shape index: {}]   ;;  %s4300_s2 = inlined_call_operand.vmem [shape: f32[1,32], index: 2, kind: input, shape index: {}]   ;;  %s4301_s3 = inlined_call_operand.vmem [shape: bf16[288,32], index: 3, kind: input, shape index: {}]   ;;  %s4302_s4 = inlined_call_operand.vmem [shape: f32[1,32], index: 4, kind: input, shape index: {}]   ;;  %s4303_s5 = inlined_call_operand.vmem [shape: bf16[288,8], index: 5, kind: input, shape index: {}]   ;;  %s4304_s6 = inlined_call_operand.vmem [shape: f32[1,8], index: 6, kind: input, shape index: {}]   ;;  %s4305_s7 = inlined_call_operand.vmem [shape: bf16[8,32], index: 7, kind: input, shape index: {}]   ;;  %s4306_s8 = inlined_call_operand.vmem [shape: f32[1,32], index: 8, kind: input, shape index: {}]   ;;  %s4307_s9 = inlined_call_operand.vmem [shape: bf16[288,8], index: 9, kind: input, shape index: {}]   ;;  %s4308_s10 = inlined_call_operand.vmem [shape: f32[1,8], index: 10, kind: input, shape index: {}]   ;;  %s4309_s11 = inlined_call_operand.vmem [shape: bf16[8,32], index: 11, kind: input, shape index: {}]   ;;  %s4310_s12 = inlined_call_operand.vmem [shape: f32[1,32], index: 12, kind: input, shape index: {}]   ;;  %s4311_s13 = inlined_call_operand.vmem [shape: bf16[2,16,32], index: 13, kind: output, shape index: {}]  }
   0x1 LB: > { %s2938_s26 = sadd.s32 4294967295, %s3437_s25   ;;  %p2942_p0 = scmp.ge.s32.totalorder %s3437_s25, 1  ;;  %s3437_s25 = sphi %s3515_s25, %s23_s25  }
   0x2   : > { %p387_p1 = scmp.lt.s32.totalorder %s3437_s25, 3 }
   0x4   : > { %p388_p2 = pnand %p2942_p0, %p387_p1 }
   0x5   : > { %p431_p3 = scmp.lt.s32.totalorder (!%p388_p2), %s2938_s26, 1  ;;  %vm444_vm0 = vcmask (!%p388_p2), 519168   ;;  %v448_v0 = vlaneseq (!%p388_p2)  ;;  %v3439_v1 = vmov (!%p388_p2), 0   ;;  %v3325_v3 = vld [vmem:[%s4299_s1 + $0x40] sm:$0xff] (!%p388_p2)   ;;  %vm641_vm6 = vsmask.f32 (!%p388_p2), 3328 }
   0x6   : > { %391 = sbr.rel (%p388_p2) target bundleno = 1984 (0x7c0), region = 72  ;;  %446 = vst.msk [vmem:[#allocation2 + $0x4] sm:$0xf] (!%p388_p2), %vm444_vm0, %v3439_v1  ;;  %447 = vst.msk [vmem:[#allocation2 + $0x10] sm:$0xf] (!%p388_p2), %vm444_vm0, %v3439_v1  ;;  %3131 = vmatprep.subr.bf16.mxu0 (!%p388_p2), %v3325_v3  ;;  %v3326_v6 = vld [vmem:[%s4299_s1] sm:$0xff] (!%p388_p2)  }
   0x7   : > { %v449_v2 = vshrl.u32 (!%p388_p2), %v448_v0, 7  ;;  %3132 = vmatpush3.bf16.msra.mxu0 (!%p388_p2), %v3326_v6  ;;  %vm642_vm7 = vsmask.f32 (!%p388_p2), 7440  ;;  %v3327_v22 = vld [vmem:[%s4299_s1 + $0xc0] sm:$0xff] (!%p388_p2)   ;;  %v3328_v29 = vld [vmem:[%s4299_s1 + $0x48] sm:$0xff] (!%p388_p2)   ;;  %vm562_vm13 = vcmask (!%p388_p2), 1045504  }
   0x8   : > { %vm3561_vm10 = vmor (!%p388_p2), %vm641_vm6, %vm642_vm7  ;;  %3153 = vmatprep.subr.bf16.mxu1 (!%p388_p2), %v3327_v22  ;;  %vm701_vm14 = vsmask.f32 (!%p388_p2), 256  ;;  %vm702_vm15 = vsmask.f32 (!%p388_p2), 4368  ;;  %3133 = vmatprep.subr.bf16.mxu0 (!%p388_p2), %v3328_v29  ;;  %v3329_v40 = vld [vmem:[%s4299_s1 + $0x80] sm:$0xff] (!%p388_p2)   ;;  %v3330_v49 = vld [vmem:[%s4299_s1 + $0x8] sm:$0xff] (!%p388_p2)  }
   0x9   : > { %v450_v4 = vadd.s32 (!%p388_p2), 8, %v449_v2  ;;  %v455_v5 = vand.u32 (!%p388_p2), 3, %v449_v2  ;;  %3154 = vmatpush3.bf16.msra.mxu1 (!%p388_p2), %v3329_v40  ;;  %s3440_s28 = smov (!%p388_p2), 64   ;;  %v3331_v54 = vld [vmem:[%s4299_s1 + $0xc8] sm:$0xff] (!%p388_p2)   ;;  %v3332_v59 = vld [vmem:[%s4299_s1 + $0x50] sm:$0xff] (!%p388_p2)   ;;  %vm703_vm6 = vmor (!%p388_p2), %vm701_vm14, %vm702_vm15  ;;  %s3443_s19 = smov (!%p388_p2), 32  }
   0xa   : > { %3155 = vmatprep.subr.bf16.mxu1 (!%p388_p2), %v3331_v54  ;;  %v3333_v21 = vld [vmem:[%s4299_s1 + $0x88] sm:$0xff] (!%p388_p2)   ;;  %vm4313_vm14 = vsmask.f32 (!%p388_p2), 7424  ;;  %s3444_s22 = smov (!%p388_p2), 96  }
   0xb   : > { %v462_v7 = vand.u32 (!%p388_p2), 3, %v450_v4  ;;  %vm475_vm1 = vcmp.ge.s32.totalorder (!%p388_p2), %v455_v5, 1  ;;  %vm3544_vm5 = vcmp.le.s32.totalorder (!%p388_p2), %v455_v5, 2  ;;  %3134 = vmatpush3.bf16.msra.mxu0 (!%p388_p2), %v3330_v49 }
   0xc   : > { %vm490_vm2 = vmpackc.low (!%p388_p2), %vm475_vm1, %vm475_vm1  ;;  %vm4312_vm1 = vsmask.f32 (!%p388_p2), 4352  ;;  %3135 = vmatprep.subr.bf16.mxu0 (!%p388_p2), %v3332_v59 }
   0xd   : > { %s4369_s26 = smov (!%p431_p3, %s2938_s26), 1  ;;  %vm476_vm3 = vcmp.ge.s32.totalorder %v462_v7, 1  ;;  %v492_v10 = vsel %vm490_vm2, 65537, %v3439_v1  ;;  %v3322_v19 = vld [vmem:[#allocation2 + $0x10] ss:$0 sps:$4 sm:$0x33]   ;;  %vm578_vm8 = vmpackc.low %vm3544_vm5, %vm3544_vm5  ;;  %3156 = vmatpush3.bf16.msra.mxu1 %v3333_v21 }
   0xe   : > { %s3127_s29 = sshll.u32 %s4369_s26, 3  ;;  %vm491_vm4 = vmpackc.low %vm476_vm3, %vm476_vm3  ;;  %v498_v11 = vshrl.u32 %v492_v10, 16  ;;  %v501_v12 = vshll.u32 %v492_v10, 16  ;;  %vm3554_vm9 = vcmp.le.s32.totalorder %v462_v7, 2  ;;  %v638_v23 = vld [vmem:[#allocation2 + $0x4] sm:$0x8] }
   0xf   : > { %s435_s17 = scalar_lea.vmem %s4298_s0, %s3127_s29  ;;  %v493_v14 = vsel %vm491_vm4, 65537, %v3439_v1  ;;  %v3568_v28 = vsel %vm578_vm8, 65537, %v3439_v1  ;;  %v787_v33 = vrot.slane %v3322_v19, 2  ;;  %vm579_vm12 = vmpackc.low %vm3554_vm9, %vm3554_vm9  ;;  %vm494_vm3 = vsmask.f32 1280  ;;  %s440_s18 = scalar_lea.vmem %s4311_s13, %s3127_s29 }
  0x10   : > { %v479_v8 = vld [vmem:[%s435_s17] sm:$0xf]  ;;  %v480_v9 = vld [vmem:[%s435_s17 + $0x4] sm:$0xf]  ;;  %v507_v15 = vshrl.u32 %v493_v14, 16  ;;  %v510_v16 = vshll.u32 %v493_v14, 16 }
  0x11   : > { %481 = vst.msk [vmem:[#allocation2 + $0x8] sm:$0xf] %vm444_vm0, %v479_v8  ;;  %482 = vst.msk [vmem:[#allocation2 + $0xc] sm:$0xf] %vm444_vm0, %v480_v9  ;;  %v3549_v17 = vrot.slane %v501_v12, 5  ;;  %v645_v18 = vrot.slane %v498_v11, 4 }
  0x12   : > { %v648_v20 = vrot.slane %v510_v16, 5  ;;  %v650_v26 = vrot.slane %v507_v15, 4  ;;  %v586_v39 = vshrl.u32 %v3568_v28, 16  ;;  %v500_v41 = vrot.slane %v498_v11, 6 }
  0x13   : > { %v646_v25 = vor.u32 %v645_v18, %v3549_v17  ;;  %vm4319_vm11 = vcmp.ne.s16.totalorder %v3549_v17, 0  ;;  %v503_v42 = vrot.slane %v501_v12, 7  ;;  %v581_v44 = vsel %vm579_vm12, 65537, %v3439_v1  ;;  %v700_v12 = vld [vmem:[#allocation2 + $0x10] sm:$0x1] }
  0x14   : > { %v651_v31 = vor.u32 %v650_v26, %v648_v20  ;;  %v656_v34 = vsel %vm4319_vm11, %v638_v23, 0  ;;  %v3596_v45 = vrot.slane %v507_v15, 6  ;;  %v3605_v50 = vrot.slane %v510_v16, 7 }
  0x15   : > { %v647_v30 = vrot.slane %v646_v25, 4  ;;  %v589_v56 = vshll.u32 %v3568_v28, 16  ;;  %v595_v57 = vshrl.u32 %v581_v44, 16  ;;  %v704_v58 = vrot.slane %v586_v39, 7  ;;  %v3334_v25 = vld [vmem:[%s4299_s1 + $0x10] sm:$0xff]   ;;  %v3420_v28 = vld [vmem:[%s4307_s9 + $0x58] sm:$0xff]  }
  0x16   : > { %v3580_v37 = vrot.slane %v651_v31, 4  ;;  %v588_v2 = vrot.slane %v586_v39, 5  ;;  %vm495_vm4 = vsmask.f32 5392  ;;  %v598_v6 = vshll.u32 %v581_v44, 16  ;;  %3136 = vmatpush3.bf16.msra.mxu0 %v3334_v25 }
  0x17   : > { %v649_v36 = vsel %vm3561_vm10, %v647_v30, %v648_v20  ;;  %v3617_v10 = vor.u32 %v704_v58, %v589_v56  ;;  %vm582_vm5 = vsmask.f32 2304  ;;  %v706_v13 = vrot.slane %v704_v58, 4  ;;  %v3335_v30 = vld [vmem:[%s4299_s1 + $0xd0] sm:$0xff]   ;;  %vm496_vm12 = vmor %vm494_vm3, %vm495_vm4  ;;  %v3341_v58 = vld [vmem:[%s4299_s1 + $0x98] sm:$0xff]  }
  0x18   : > { %v639_v27 = vld [vmem:[#allocation2 + $0x8] sm:$0xf]  ;;  %v640_v35 = vld [vmem:[#allocation2 + $0xc] sm:$0xf]  ;;  %vm3586_vm0 = vcmp.ne.s16.totalorder %v649_v36, 0  ;;  %vm4316_vm2 = vcmp.ne.s16.totalorder %v3580_v37, 0  ;;  %v3625_v22 = vor.u32 %v503_v42, %v500_v41  ;;  %3157 = vmatprep.subr.bf16.mxu1 %v3335_v30  ;;  %v513_v39 = vor.u32 %v3605_v50, %v3596_v45 }
  0x19   : > { %v3321_v32 = vld [vmem:[#allocation2 + $0x8] sm:$0xfc]   ;;  %v657_v46 = vsel %vm3586_vm0, %v639_v27, 0  ;;  %v658_v51 = vsel %vm4316_vm2, %v640_v35, 0  ;;  %v707_v14 = vrot.slane %v595_v57, 7  ;;  %v591_v16 = vrot.slane %v589_v56, 6 }
  0x1a   : > { %v786_v38 = vrot.slane %v3321_v32, 2  ;;  %v3323_v48 = vld [vmem:[#allocation2 + $0x4] sm:$0xfc]   ;;  %v2953_v52 = vcombine.low %v656_v34, %v657_v46  ;;  %v3324_v53 = vld [vmem:[#allocation2 + $0xc] ss:$0 sps:$4 sm:$0x33]   ;;  %v2954_v55 = vcombine.low %v658_v51, %v658_v51 }
  0x1b   : > { %v563_v0 = vrot.slane %v3323_v48, 2  ;;  %v564_v5 = vrot.slane %v3324_v53, 2  ;;  %v698_v9 = vld [vmem:[#allocation2 + $0x8] sm:$0xf]  ;;  %vm4320_vm7 = vcmp.ne.s16.totalorder %v3617_v10, 0  ;;  %v708_v19 = vor.u32 %v707_v14, %v598_v6  ;;  %v3336_v36 = vld [vmem:[%s4299_s1 + $0x58] sm:$0xff]  }
  0x1c   : > { %v788_v47 = vsel %vm562_vm13, %v786_v38, %v787_v33  ;;  %v669_v60 = vshrl.u32 %v2953_v52, 16  ;;  %v672_v61 = vshll.u32 %v2953_v52, 16  ;;  %v677_v62 = vshrl.u32 %v2954_v55, 16  ;;  %v699_v18 = vld [vmem:[#allocation2 + $0xc] sm:$0xf]  ;;  %3137 = vmatprep.subr.bf16.mxu0 %v3336_v36  ;;  %v3338_v45 = vld [vmem:[%s4299_s1 + $0x18] sm:$0xff]  }
  0x1d   : > { %789 = vrot.lane.b32.xlu1 %v788_v47, %s3440_s28  ;;  %v680_v63 = vshll.u32 %v2954_v55, 16  ;;  %v710_v20 = vrot.slane %v707_v14, 4  ;;  %v597_v24 = vrot.slane %v595_v57, 5  ;;  %v600_v26 = vrot.slane %v598_v6, 6  ;;  %v3337_v47 = vld [vmem:[%s4299_s1 + $0x90] sm:$0xff]   ;;  %3138 = vmatpush3.bf16.msra.mxu0 %v3338_v45  ;;  %v3339_v53 = vld [vmem:[%s4299_s1 + $0xd8] sm:$0xff]  }
  0x1e   : > { %v671_v3 = vrot.slane %v669_v60, 3  ;;  %v674_v4 = vrot.slane %v672_v61, 4  ;;  %v679_v7 = vrot.slane %v677_v62, 3  ;;  %v3632_v27 = vsel %vm703_vm6, %v706_v13, %v708_v19  ;;  %3158 = vmatpush3.bf16.msra.mxu1 %v3337_v47  ;;  %v3340_v56 = vld [vmem:[%s4299_s1 + $0x60] sm:$0xff]   ;;  %v795_v14 = vld [vmem:[#allocation2 + $0x10] sm:$0x7] }
  0x1f   : > { %v682_v8 = vrot.slane %v680_v63, 4  ;;  %vm3634_vm8 = vcmp.ne.s16.totalorder %v710_v20, 0  ;;  %v714_v29 = vsel %vm4320_vm7, %v698_v9, 0  ;;  %v565_v31 = vsel %vm562_vm13, %v563_v0, %v564_v5  ;;  %3159 = vmatprep.subr.bf16.mxu1 %v3339_v53  ;;  %3139 = vmatprep.subr.bf16.mxu0 %v3340_v56  ;;  %v3342_v60 = vld [vmem:[%s4299_s1 + $0x20] sm:$0xff]   ;;  %v3344_v0 = vld [vmem:[%s4299_s1 + $0x68] sm:$0xff]  }
  0x20   : > { %v675_v11 = vor.u32 %v674_v4, %v671_v3  ;;  %vm4317_vm9 = vcmp.ne.s16.totalorder %v3632_v27, 0  ;;  %v716_v32 = vsel %vm3634_vm8, %v700_v12, 0  ;;  %vm583_vm10 = vsmask.f32 6416  ;;  %v3343_v62 = vld [vmem:[%s4299_s1 + $0xe0] sm:$0xff]   ;;  %v3347_v12 = vld [vmem:[%s4299_s1 + $0xe8] sm:$0xff]  }
  0x21   : > { %v683_v15 = vor.u32 %v682_v8, %v679_v7  ;;  %v715_v33 = vsel %vm4317_vm9, %v699_v18, 0  ;;  %v2957_v34 = vcombine.low %v716_v32, %v716_v32  ;;  %v505_v38 = vrot.slane %v3625_v22, 4  ;;  %vm3668_vm15 = vmor %vm582_vm5, %vm583_vm10  ;;  %3140 = vmatpush3.bf16.msra.mxu0 %v3342_v60  ;;  %v3345_v3 = vld [vmem:[%s4299_s1 + $0xa0] sm:$0xff]   ;;  %v573_v5 = vld [vmem:[#allocation2 + $0xc] sm:$0x7] }
  0x22   : > { %v2956_v35 = vcombine.low %v714_v29, %v715_v33  ;;  %v3656_v40 = vor.u32 %v591_v16, %v588_v2  ;;  %v601_v42 = vor.u32 %v600_v26, %v597_v24  ;;  %v515_v57 = vrot.slane %v513_v39, 4  ;;  %3160 = vmatpush3.bf16.msra.mxu1 %v3341_v58  ;;  %v571_v4 = vld [vmem:[#allocation2 + $0x4] sm:$0xc]  ;;  %3141 = vmatprep.subr.bf16.mxu0 %v3344_v0  ;;  %v3346_v7 = vld [vmem:[%s4299_s1 + $0x28] sm:$0xff]   ;;  %v744_v32 = vld [vmem:[#allocation2 + $0x10] sm:$0x3] }
  0x23   : > { %v684_v23 = vsel %vm4312_vm1, %v675_v11, %v683_v15  ;;  %v734_v41 = vshll.u32 %v2957_v34, 16  ;;  %v3672_v51 = vsel %vm496_vm12, %v505_v38, %v513_v39  ;;  %vm516_vm6 = vcmp.ne.s16.totalorder %v3625_v22, 0  ;;  %3161 = vmatprep.subr.bf16.mxu1 %v3343_v62  ;;  %v793_v9 = vld [vmem:[#allocation2 + $0x8] sm:$0xc]  ;;  %v794_v11 = vld [vmem:[#allocation2 + $0xc] sm:$0xf] }
  0x24   : > { %685 = vrot.lane.b32.xlu0 %v684_v23, %s3440_s28  ;;  %v727_v44 = vshrl.u32 %v2956_v35, 16  ;;  %v729_v46 = vshll.u32 %v2956_v35, 16  ;;  %v593_v52 = vrot.slane %v3656_v40, 4  ;;  %v603_v54 = vrot.slane %v601_v42, 4  ;;  %v572_v18 = vld [vmem:[#allocation2 + $0x8] sm:$0xf] }
  0x25   : > { %v736_v50 = vrot.slane %v734_v41, 1  ;;  %vm4318_vm3 = vcmp.ne.s16.totalorder %v3672_v51, 0  ;;  %vm604_vm4 = vcmp.ne.s16.totalorder %v3656_v40, 0  ;;  %vm3706_vm10 = vcmp.ne.s16.totalorder %v515_v57, 0  ;;  %3142 = vmatpush3.bf16.msra.mxu0 %v3346_v7  ;;  %v743_v29 = vld [vmem:[#allocation2 + $0xc] sm:$0xf] }
  0x26   : > { %v731_v49 = vrot.slane %v729_v46, 1  ;;  %v3691_v61 = vsel %vm3668_vm15, %v593_v52, %v601_v42  ;;  %vm3698_vm5 = vcmp.ne.s16.totalorder %v603_v54, 0  ;;  %v607_v6 = vsel %vm604_vm4, %v571_v4, 0  ;;  %3162 = vmatpush3.bf16.msra.mxu1 %v3345_v3  ;;  %v3348_v34 = vld [vmem:[%s4299_s1 + $0x70] sm:$0xff]   ;;  %v742_v41 = vld [vmem:[#allocation2 + $0x8] sm:$0xe] }
  0x27   : > { %vm605_vm12 = vcmp.ne.s16.totalorder %v3691_v61, 0  ;;  %v609_v8 = vsel %vm3698_vm5, %v573_v5, 0  ;;  %vm4314_vm15 = vsmask.f32 5376  ;;  %v796_v15 = vsel %vm604_vm4, %v793_v9, 0  ;;  %3163 = vmatprep.subr.bf16.mxu1 %v3347_v12  ;;  %3143 = vmatprep.subr.bf16.mxu0 %v3348_v34  ;;  %v3349_v52 = vld [vmem:[%s4299_s1 + $0xa8] sm:$0xff]  }
  0x28   : > { %566 = vrot.lane.b32.xlu0 %v565_v31, %s3440_s28  ;;  %v732_v55 = vor.u32 %v731_v49, %v727_v44  ;;  %v2952_v13 = vcombine.low %v609_v8, %v609_v8  ;;  %v797_v16 = vsel %vm605_vm12, %v794_v11, 0  ;;  %vm549_vm1 = vcmask 523264   ;;  %v483_v4 = vld [vmem:[#allocation2 + $0x4] sm:$0xe]  ;;  %v485_v5 = vld [vmem:[#allocation2 + $0xc] sm:$0x3] }
  0x29   : > { %v798_v19 = vsel %vm3698_vm5, %v795_v14, 0  ;;  %v2962_v20 = vcombine.low %v796_v15, %v797_v16  ;;  %v608_v21 = vsel %vm605_vm12, %v572_v18, 0  ;;  %v746_v33 = vsel %vm4318_vm3, %v743_v29, 0  ;;  %v484_v9 = vld [vmem:[#allocation2 + $0x8] sm:$0xf] }
  0x2a   : > { %v737_v59 = vsel %vm4313_vm14, %v732_v55, %v736_v50  ;;  %v628_v23 = vshrl.u32 %v2952_v13, 16  ;;  %v631_v24 = vshll.u32 %v2952_v13, 16  ;;  %v2963_v25 = vcombine.low %v798_v19, %v798_v19  ;;  %3164 = vmatpush3.bf16.msra.mxu1 %v3349_v52  ;;  %v3351_v15 = vld [vmem:[#allocation2 + $0x8] sm:$0xff]  }
  0x2b   : > { %738 = vrot.lane.b32.xlu1 %v737_v59, %s3440_s28  ;;  %v2951_v26 = vcombine.low %v607_v6, %v608_v21  ;;  %v808_v30 = vshrl.u32 %v2962_v20, 16  ;;  %v811_v31 = vshll.u32 %v2962_v20, 16  ;;  %v747_v50 = vsel %vm3706_vm10, %v744_v32, 0  ;;  %v3350_v59 = vld [vmem:[%s4299_s1 + $0x30] sm:$0xff]   ;;  %697 = vst.msk [vmem:[#allocation3 + $0x10] sm:$0xff] %vm549_vm1, %v3351_v15 }
  0x2c   : > { %v630_v35 = vrot.slane %v628_v23, 2  ;;  %v633_v36 = vrot.slane %v631_v24, 3  ;;  %v816_v38 = vshrl.u32 %v2963_v25, 16  ;;  %v819_v39 = vshll.u32 %v2963_v25, 16  ;;  %3144 = vmatpush3.bf16.msra.mxu0 %v3350_v59  ;;  %v3352_v23 = vld [vmem:[%s4299_s1 + $0xf0] sm:$0xff]   ;;  %v3359_v59 = vld [vmem:[%s4299_s1 + $0x108] sm:$0xff]  }
  0x2d   : > { %v810_v42 = vrot.slane %v808_v30, 2  ;;  %v813_v44 = vrot.slane %v811_v31, 3  ;;  %v620_v46 = vshrl.u32 %v2951_v26, 16  ;;  %v623_v47 = vshll.u32 %v2951_v26, 16  ;;  %v3353_v30 = vld [vmem:[%s4299_s1 + $0x78] sm:$0xff]   ;;  %3165 = vmatprep.subr.bf16.mxu1 %v3352_v23 }
  0x2e   : > { %v634_v45 = vor.u32 %v633_v36, %v630_v35  ;;  %v818_v48 = vrot.slane %v816_v38, 2  ;;  %v821_v49 = vrot.slane %v819_v39, 3  ;;  %vm4315_vm14 = vsmask.f32 6400  ;;  %3145 = vmatprep.subr.bf16.mxu0 %v3353_v30  ;;  %v3354_v36 = vld [vmem:[%s4299_s1 + $0xb0] sm:$0xff]   ;;  %v3355_v38 = vld [vmem:[%s4299_s1 + $0x38] sm:$0xff]  }
  0x2f   : > { %v814_v53 = vor.u32 %v813_v44, %v810_v42  ;;  %v622_v54 = vrot.slane %v620_v46, 2  ;;  %v625_v55 = vrot.slane %v623_v47, 3  ;;  %v2959_v56 = vcombine.low %v747_v50, %v747_v50  ;;  %3166 = vmatpush3.bf16.msra.mxu1 %v3354_v36  ;;  %v3356_v46 = vld [vmem:[%s4299_s1 + $0xf8] sm:$0xff]  }
  0x30   : > { %v822_v57 = vor.u32 %v821_v49, %v818_v48  ;;  %v745_v58 = vsel %vm516_vm6, %v742_v41, 0  ;;  %v519_v7 = vsel %vm516_vm6, %v483_v4, 0  ;;  %v521_v8 = vsel %vm3706_vm10, %v485_v5, 0  ;;  %3146 = vmatpush3.bf16.msra.mxu0 %v3355_v38  ;;  %3167 = vmatprep.subr.bf16.mxu1 %v3356_v46  ;;  %v3364_v4 = vld [vmem:[%s4301_s3 + $0x80] sm:$0xff]   ;;  %v3365_v5 = vld [vmem:[%s4301_s3 + $0x88] sm:$0xff]  }
  0x31   : > { %v626_v60 = vor.u32 %v625_v55, %v622_v54  ;;  %v765_v62 = vshrl.u32 %v2959_v56, 16  ;;  %v768_v0 = vshll.u32 %v2959_v56, 16  ;;  %v2958_v3 = vcombine.low %v745_v58, %v746_v33  ;;  %v3358_v56 = vld [vmem:[%s4299_s1 + $0x100] sm:$0xff]  }
  0x32   : > { %v823_v6 = vsel %vm4314_vm15, %v814_v53, %v822_v57  ;;  %v2948_v18 = vcombine.low %v521_v8, %v521_v8  ;;  %v520_v19 = vsel %vm4318_vm3, %v484_v9, 0  ;;  %v3441_v48 = vmov 0.0   ;;  %v3370_v8 = vld [vmem:[%s4301_s3 + $0x48] sm:$0xff]  }
  0x33   : > { %825 = vst.msk [vmem:[#allocation3 + $0x20] sm:$0xff] %vm549_vm1, %v823_v6  ;;  %v635_v11 = vsel %vm4314_vm15, %v626_v60, %v634_v45  ;;  %v767_v12 = vrot.slane %v765_v62, 1  ;;  %v770_v13 = vrot.slane %v768_v0, 2  ;;  %v757_v14 = vshrl.u32 %v2958_v3, 16  ;;  %v3357_v45 = vld [vmem:[%s4299_s1 + $0xb8] sm:$0xff]   ;;  %3259 = vmatprep.subr.bf16.mxu0 %v3441_v48  ;;  %v3360_v60 = vld [vmem:[%s4299_s1 + $0x110] sm:$0xff]  }
  0x34   : > { %637 = vst.msk [vmem:[#allocation3 + $0x8] sm:$0xff] %vm549_vm1, %v635_v11  ;;  %v760_v16 = vshll.u32 %v2958_v3, 16  ;;  %v2947_v21 = vcombine.low %v519_v7, %v520_v19  ;;  %v540_v26 = vshrl.u32 %v2948_v18, 16  ;;  %v543_v29 = vshll.u32 %v2948_v18, 16  ;;  %3168 = vmatpush3.bf16.msra.mxu1 %v3357_v45  ;;  %v3361_v0 = vld [vmem:[%s4299_s1 + $0x118] sm:$0xff]   ;;  %v3368_v6 = vld [vmem:[%s4301_s3 + $0x40] sm:$0xff]  }
  0x35   : > { %v759_v20 = vrot.slane %v757_v14, 1  ;;  %v771_v24 = vor.u32 %v770_v13, %v767_v12  ;;  %vm569_vm15 = vcmask 1048064   ;;  %v3369_v7 = vld [vmem:[%s4301_s3] sm:$0xff]   ;;  %3180 = vmatprep.subr.bf16.mxu1 %v3368_v6  ;;  %v3371_v9 = vld [vmem:[%s4301_s3 + $0x8] sm:$0xff]   ;;  %v3372_v11 = vld [vmem:[%s4301_s3 + $0x50] sm:$0xff]  }
  0x36   : > { %v762_v25 = vrot.slane %v760_v16, 2  ;;  %v532_v31 = vshrl.u32 %v2947_v21, 16  ;;  %v535_v32 = vshll.u32 %v2947_v21, 16  ;;  %v542_v34 = vrot.slane %v540_v26, 1  ;;  %v3373_v12 = vld [vmem:[%s4301_s3 + $0x10] sm:$0xff]  }
  0x37   : > { %v545_v35 = vrot.slane %v543_v29, 2 }
  0x38   : > { %v763_v33 = vor.u32 %v762_v25, %v759_v20  ;;  %v534_v39 = vrot.slane %v532_v31, 1  ;;  %v537_v41 = vrot.slane %v535_v32, 2  ;;  %v2964_v20 = vld [vmem:[%s4300_s2] ss:$0 sm:$0xff] }
  0x39   : > { %v546_v44 = vor.u32 %v545_v35, %v542_v34  ;;  %v1401_v35 = vld [vmem:[#allocation2 + $0x10] sm:$0x1] }
  0x3a   : > { %v772_v42 = vsel %vm4315_vm14, %v763_v33, %v771_v24  ;;  %v538_v47 = vor.u32 %v537_v41, %v534_v39  ;;  %v830_v3 = vld [vmem:[#allocation3 + $0x20] sm:$0xff]  ;;  %v1484_v33 = vld [vmem:[#allocation2 + $0x10] sm:$0x7]  ;;  %v1404_v46 = vsel %vm3634_vm8, %v1401_v35, 0 }
  0x3b   : > { %774 = vst.msk [vmem:[#allocation3 + $0x18] sm:$0xff] %vm549_vm1, %v772_v42  ;;  %v1487_v38 = vsel %vm3698_vm5, %v1484_v33, 0  ;;  %v1431_v42 = vld [vmem:[#allocation2 + $0x10] sm:$0x3] }
  0x3c   : > { %v547_v49 = vsel %vm4315_vm14, %v538_v47, %v546_v44  ;;  %vm3442_vm14 = vmmov 0  }
  0x3d   : > { %550 = vst.msk [vmem:[#allocation3] sm:$0xff] %vm549_vm1, %v547_v49 }
  0x8f   : > { %v790_v50 = vpop.permute.xlu1 %789 }
  0x90   : > { %792 = vst.msk [vmem:[#allocation3 + $0x18] sm:$0xff] %vm569_vm15, %v790_v50  ;;  %v3020_v50 = vcombine.low %v1487_v38, %v1487_v38 }
  0x96   : > { %v686_v53 = vpop.permute.xlu0 %685 }
  0x97   : > { %v829_v52 = vld [vmem:[#allocation3 + $0x18] sm:$0xff]  ;;  %688 = vst.msk [vmem:[#allocation3 + $0x8] sm:$0xff] %vm569_vm15, %v686_v53 }
  0x98   : > { %1202 = vmatprep.mubr.bf16.mxu1 %v829_v52  ;;  %v1434_v52 = vsel %vm3706_vm10, %v1431_v42, 0 }
  0x9a   : > { %v567_v54 = vpop.permute.xlu0 %566 }
  0x9b   : > { %570 = vst.msk [vmem:[#allocation3] sm:$0xff] %vm569_vm15, %v567_v54 }
  0x9d   : > { %v739_v57 = vpop.permute.xlu1 %738 }
  0x9e   : > { %v827_v55 = vld [vmem:[#allocation3 + $0x8] sm:$0xff]  ;;  %741 = vst.msk [vmem:[#allocation3 + $0x10] sm:$0xff] %vm569_vm15, %v739_v57  ;;  %v3016_v57 = vcombine.low %v1434_v52, %v1434_v52  ;;  %vm1297_vm15 = vcmask 261120  }
  0x9f   : > { %1161 = vmatprep.mubr.bf16.mxu0 %v827_v55  ;;  %v3014_v55 = vcombine.low %v1404_v46, %v1404_v46  ;;  %v3377_v46 = vld [vmem:[%s4301_s3 + $0x60] sm:$0xff]  }
  0xa0   : > { %v1452_v6 = vshrl.u32 %v3016_v57, 16 }
  0xa2   : > { %v826_v58 = vld [vmem:[#allocation3] sm:$0xff] }
  0xa3   : > { %1162 = vmatmul.mubr.bf16.vlgmr.msra.gmra.mrb[0].mxu0 %v826_v58  ;;  %v1505_v58 = vshrl.u32 %v3020_v50, 16 }
  0xa4   : > { %3260 = vmatpush3.bf16.msra.mxu0 %v3358_v56  ;;  %3267 = vmatprep.mubr.msk.bf16.mxu0 %vm3442_vm14, %v3441_v48 }
  0xa5   : > { %3261 = vmatprep.subr.bf16.mxu0 %v3441_v48  ;;  %v828_v62 = vld [vmem:[#allocation3 + $0x10] sm:$0xff] }
  0xa6   : > { %1203 = vmatmul.mubr.bf16.vlgmr.msra.gmra.mrb[0].mxu1 %v828_v62  ;;  %v3375_v62 = vld [vmem:[%s4301_s3 + $0x18] sm:$0xff]  }
  0xa7   : > { %3181 = vmatpush3.bf16.msra.mxu1 %v3369_v7  ;;  %v1455_v7 = vshll.u32 %v3016_v57, 16 }
  0xa8   : > { %3262 = vmatpush3.bf16.msra.mxu0 %v3359_v59  ;;  %3182 = vmatprep.subr.bf16.mxu1 %v3370_v8  ;;  %v1508_v59 = vshll.u32 %v3020_v50, 16  ;;  %v3846_v8 = vrot.slane %v1505_v58, 2 }
  0xa9   : > { %3263 = vmatprep.subr.bf16.mxu0 %v3441_v48 }
  0xab   : > { %3183 = vmatpush3.bf16.msra.mxu1 %v3371_v9  ;;  %v3848_v9 = vrot.slane %v1508_v59, 3 }
  0xac   : > { %3264 = vmatpush3.bf16.msra.mxu0 %v3360_v60  ;;  %3184 = vmatprep.subr.bf16.mxu1 %v3372_v11  ;;  %v3374_v60 = vld [vmem:[%s4301_s3 + $0x58] sm:$0xff]  }
  0xad   : > { %3265 = vmatprep.subr.bf16.mxu0 %v3441_v48 }
  0xaf   : > { %3185 = vmatpush3.bf16.msra.mxu1 %v3373_v12 }
  0xb0   : > { %3266 = vmatpush3.bf16.msra.mxu0 %v3361_v0  ;;  %v3844_v0 = vshll.u32 %v3014_v55, 16  ;;  %3186 = vmatprep.subr.bf16.mxu1 %v3374_v60 }
  0xb1   : > { %3271 = vmatprep.subr.bf16.mxu0 %v3441_v48 }
  0xb2   : > { %v1423_v12 = vrot.slane %v3844_v0, 1 }
  0xb3   : > { %3268 = vmatmul.mubr.msk.bf16.vlgmr.msra.gmra.mrb[4].mxu0 %vm549_vm1, %v830_v3  ;;  %vm4321_vm1 = vcmask 257024   ;;  %v1318_v3 = vld [vmem:[#allocation2 + $0x4] sm:$0xc]  ;;  %3187 = vmatpush3.bf16.msra.mxu1 %v3375_v62 }
  0xb4   : > { %3275 = vmatprep.mubr.msk.bf16.mxu0 %vm3442_vm14, %v3441_v48  ;;  %3272 = vmatpush3.bf16.msra.mxu0 %v3364_v4  ;;  %v1354_v4 = vld [vmem:[#allocation2 + $0x4] sm:$0x8]  ;;  %v1321_v11 = vsel %vm604_vm4, %v1318_v3, 0 }
  0xb5   : > { %3273 = vmatprep.subr.bf16.mxu0 %v3441_v48  ;;  %3188 = vmatprep.subr.bf16.mxu1 %v3377_v46 }
  0xb8   : > { %3274 = vmatpush3.bf16.msra.mxu0 %v3365_v5  ;;  %v1265_v5 = vld [vmem:[#allocation2 + $0x4] sm:$0xe] }
 0x176   : > { %v3147_v13 = vpop.f32.mrb[0].mxu0 }
 0x177   : > { %v3148_v14 = vpop.f32.mrb[1].mxu0 }
 0x178   : > { %v3149_v15 = vadd.f32 %v3148_v14, %v3147_v13  ;;  %v3150_v16 = vpop.f32.mrb[2].mxu0  ;;  %v1357_v13 = vsel %vm4319_vm11, %v1354_v4, 0  ;;  %v3857_v14 = vsel %vm516_vm6, %v1265_v5, 0  ;;  %v3883_v4 = vld [vmem:[#allocation2 + $0x10] ss:$0 sps:$4 sm:$0x33]  }
 0x179   : > { %v3151_v18 = vpop.f32.mrb[3].mxu0  ;;  %v3169_v23 = vpop.f32.mrb[0].mxu1 }
 0x17a   : > { %v3152_v19 = vadd.f32 %v3151_v18, %v3150_v16  ;;  %v1164_v21 = vadd.f32 %v3149_v15, %v2964_v20  ;;  %v3170_v24 = vpop.f32.mrb[1].mxu1 }
 0x17b   : > { %v3171_v26 = vadd.f32 %v3170_v24, %v3169_v23  ;;  %v3172_v29 = vpop.f32.mrb[2].mxu1 }
 0x17c   : > { %v1167_v25 = vadd.f32 %v3152_v19, %v2964_v20  ;;  %v3173_v30 = vpop.f32.mrb[3].mxu1  ;;  %v3859_v20 = vrot.slane %v1452_v6, 1 }
 0x17d   : > { %v3174_v31 = vadd.f32 %v3173_v30, %v3172_v29  ;;  %v1205_v32 = vadd.f32 %v3171_v26, %v1164_v21  ;;  %v3861_v21 = vrot.slane %v1455_v7, 2 }
 0x17f   : > { %v1208_v34 = vadd.f32 %v3174_v31, %v1167_v25  ;;  %v1511_v25 = vor.u32 %v3848_v9, %v3846_v8 }
 0x186   : > { %v1245_v36 = vpop.f32.mrb[4].mxu0 }
 0x187   : > { %v1246_v39 = vadd.f32 %v1245_v36, %v1205_v32  ;;  %v3269_v41 = vpop.f32.mrb[5].mxu0 }
 0x188   : > { %v1248_v44 = vpop.f32.mrb[6].mxu0 }
 0x189   : > { %v1252_v47 = vmax.f32 %v1246_v39, 0.0  ;;  %v1249_v45 = vadd.f32 %v1248_v44, %v1208_v34  ;;  %v3270_v49 = vpop.f32.mrb[7].mxu0 }
 0x18b   : > { %v3129_v53 = vpack.c.bf16 %v1252_v47, %v1252_v47  ;;  %v1253_v54 = vmax.f32 %v1249_v45, 0.0 }
 0x18d   : > { %v3130_v56 = vpack.c.bf16 %v1253_v54, %v1253_v54  ;;  %1263 = vst.msk [vmem:[#allocation2 + $0x8] sm:$0xf] %vm4321_vm1, %v3129_v53 }
 0x18f   : > { %1264 = vst.msk [vmem:[#allocation2 + $0xc] sm:$0xf] %vm4321_vm1, %v3130_v56 }
 0x194   : > { %v3362_v15 = vld [vmem:[#allocation2 + $0x4] sm:$0xfc]  }
 0x195   : > { %v1399_v16 = vld [vmem:[#allocation2 + $0x8] sm:$0xf]  ;;  %v1310_v26 = vrot.slane %v3362_v15, 2 }
 0x196   : > { %v1319_v18 = vld [vmem:[#allocation2 + $0x8] sm:$0xf]  ;;  %v3363_v23 = vld [vmem:[#allocation2 + $0xc] ss:$0 sps:$4 sm:$0x33]   ;;  %v1402_v24 = vsel %vm4320_vm7, %v1399_v16, 0 }
 0x197   : > { %v1429_v19 = vld [vmem:[#allocation2 + $0x8] sm:$0xe]  ;;  %v1400_v29 = vld [vmem:[#allocation2 + $0xc] sm:$0xf]  ;;  %v1322_v31 = vsel %vm605_vm12, %v1319_v18, 0  ;;  %v1311_v32 = vrot.slane %v3363_v23, 2 }
 0x198   : > { %v1320_v30 = vld [vmem:[#allocation2 + $0xc] sm:$0x7]  ;;  %v1403_v33 = vsel %vm4317_vm9, %v1400_v29, 0  ;;  %v3008_v35 = vcombine.low %v1321_v11, %v1322_v31  ;;  %v1432_v42 = vsel %vm516_vm6, %v1429_v19, 0  ;;  %v1355_v52 = vld [vmem:[#allocation2 + $0x8] sm:$0xf] }
 0x199   : > { %v1323_v34 = vsel %vm3698_vm5, %v1320_v30, 0  ;;  %v1430_v36 = vld [vmem:[#allocation2 + $0xc] sm:$0xf]  ;;  %v3013_v39 = vcombine.low %v1402_v24, %v1403_v33  ;;  %v1312_v47 = vsel %vm562_vm13, %v1310_v26, %v1311_v32  ;;  %v1482_v58 = vld [vmem:[#allocation2 + $0x8] sm:$0xc]  ;;  %v1358_v11 = vsel %vm3586_vm0, %v1355_v52, 0 }
 0x19a   : > { %v3376_v38 = vld [vmem:[#allocation2 + $0x8] sm:$0xff]   ;;  %v3009_v41 = vcombine.low %v1323_v34, %v1323_v34  ;;  %v1433_v44 = vsel %vm4318_vm3, %v1430_v36, 0  ;;  %v1333_v45 = vshrl.u32 %v3008_v35, 16  ;;  %v1336_v49 = vshll.u32 %v3008_v35, 16  ;;  %1313 = vrot.lane.b32.xlu1 %v1312_v47, %s3443_s19  ;;  %v3378_v24 = vld [vmem:[%s4301_s3 + $0x20] sm:$0xff]  }
 0x19b   : > { %v3015_v50 = vcombine.low %v1432_v42, %v1433_v44  ;;  %v1356_v53 = vld [vmem:[#allocation2 + $0xc] sm:$0xf]  ;;  %1398 = vst.msk [vmem:[#allocation3 + $0x8] sm:$0xff] %vm1297_vm15, %v3376_v38  ;;  %v1414_v54 = vshrl.u32 %v3013_v39, 16  ;;  %v1416_v55 = vshll.u32 %v3013_v39, 16  ;;  %v3010_v30 = vcombine.low %v1357_v13, %v1358_v11  ;;  %3189 = vmatpush3.bf16.msra.mxu1 %v3378_v24  ;;  %v3381_v44 = vld [vmem:[%s4301_s3 + $0x70] sm:$0xff]  }
 0x19c   : > { %v1341_v56 = vshrl.u32 %v3009_v41, 16  ;;  %v1344_v57 = vshll.u32 %v3009_v41, 16  ;;  %v1335_v59 = vrot.slane %v1333_v45, 2  ;;  %v1338_v60 = vrot.slane %v1336_v49, 3  ;;  %v1483_v15 = vld [vmem:[#allocation2 + $0xc] sm:$0xf] }
 0x19d   : > { %v1444_v62 = vshrl.u32 %v3015_v50, 16  ;;  %v1447_v3 = vshll.u32 %v3015_v50, 16  ;;  %v1418_v5 = vrot.slane %v1416_v55, 1  ;;  %v1359_v23 = vsel %vm4316_vm2, %v1356_v53, 0  ;;  %v3366_v32 = vld [vmem:[#allocation2 + $0x8] sm:$0xfc]  }
 0x19e   : > { %v1343_v6 = vrot.slane %v1341_v56, 2  ;;  %v1346_v7 = vrot.slane %v1344_v57, 3  ;;  %v1339_v16 = vor.u32 %v1338_v60, %v1335_v59  ;;  %v3011_v31 = vcombine.low %v1359_v23, %v1359_v23  ;;  %v1267_v38 = vld [vmem:[#allocation2 + $0xc] sm:$0x3]  ;;  %v1266_v0 = vld [vmem:[#allocation2 + $0x8] sm:$0xf] }
 0x19f   : > { %v1446_v18 = vrot.slane %v1444_v62, 1  ;;  %v1449_v19 = vrot.slane %v1447_v3, 2  ;;  %v1419_v26 = vor.u32 %v1418_v5, %v1414_v54  ;;  %v1458_v34 = vor.u32 %v3861_v21, %v3859_v20  ;;  %v3379_v39 = vld [vmem:[%s4301_s3 + $0x68] sm:$0xff]  }
 0x1a0   : > { %v1347_v29 = vor.u32 %v1346_v7, %v1343_v6  ;;  %v1485_v35 = vsel %vm604_vm4, %v1482_v58, 0  ;;  %v1486_v36 = vsel %vm605_vm12, %v1483_v15, 0  ;;  %v3380_v13 = vld [vmem:[%s4301_s3 + $0x28] sm:$0xff]   ;;  %vm4338_vm2 = vsmask.f32 7424  ;;  %3190 = vmatprep.subr.bf16.mxu1 %v3379_v39  ;;  %v3382_v58 = vld [vmem:[%s4301_s3 + $0x30] sm:$0xff]  }
 0x1a1   : > { %v1450_v33 = vor.u32 %v1449_v19, %v1446_v18  ;;  %v1424_v20 = vsel %vm4338_vm2, %v1419_v26, %v1423_v12  ;;  %vm4339_vm9 = vsmask.f32 5376  ;;  %v1369_v41 = vshrl.u32 %v3010_v30, 16  ;;  %3191 = vmatpush3.bf16.msra.mxu1 %v3380_v13  ;;  %v3384_v26 = vld [vmem:[%s4301_s3 + $0x38] sm:$0xff]  }
 0x1a2   : > { %v1348_v21 = vsel %vm4339_vm9, %v1339_v16, %v1347_v29  ;;  %v1372_v42 = vshll.u32 %v3010_v30, 16  ;;  %1425 = vrot.lane.b32.xlu0 %v1424_v20, %s3443_s19  ;;  %v1377_v46 = vshrl.u32 %v3011_v31, 16  ;;  %v1380_v47 = vshll.u32 %v3011_v31, 16  ;;  %3192 = vmatprep.subr.bf16.mxu1 %v3381_v44 }
 0x1a3   : > { %1349 = vrot.lane.b32.xlu1 %v1348_v21, %s3440_s28  ;;  %v3019_v45 = vcombine.low %v1485_v35, %v1486_v36  ;;  %v1476_v49 = vrot.slane %v3883_v4, 2  ;;  %v1371_v50 = vrot.slane %v1369_v41, 3  ;;  %v1475_v52 = vrot.slane %v3366_v32, 2  ;;  %v3383_v4 = vld [vmem:[%s4301_s3 + $0x78] sm:$0xff]  }
 0x1a4   : > { %v1374_v12 = vrot.slane %v1372_v42, 4  ;;  %v1270_v53 = vsel %vm3706_vm10, %v1267_v38, 0  ;;  %v1379_v54 = vrot.slane %v1377_v46, 3  ;;  %v1382_v55 = vrot.slane %v1380_v47, 4 }
 0x1a5   : > { %v1497_v56 = vshrl.u32 %v3019_v45, 16  ;;  %v1500_v57 = vshll.u32 %v3019_v45, 16  ;;  %vm4340_vm2 = vsmask.f32 6400  ;;  %v3005_v62 = vcombine.low %v1270_v53, %v1270_v53  ;;  %3193 = vmatpush3.bf16.msra.mxu1 %v3382_v58  ;;  %v3387_v45 = vld [vmem:[%s4303_s5 + $0x80] sm:$0xff]   ;;  %v3395_v53 = vld [vmem:[%s4303_s5 + $0x50] sm:$0xff]  }
 0x1a6   : > { %v1459_v59 = vsel %vm4340_vm2, %v1450_v33, %v1458_v34  ;;  %v1375_v60 = vor.u32 %v1374_v12, %v1371_v50  ;;  %v1269_v3 = vsel %vm4318_vm3, %v1266_v0, 0  ;;  %v1383_v5 = vor.u32 %v1382_v55, %v1379_v54  ;;  %3194 = vmatprep.subr.bf16.mxu1 %v3383_v4  ;;  %v3391_v0 = vld [vmem:[%s4303_s5 + $0x40] sm:$0xff]   ;;  %v3393_v12 = vld [vmem:[%s4303_s5 + $0x48] sm:$0xff]   ;;  %v3396_v54 = vld [vmem:[%s4303_s5 + $0x10] sm:$0xff]  }
 0x1a7   : > { %1460 = vrot.lane.b32.xlu0 %v1459_v59, %s3440_s28  ;;  %v1499_v6 = vrot.slane %v1497_v56, 2  ;;  %v1502_v7 = vrot.slane %v1500_v57, 3  ;;  %v3004_v11 = vcombine.low %v3857_v14, %v1269_v3  ;;  %v1288_v15 = vshrl.u32 %v3005_v62, 16  ;;  %v3392_v50 = vld [vmem:[%s4303_s5] sm:$0xff]   ;;  %3205 = vmatprep.subr.bf16.mxu0 %v3391_v0  ;;  %v1980_v4 = vld [vmem:[#allocation2 + $0x10] sm:$0x7] }
 0x1a8   : > { %v1291_v16 = vshll.u32 %v3005_v62, 16  ;;  %vm4341_vm9 = vsmask.f32 4352  ;;  %v1477_v29 = vsel %vm562_vm13, %v1475_v52, %v1476_v49  ;;  %vm4342_vm2 = vsmask.f32 5376  ;;  %v3388_v49 = vld [vmem:[%s4303_s5 + $0x88] sm:$0xff]  }
 0x1a9   : > { %v1384_v18 = vsel %vm4341_vm9, %v1375_v60, %v1383_v5  ;;  %v1503_v19 = vor.u32 %v1502_v7, %v1499_v6  ;;  %v1280_v23 = vshrl.u32 %v3004_v11, 16  ;;  %v1283_v24 = vshll.u32 %v3004_v11, 16  ;;  %3195 = vmatpush3.bf16.msra.mxu1 %v3384_v26  ;;  %v3394_v52 = vld [vmem:[%s4303_s5 + $0x8] sm:$0xff]   ;;  %v3021_v56 = vld [vmem:[%s4302_s4] ss:$0 sm:$0xff] }
 0x1aa   : > { %1385 = vrot.lane.b32.xlu1 %v1384_v18, %s3444_s22  ;;  %v1290_v30 = vrot.slane %v1288_v15, 1  ;;  %v1293_v31 = vrot.slane %v1291_v16, 2  ;;  %3279 = vmatprep.subr.bf16.mxu1 %v3441_v48  ;;  %vm4343_vm9 = vsmask.f32 6400  ;;  %vm1316_vm3 = vcmask 523520  }
 0x1ab   : > { %v1512_v14 = vsel %vm4342_vm2, %v1503_v19, %v1511_v25  ;;  %1478 = vrot.lane.b32.xlu0 %v1477_v29, %s3444_s22  ;;  %v1282_v32 = vrot.slane %v1280_v23, 1  ;;  %v1285_v33 = vrot.slane %v1283_v24, 2  ;;  %vm1352_vm2 = vcmask 785920   ;;  %v1897_v7 = vld [vmem:[#allocation2 + $0x10] sm:$0x1] }
 0x1ac   : > { %1514 = vst.msk [vmem:[#allocation3 + $0x10] sm:$0xff] %vm1297_vm15, %v1512_v14  ;;  %v1294_v34 = vor.u32 %v1293_v31, %v1290_v30  ;;  %v1927_v15 = vld [vmem:[#allocation2 + $0x10] sm:$0x3]  ;;  %v1983_v16 = vsel %vm3698_vm5, %v1980_v4, 0  ;;  %v1900_v19 = vsel %vm3634_vm8, %v1897_v7, 0 }
 0x1ad   : > { %v1286_v35 = vor.u32 %v1285_v33, %v1282_v32  ;;  %v1930_v23 = vsel %vm3706_vm10, %v1927_v15, 0  ;;  %v3059_v24 = vcombine.low %v1983_v16, %v1983_v16  ;;  %v3053_v29 = vcombine.low %v1900_v19, %v1900_v19  ;;  %v3397_v33 = vld [vmem:[%s4303_s5 + $0x58] sm:$0xff]   ;;  %v3401_v15 = vld [vmem:[%s4303_s5 + $0x20] sm:$0xff]  }
 0x1ae   : > { %v3055_v14 = vcombine.low %v1930_v23, %v1930_v23 }
 0x1af   : > { %v1295_v36 = vsel %vm4343_vm9, %v1286_v35, %v1294_v34  ;;  %vm1388_vm9 = vcmask 1048320   ;;  %v2001_v32 = vshrl.u32 %v3059_v24, 16  ;;  %v3398_v34 = vld [vmem:[%s4303_s5 + $0x18] sm:$0xff]   ;;  %v2004_v35 = vshll.u32 %v3059_v24, 16 }
 0x1b0   : > { %1298 = vst.msk [vmem:[#allocation3] sm:$0xff] %vm1297_vm15, %v1295_v36  ;;  %v3998_v36 = vshll.u32 %v3053_v29, 16 }
 0x1b3   : > { %v1517_v38 = vld [vmem:[#allocation3 + $0x10] sm:$0xff] }
 0x1b4   : > { %3276 = vmatmul.mubr.msk.bf16.vlgmr.msra.gmra.mrb[8].mxu0 %vm1297_vm15, %v1517_v38  ;;  %v1816_v38 = vld [vmem:[#allocation2 + $0x4] sm:$0xc] }
 0x1b5   : > { %3206 = vmatpush3.bf16.msra.mxu0 %v3392_v50 }
 0x1b6   : > { %3207 = vmatprep.subr.bf16.mxu0 %v3393_v12 }
 0x1b9   : > { %3208 = vmatpush3.bf16.msra.mxu0 %v3394_v52 }
 0x1ba   : > { %3209 = vmatprep.subr.bf16.mxu0 %v3395_v53 }
 0x1bd   : > { %3210 = vmatpush3.bf16.msra.mxu0 %v3396_v54 }
 0x1be   : > { %3211 = vmatprep.subr.bf16.mxu0 %v3397_v33 }
 0x1c1   : > { %3212 = vmatpush3.bf16.msra.mxu0 %v3398_v34 }
 0x20c   : > { %v1314_v8 = vpop.permute.xlu1 %1313 }
 0x20d   : > { %1317 = vst.msk [vmem:[#allocation3] sm:$0xff] %vm1316_vm3, %v1314_v8  ;;  %v1851_v8 = vld [vmem:[#allocation2 + $0x4] sm:$0x8] }
 0x214   : > { %v1426_v9 = vpop.permute.xlu0 %1425 }
 0x215   : > { %v1350_v25 = vpop.permute.xlu1 %1349  ;;  %1428 = vst.msk [vmem:[#allocation3 + $0x8] sm:$0xff] %vm1316_vm3, %v1426_v9  ;;  %v1948_v9 = vshrl.u32 %v3055_v14, 16 }
 0x216   : > { %1353 = vst.msk [vmem:[#allocation3] sm:$0xff] %vm1352_vm2, %v1350_v25  ;;  %v1951_v25 = vshll.u32 %v3055_v14, 16 }
 0x219   : > { %v1461_v39 = vpop.permute.xlu0 %1460 }
 0x21a   : > { %1463 = vst.msk [vmem:[#allocation3 + $0x8] sm:$0xff] %vm1352_vm2, %v1461_v39  ;;  %v4000_v39 = vld [vmem:[#allocation2 + $0x10] ss:$0 sps:$4 sm:$0x33]  }
 0x21c   : > { %v1386_v13 = vpop.permute.xlu1 %1385 }
 0x21d   : > { %1389 = vst.msk [vmem:[#allocation3] sm:$0xff] %vm1388_vm9, %v1386_v13  ;;  %v1479_v20 = vpop.permute.xlu0 %1478  ;;  %v1765_v13 = vld [vmem:[#allocation2 + $0x4] sm:$0xe] }
 0x21e   : > { %1481 = vst.msk [vmem:[#allocation3 + $0x8] sm:$0xff] %vm1388_vm9, %v1479_v20  ;;  %v4002_v20 = vrot.slane %v2001_v32, 2 }
 0x224   : > { %v1515_v41 = vld [vmem:[#allocation3] sm:$0xff] }
 0x225   : > { %v1516_v21 = vld [vmem:[#allocation3 + $0x8] sm:$0xff] }
 0x226   : > { %1704 = vmatprep.mubr.bf16.mxu1 %v1516_v21  ;;  %v4004_v21 = vrot.slane %v2004_v35, 3 }
 0x227   : > { %1705 = vmatmul.mubr.bf16.vlgmr.msra.gmra.mrb[4].mxu1 %v1515_v41  ;;  %v1919_v41 = vrot.slane %v3998_v36, 1  ;;  %v3405_v36 = vld [vmem:[%s4303_s5 + $0x30] sm:$0xff]  }
 0x228   : > { %3283 = vmatprep.mubr.msk.bf16.mxu1 %vm3442_vm14, %v3441_v48  ;;  %3280 = vmatpush3.bf16.msra.mxu1 %v3387_v45  ;;  %v1972_v45 = vrot.slane %v4000_v39, 2 }
 0x229   : > { %3281 = vmatprep.subr.bf16.mxu1 %v3441_v48 }
 0x22c   : > { %3282 = vmatpush3.bf16.msra.mxu1 %v3388_v49  ;;  %v4018_v49 = vsel %vm516_vm6, %v1765_v13, 0 }
 0x22d   : > { %3287 = vmatprep.subr.bf16.mxu1 %v3441_v48 }
 0x287   : > { %v1747_v42 = vpop.f32.mrb[8].mxu0 }
 0x288   : > { %v3277_v44 = vpop.f32.mrb[9].mxu0 }
 0x289   : > { %v1750_v46 = vpop.f32.mrb[10].mxu0  ;;  %v1854_v44 = vsel %vm4319_vm11, %v1851_v8, 0  ;;  %vm4344_vm11 = vcmp.ne.s16.totalorder %v3632_v27, 0 }
 0x28a   : > { %v3278_v47 = vpop.f32.mrb[11].mxu0 }
 0x28b   : > { %v4013_v47 = vrot.slane %v1951_v25, 2 }
 0x2fa   : > { %v3196_v55 = vpop.f32.mrb[4].mxu1 }
 0x2fb   : > { %v3197_v57 = vpop.f32.mrb[5].mxu1 }
 0x2fc   : > { %v3198_v58 = vadd.f32 %v3197_v57, %v3196_v55  ;;  %v3199_v59 = vpop.f32.mrb[6].mxu1 }
 0x2fd   : > { %v3200_v60 = vpop.f32.mrb[7].mxu1 }
 0x2fe   : > { %v1707_v62 = vadd.f32 %v3198_v58, %v3021_v56  ;;  %v3201_v3 = vadd.f32 %v3200_v60, %v3199_v59 }
 0x300   : > { %v1748_v5 = vadd.f32 %v1747_v42, %v1707_v62  ;;  %v1710_v6 = vadd.f32 %v3201_v3, %v3021_v56  ;;  %v1819_v42 = vsel %vm604_vm4, %v1816_v38, 0  ;;  %v3400_v62 = vld [vmem:[%s4303_s5 + $0x60] sm:$0xff]  }
 0x301   : > { %3213 = vmatprep.subr.bf16.mxu0 %v3400_v62 }
 0x302   : > { %v1751_v11 = vadd.f32 %v1750_v46, %v1710_v6  ;;  %v4011_v46 = vrot.slane %v1948_v9, 1  ;;  %3214 = vmatpush3.bf16.msra.mxu0 %v3401_v15  ;;  %v3402_v9 = vld [vmem:[%s4303_s5 + $0x68] sm:$0xff]  }
 0x303   : > { %3215 = vmatprep.subr.bf16.mxu0 %v3402_v9 }
 0x304   : > { %v3982_v18 = vpack.c.bf16 %v1751_v11, %v1748_v5  ;;  %v1954_v11 = vor.u32 %v4013_v47, %v4011_v46  ;;  %v3407_v47 = vld [vmem:[%s4303_s5 + $0x38] sm:$0xff]  }
 0x306   : > { %v1755_v26 = vmax.bf16 %v3439_v1, %v3982_v18 }
 0x308   : > { %v3041_v30 = vcombine.low %v1755_v26, %v1755_v26  ;;  %v3042_v31 = vcombine.high %v1755_v26, %v1755_v26 }
 0x30a   : > { %1763 = vst.msk [vmem:[#allocation2 + $0x8] sm:$0xf] %vm4321_vm1, %v3041_v30  ;;  %1764 = vst.msk [vmem:[#allocation2 + $0xc] sm:$0xf] %vm4321_vm1, %v3042_v31 }
 0x311   : > { %v3385_v0 = vld [vmem:[#allocation2 + $0x4] sm:$0xfc]   ;;  %v3386_v50 = vld [vmem:[#allocation2 + $0xc] ss:$0 sps:$4 sm:$0x33]  }
 0x312   : > { %v1895_v12 = vld [vmem:[#allocation2 + $0x8] sm:$0xf]  ;;  %v1809_v53 = vrot.slane %v3385_v0, 2  ;;  %v1896_v54 = vld [vmem:[#allocation2 + $0xc] sm:$0xf]  ;;  %v1810_v57 = vrot.slane %v3386_v50, 2 }
 0x313   : > { %v3399_v52 = vld [vmem:[#allocation2 + $0x8] sm:$0xff]   ;;  %v1898_v55 = vsel %vm4320_vm7, %v1895_v12, 0  ;;  %v1899_v58 = vsel %vm4344_vm11, %v1896_v54, 0  ;;  %vm4345_vm11 = vcmp.ne.s16.totalorder %v3672_v51, 0  ;;  %vm4348_vm7 = vsmask.f32 5376 }
 0x314   : > { %v1817_v56 = vld [vmem:[#allocation2 + $0x8] sm:$0xf]  ;;  %v1818_v59 = vld [vmem:[#allocation2 + $0xc] sm:$0x7]  ;;  %1894 = vst.msk [vmem:[#allocation3 + $0x8] sm:$0xff] %vm1297_vm15, %v3399_v52  ;;  %v3052_v3 = vcombine.low %v1898_v55, %v1899_v58  ;;  %v1811_v16 = vsel %vm562_vm13, %v1809_v53, %v1810_v57 }
 0x315   : > { %v1820_v60 = vsel %vm605_vm12, %v1817_v56, 0  ;;  %v1821_v4 = vsel %vm3698_vm5, %v1818_v59, 0  ;;  %v1925_v6 = vld [vmem:[#allocation2 + $0x8] sm:$0xe]  ;;  %v1926_v7 = vld [vmem:[#allocation2 + $0xc] sm:$0xf]  ;;  %1812 = vrot.lane.b32.xlu1 %v1811_v16, %s3443_s19 }
 0x316   : > { %v3047_v5 = vcombine.low %v1819_v42, %v1820_v60  ;;  %v3048_v19 = vcombine.low %v1821_v4, %v1821_v4  ;;  %v1928_v23 = vsel %vm516_vm6, %v1925_v6, 0  ;;  %v1929_v24 = vsel %vm4345_vm11, %v1926_v7, 0  ;;  %v1852_v26 = vld [vmem:[#allocation2 + $0x8] sm:$0xf]  ;;  %v1853_v29 = vld [vmem:[#allocation2 + $0xc] sm:$0xf] }
 0x317   : > { %v1910_v30 = vshrl.u32 %v3052_v3, 16  ;;  %v1912_v31 = vshll.u32 %v3052_v3, 16  ;;  %v3054_v35 = vcombine.low %v1928_v23, %v1929_v24  ;;  %v1855_v38 = vsel %vm3586_vm0, %v1852_v26, 0  ;;  %v1978_v8 = vld [vmem:[#allocation2 + $0x8] sm:$0xc] }
 0x318   : > { %v1831_v14 = vshrl.u32 %v3047_v5, 16  ;;  %v1834_v32 = vshll.u32 %v3047_v5, 16  ;;  %v1839_v33 = vshrl.u32 %v3048_v19, 16  ;;  %v1842_v34 = vshll.u32 %v3048_v19, 16  ;;  %v1979_v58 = vld [vmem:[#allocation2 + $0xc] sm:$0xf] }
 0x319   : > { %v1914_v25 = vrot.slane %v1912_v31, 1  ;;  %vm4346_vm11 = vcmp.ne.s16.totalorder %v3580_v37, 0  ;;  %v1940_v52 = vshrl.u32 %v3054_v35, 16  ;;  %v1943_v53 = vshll.u32 %v3054_v35, 16  ;;  %v3389_v59 = vld [vmem:[#allocation2 + $0x8] sm:$0xfc]  }
 0x31a   : > { %v1833_v13 = vrot.slane %v1831_v14, 2  ;;  %v1836_v42 = vrot.slane %v1834_v32, 3  ;;  %v1856_v0 = vsel %vm4346_vm11, %v1853_v29, 0  ;;  %v1841_v50 = vrot.slane %v1839_v33, 2  ;;  %v1767_v60 = vld [vmem:[#allocation2 + $0xc] sm:$0x3] }
 0x31b   : > { %v1844_v12 = vrot.slane %v1842_v34, 3  ;;  %v1915_v54 = vor.u32 %v1914_v25, %v1910_v30  ;;  %v3049_v56 = vcombine.low %v1854_v44, %v1855_v38  ;;  %v3050_v57 = vcombine.low %v1856_v0, %v1856_v0  ;;  %v3403_v6 = vld [vmem:[%s4303_s5 + $0x28] sm:$0xff]   ;;  %v3404_v19 = vld [vmem:[%s4303_s5 + $0x70] sm:$0xff]   ;;  %v3406_v33 = vld [vmem:[%s4303_s5 + $0x78] sm:$0xff]  }
 0x31c   : > { %v1837_v55 = vor.u32 %v1836_v42, %v1833_v13  ;;  %v1942_v3 = vrot.slane %v1940_v52, 1  ;;  %v1945_v4 = vrot.slane %v1943_v53, 2  ;;  %v1981_v5 = vsel %vm604_vm4, %v1978_v8, 0  ;;  %3216 = vmatpush3.bf16.msra.mxu0 %v3403_v6  ;;  %v1766_v32 = vld [vmem:[#allocation2 + $0x8] sm:$0xf] }
 0x31d   : > { %v1845_v62 = vor.u32 %v1844_v12, %v1841_v50  ;;  %vm4347_vm11 = vsmask.f32 7424  ;;  %v1866_v15 = vshrl.u32 %v3049_v56, 16  ;;  %v1869_v44 = vshll.u32 %v3049_v56, 16  ;;  %3217 = vmatprep.subr.bf16.mxu0 %v3404_v19 }
 0x31e   : > { %v1920_v7 = vsel %vm4347_vm11, %v1915_v54, %v1919_v41  ;;  %v1874_v16 = vshrl.u32 %v3050_v57, 16  ;;  %v1946_v24 = vor.u32 %v1945_v4, %v1942_v3  ;;  %v1877_v26 = vshll.u32 %v3050_v57, 16 }
 0x31f   : > { %1921 = vrot.lane.b32.xlu0 %v1920_v7, %s3443_s19  ;;  %v1846_v23 = vsel %vm4348_vm7, %v1837_v55, %v1845_v62  ;;  %v1982_v29 = vsel %vm605_vm12, %v1979_v58, 0  ;;  %v1868_v41 = vrot.slane %v1866_v15, 3  ;;  %v1871_v30 = vrot.slane %v1869_v44, 4 }
 0x320   : > { %1847 = vrot.lane.b32.xlu1 %v1846_v23, %s3440_s28  ;;  %v1876_v31 = vrot.slane %v1874_v16, 3  ;;  %v3058_v14 = vcombine.low %v1981_v5, %v1982_v29  ;;  %vm4349_vm7 = vsmask.f32 6400  ;;  %v1879_v35 = vrot.slane %v1877_v26, 4  ;;  %3218 = vmatpush3.bf16.msra.mxu0 %v3405_v36 }
 0x321   : > { %v1955_v34 = vsel %vm4349_vm7, %v1946_v24, %v1954_v11  ;;  %v1971_v38 = vrot.slane %v3389_v59, 2  ;;  %v1770_v8 = vsel %vm3706_vm10, %v1767_v60, 0  ;;  %v1872_v9 = vor.u32 %v1871_v30, %v1868_v41  ;;  %3219 = vmatprep.subr.bf16.mxu0 %v3406_v33  ;;  %v2253_v24 = vld [vmem:[%s4305_s7] sm:$0xf] }
 0x322   : > { %v1993_v25 = vshrl.u32 %v3058_v14, 16  ;;  %v1996_v13 = vshll.u32 %v3058_v14, 16  ;;  %v3044_v42 = vcombine.low %v1770_v8, %v1770_v8  ;;  %v2007_v0 = vor.u32 %v4004_v21, %v4002_v20  ;;  %v3060_v14 = vld [vmem:[%s4304_s6] ss:$0 sm:$0xff] }
 0x323   : > { %1956 = vrot.lane.b32.xlu0 %v1955_v34, %s3440_s28  ;;  %v1880_v50 = vor.u32 %v1879_v35, %v1876_v31  ;;  %vm4350_vm11 = vcmp.ne.s16.totalorder %v3672_v51, 0  ;;  %vm4351_vm7 = vsmask.f32 4352  ;;  %v1973_v55 = vsel %vm562_vm13, %v1971_v38, %v1972_v45 }
 0x324   : > { %v1769_v46 = vsel %vm4350_vm11, %v1766_v32, 0  ;;  %v1995_v11 = vrot.slane %v1993_v25, 2  ;;  %v1998_v12 = vrot.slane %v1996_v13, 3  ;;  %v1788_v52 = vshrl.u32 %v3044_v42, 16  ;;  %3220 = vmatpush3.bf16.msra.mxu0 %v3407_v47  ;;  %v3411_v47 = vld [vmem:[%s4307_s9 + $0x88] sm:$0xff]  }
 0x325   : > { %v1791_v53 = vshll.u32 %v3044_v42, 16  ;;  %v1881_v54 = vsel %vm4351_vm7, %v1872_v9, %v1880_v50  ;;  %v3043_v20 = vcombine.low %v4018_v49, %v1769_v46  ;;  %vm4352_vm11 = vsmask.f32 5376  ;;  %3293 = vmatprep.subr.bf16.mxu0 %v3441_v48  ;;  %v3410_v46 = vld [vmem:[%s4307_s9 + $0x80] sm:$0xff]  }
 0x326   : > { %1882 = vrot.lane.b32.xlu1 %v1881_v54, %s3444_s22  ;;  %v1999_v21 = vor.u32 %v1998_v12, %v1995_v11  ;;  %v1790_v56 = vrot.slane %v1788_v52, 1  ;;  %vm4353_vm7 = vsmask.f32 6400  ;;  %v3414_v11 = vld [vmem:[%s4307_s9 + $0x40] sm:$0xff]   ;;  %v3416_v52 = vld [vmem:[%s4307_s9 + $0x48] sm:$0xff]   ;;  %v3418_v54 = vld [vmem:[%s4307_s9 + $0x50] sm:$0xff]  }
 0x327   : > { %v1793_v57 = vrot.slane %v1791_v53, 2  ;;  %1974 = vrot.lane.b32.xlu0 %v1973_v55, %s3444_s22  ;;  %v1780_v58 = vshrl.u32 %v3043_v20, 16  ;;  %v1783_v59 = vshll.u32 %v3043_v20, 16  ;;  %v3415_v12 = vld [vmem:[%s4307_s9] sm:$0xff]   ;;  %v3417_v53 = vld [vmem:[%s4307_s9 + $0x8] sm:$0xff]   ;;  %v3419_v20 = vld [vmem:[%s4307_s9 + $0x10] sm:$0xff]  }
 0x328   : > { %v2008_v60 = vsel %vm4352_vm11, %v1999_v21, %v2007_v0  ;;  %vm2265_vm11 = vcmask 1043456   ;;  %v3080_v21 = vld [vmem:[%s4306_s8] ss:$0 sm:$0xff] }
 0x329   : > { %2010 = vst.msk [vmem:[#allocation3 + $0x10] sm:$0xff] %vm1297_vm15, %v2008_v60  ;;  %v1794_v49 = vor.u32 %v1793_v57, %v1790_v56  ;;  %v1782_v62 = vrot.slane %v1780_v58, 1  ;;  %v1785_v3 = vrot.slane %v1783_v59, 2  ;;  %v2267_v26 = vsel %vm2265_vm11, %v2253_v24, 0  ;;  %v2540_v60 = vld [vmem:[#allocation2 + $0x10] sm:$0x7] }
 0x32a   : > { %v2310_v57 = vunpack.c.l.bf16 %v3982_v18 }
 0x32b   : > { %v1786_v4 = vor.u32 %v1785_v3, %v1782_v62  ;;  %v2311_v3 = vunpack.c.h.bf16 %v3982_v18 }
 0x32d   : > { %v1795_v39 = vsel %vm4353_vm7, %v1786_v4, %v1794_v49  ;;  %vm2261_vm7 = vcmask 64512  }
 0x32e   : > { %1797 = vst.msk [vmem:[#allocation3] sm:$0xff] %vm1297_vm15, %v1795_v39  ;;  %v2457_v39 = vld [vmem:[#allocation2 + $0x10] sm:$0x1] }
 0x330   : > { %v2013_v45 = vld [vmem:[#allocation3 + $0x10] sm:$0xff] }
 0x331   : > { %3284 = vmatmul.mubr.msk.bf16.vlgmr.msra.gmra.mrb[8].mxu1 %vm1297_vm15, %v2013_v45 }
 0x332   : > { %3289 = vmatprep.mubr.msk.bf16.mxu1 %vm3442_vm14, %v3441_v48  ;;  %3288 = vmatpush3.bf16.msra.mxu1 %v2267_v26 }
 0x333   : > { %3232 = vmatprep.subr.bf16.mxu1 %v3414_v11 }
 0x387   : > { %v1813_v5 = vpop.permute.xlu1 %1812 }
 0x388   : > { %1815 = vst.msk [vmem:[#allocation3] sm:$0xff] %vm1316_vm3, %v1813_v5  ;;  %v2487_v5 = vld [vmem:[#allocation2 + $0x10] sm:$0x3] }
 0x391   : > { %v1922_v6 = vpop.permute.xlu0 %1921 }
 0x392   : > { %1924 = vst.msk [vmem:[#allocation3 + $0x8] sm:$0xff] %vm1316_vm3, %v1922_v6  ;;  %v1848_v7 = vpop.permute.xlu1 %1847  ;;  %v2543_v6 = vsel %vm3698_vm5, %v2540_v60, 0 }
 0x393   : > { %1850 = vst.msk [vmem:[#allocation3] sm:$0xff] %vm1352_vm2, %v1848_v7 }
 0x395   : > { %v1957_v15 = vpop.permute.xlu0 %1956 }
 0x396   : > { %1959 = vst.msk [vmem:[#allocation3 + $0x8] sm:$0xff] %vm1352_vm2, %v1957_v15  ;;  %v2460_v15 = vsel %vm3634_vm8, %v2457_v39, 0  ;;  %vm4354_vm8 = vcmp.ne.s16.totalorder %v3549_v17, 0 }
 0x397   : > { %v3094_v18 = vcombine.low %v2460_v15, %v2460_v15 }
 0x398   : > { %v1883_v44 = vpop.permute.xlu1 %1882 }
 0x399   : > { %1885 = vst.msk [vmem:[#allocation3] sm:$0xff] %vm1388_vm9, %v1883_v44  ;;  %v1975_v16 = vpop.permute.xlu0 %1974  ;;  %v2490_v44 = vsel %vm3706_vm10, %v2487_v5, 0 }
 0x39a   : > { %1977 = vst.msk [vmem:[#allocation3 + $0x8] sm:$0xff] %vm1388_vm9, %v1975_v16  ;;  %v3100_v16 = vcombine.low %v2543_v6, %v2543_v6  ;;  %v3096_v26 = vcombine.low %v2490_v44, %v2490_v44 }
 0x3a0   : > { %v2011_v23 = vld [vmem:[#allocation3] sm:$0xff] }
 0x3a1   : > { %v2012_v19 = vld [vmem:[#allocation3 + $0x8] sm:$0xff] }
 0x3a2   : > { %2200 = vmatprep.mubr.bf16.mxu0 %v2012_v19 }
 0x3a3   : > { %2201 = vmatmul.mubr.bf16.vlgmr.msra.gmra.mrb[12].mxu0 %v2011_v23 }
 0x3a4   : > { %3297 = vmatprep.mubr.msk.bf16.mxu0 %vm3442_vm14, %v3441_v48  ;;  %3294 = vmatpush3.bf16.msra.mxu0 %v3410_v46 }
 0x3a5   : > { %3295 = vmatprep.subr.bf16.mxu0 %v3441_v48 }
 0x3a8   : > { %3296 = vmatpush3.bf16.msra.mxu0 %v3411_v47 }
 0x3a9   : > { %3301 = vmatprep.subr.bf16.mxu0 %v3441_v48 }
 0x404   : > { %v2243_v29 = vpop.f32.mrb[8].mxu1 }
 0x405   : > { %v3285_v36 = vpop.f32.mrb[9].mxu1 }
 0x406   : > { %v2246_v41 = vpop.f32.mrb[10].mxu1  ;;  %v3421_v36 = vld [vmem:[%s4307_s9 + $0x18] sm:$0xff]  }
 0x407   : > { %v3286_v30 = vpop.f32.mrb[11].mxu1 }
 0x408   : > { %v4166_v30 = vshll.u32 %v3094_v18, 16 }
 0x476   : > { %v3221_v31 = vpop.f32.mrb[12].mxu0 }
 0x477   : > { %v3222_v32 = vpop.f32.mrb[13].mxu0 }
 0x478   : > { %v3223_v33 = vadd.f32 %v3222_v32, %v3221_v31  ;;  %v3224_v34 = vpop.f32.mrb[14].mxu0  ;;  %v2376_v31 = vld [vmem:[#allocation2 + $0x4] sm:$0xc]  ;;  %v2508_v32 = vshrl.u32 %v3096_v26, 16 }
 0x479   : > { %v3225_v35 = vpop.f32.mrb[15].mxu0 }
 0x47a   : > { %v2203_v38 = vadd.f32 %v3223_v33, %v3060_v14  ;;  %v3226_v8 = vadd.f32 %v3225_v35, %v3224_v34  ;;  %v2511_v33 = vshll.u32 %v3096_v26, 16  ;;  %v4168_v34 = vld [vmem:[#allocation2 + $0x10] ss:$0 sps:$4 sm:$0x33]   ;;  %v2325_v35 = vld [vmem:[#allocation2 + $0x4] sm:$0xe] }
 0x47b   : > { %v4186_v46 = vsel %vm516_vm6, %v2325_v35, 0 }
 0x47c   : > { %v2244_v9 = vadd.f32 %v2243_v29, %v2203_v38  ;;  %v2206_v25 = vadd.f32 %v3226_v8, %v3060_v14  ;;  %v2561_v29 = vshrl.u32 %v3100_v16, 16  ;;  %v2411_v14 = vld [vmem:[#allocation2 + $0x4] sm:$0x8] }
 0x47e   : > { %v2247_v13 = vadd.f32 %v2246_v41, %v2206_v25  ;;  %v2250_v42 = vmax.f32 %v2244_v9, 0.0  ;;  %v2564_v41 = vshll.u32 %v3100_v16, 16  ;;  %v4170_v38 = vrot.slane %v2561_v29, 2  ;;  %v3425_v29 = vld [vmem:[%s4307_s9 + $0x68] sm:$0xff]  }
 0x47f   : > { %v2479_v9 = vrot.slane %v4166_v30, 1  ;;  %v2379_v25 = vsel %vm604_vm4, %v2376_v31, 0  ;;  %v3428_v30 = vld [vmem:[%s4307_s9 + $0x30] sm:$0xff]  }
 0x480   : > { %v2251_v0 = vmax.f32 %v2247_v13, 0.0  ;;  %v4172_v8 = vrot.slane %v2564_v41, 3  ;;  %v2414_v13 = vsel %vm4354_vm8, %v2411_v14, 0  ;;  %vm4356_vm8 = vcmp.ne.s16.totalorder %v3632_v27, 0 }
 0x482   : > { %v2252_v50 = vpack.c.bf16 %v2251_v0, %v2250_v42  ;;  %v4179_v42 = vrot.slane %v2508_v32, 1  ;;  %v4181_v0 = vrot.slane %v2511_v33, 2 }
 0x484   : > { %3290 = vmatmul.mubr.msk.bf16.vlgmr.msra.gmra.mrb[12].mxu1 %vm2261_vm7, %v2252_v50  ;;  %v2532_v50 = vrot.slane %v4168_v34, 2  ;;  %v2514_v27 = vor.u32 %v4181_v0, %v4179_v42  ;;  %v3430_v0 = vld [vmem:[%s4307_s9 + $0x38] sm:$0xff]  }
 0x485   : > { %3233 = vmatpush3.bf16.msra.mxu1 %v3415_v12 }
 0x486   : > { %3234 = vmatprep.subr.bf16.mxu1 %v3416_v52 }
 0x489   : > { %3235 = vmatpush3.bf16.msra.mxu1 %v3417_v53 }
 0x48a   : > { %3236 = vmatprep.subr.bf16.mxu1 %v3418_v54 }
 0x48d   : > { %3237 = vmatpush3.bf16.msra.mxu1 %v3419_v20 }
 0x48e   : > { %3238 = vmatprep.subr.bf16.mxu1 %v3420_v28 }
 0x491   : > { %3239 = vmatpush3.bf16.msra.mxu1 %v3421_v36 }
 0x557   : > { %v2303_v55 = vpop.f32.mrb[12].mxu1 }
 0x558   : > { %v2304_v56 = vadd.f32 %v3080_v21, %v2303_v55  ;;  %v3291_v58 = vpop.f32.mrb[13].mxu1 }
 0x559   : > { %v2306_v59 = vpop.f32.mrb[14].mxu1  ;;  %v3423_v58 = vld [vmem:[%s4307_s9 + $0x60] sm:$0xff]  }
 0x55a   : > { %v2312_v49 = vadd.f32 %v2310_v57, %v2304_v56  ;;  %v2307_v62 = vadd.f32 %v3080_v21, %v2306_v59  ;;  %v3292_v4 = vpop.f32.mrb[15].mxu1  ;;  %3240 = vmatprep.subr.bf16.mxu1 %v3423_v58  ;;  %v3427_v58 = vld [vmem:[%s4307_s9 + $0x70] sm:$0xff]  }
 0x55c   : > { %v2313_v45 = vadd.f32 %v2311_v3, %v2307_v62  ;;  %v3424_v3 = vld [vmem:[%s4307_s9 + $0x20] sm:$0xff]  }
 0x55d   : > { %3241 = vmatpush3.bf16.msra.mxu1 %v3424_v3 }
 0x55e   : > { %v4150_v7 = vpack.c.bf16 %v2313_v45, %v2312_v49  ;;  %3242 = vmatprep.subr.bf16.mxu1 %v3425_v29 }
 0x560   : > { %v2315_v19 = vmax.bf16 %v3439_v1, %v4150_v7 }
 0x562   : > { %v3082_v23 = vcombine.low %v2315_v19, %v2315_v19  ;;  %v3083_v24 = vcombine.high %v2315_v19, %v2315_v19 }
 0x564   : > { %2323 = vst.msk [vmem:[#allocation2 + $0x8] sm:$0xf] %vm4321_vm1, %v3082_v23  ;;  %2324 = vst.msk [vmem:[#allocation2 + $0xc] sm:$0xf] %vm4321_vm1, %v3083_v24  ;;  %vm4355_vm1 = vcmp.ne.s16.totalorder %v3617_v10, 0 }
 0x56b   : > { %v3408_v47 = vld [vmem:[#allocation2 + $0x4] sm:$0xfc]   ;;  %v3409_v11 = vld [vmem:[#allocation2 + $0xc] ss:$0 sps:$4 sm:$0x33]  }
 0x56c   : > { %v2455_v12 = vld [vmem:[#allocation2 + $0x8] sm:$0xf]  ;;  %v2369_v53 = vrot.slane %v3408_v47, 2  ;;  %v2456_v54 = vld [vmem:[#allocation2 + $0xc] sm:$0xf]  ;;  %v2370_v21 = vrot.slane %v3409_v11, 2 }
 0x56d   : > { %v3422_v52 = vld [vmem:[#allocation2 + $0x8] sm:$0xff]   ;;  %v2458_v17 = vsel %vm4355_vm1, %v2455_v12, 0  ;;  %v2459_v55 = vsel %vm4356_vm8, %v2456_v54, 0  ;;  %vm4357_vm1 = vcmp.ne.s16.totalorder %v3672_v51, 0 }
 0x56e   : > { %v2377_v20 = vld [vmem:[#allocation2 + $0x8] sm:$0xf]  ;;  %v2378_v56 = vld [vmem:[#allocation2 + $0xc] sm:$0x7]  ;;  %2454 = vst.msk [vmem:[#allocation3 + $0x8] sm:$0xff] %vm1297_vm15, %v3422_v52  ;;  %v3093_v59 = vcombine.low %v2458_v17, %v2459_v55  ;;  %v2371_v4 = vsel %vm562_vm13, %v2369_v53, %v2370_v21 }
 0x56f   : > { %v2380_v57 = vsel %vm605_vm12, %v2377_v20, 0  ;;  %v2381_v10 = vsel %vm3698_vm5, %v2378_v56, 0  ;;  %v2485_v49 = vld [vmem:[#allocation2 + $0x8] sm:$0xe]  ;;  %v2486_v62 = vld [vmem:[#allocation2 + $0xc] sm:$0xf]  ;;  %2372 = vrot.lane.b32.xlu1 %v2371_v4, %s3443_s19 }
 0x570   : > { %v3088_v60 = vcombine.low %v2379_v25, %v2380_v57  ;;  %v3089_v39 = vcombine.low %v2381_v10, %v2381_v10  ;;  %v2488_v45 = vsel %vm516_vm6, %v2485_v49, 0  ;;  %v2489_v63 = vsel %vm4357_vm1, %v2486_v62, 0  ;;  %v2412_v5 = vld [vmem:[#allocation2 + $0x8] sm:$0xf]  ;;  %v2413_v6 = vld [vmem:[#allocation2 + $0xc] sm:$0xf] }
 0x571   : > { %v2470_v15 = vshrl.u32 %v3093_v59, 16  ;;  %v2472_v44 = vshll.u32 %v3093_v59, 16  ;;  %v3095_v24 = vcombine.low %v2488_v45, %v2489_v63  ;;  %v2415_v22 = vsel %vm3586_vm0, %v2412_v5, 0  ;;  %v2538_v26 = vld [vmem:[#allocation2 + $0x8] sm:$0xc] }
 0x572   : > { %v2391_v16 = vshrl.u32 %v3088_v60, 16  ;;  %v2394_v19 = vshll.u32 %v3088_v60, 16  ;;  %v2399_v18 = vshrl.u32 %v3089_v39, 16  ;;  %v2402_v23 = vshll.u32 %v3089_v39, 16  ;;  %v2539_v12 = vld [vmem:[#allocation2 + $0xc] sm:$0xf] }
 0x573   : > { %v2474_v28 = vrot.slane %v2472_v44, 1  ;;  %vm4358_vm5 = vcmp.ne.s16.totalorder %v3580_v37, 0  ;;  %v2500_v33 = vshrl.u32 %v3095_v24, 16  ;;  %v2503_v35 = vshll.u32 %v3095_v24, 16  ;;  %v3412_v52 = vld [vmem:[#allocation2 + $0x8] sm:$0xfc]  }
 0x574   : > { %v2393_v36 = vrot.slane %v2391_v16, 2  ;;  %v2396_v41 = vrot.slane %v2394_v19, 3  ;;  %v2416_v31 = vsel %vm4358_vm5, %v2413_v6, 0  ;;  %v2401_v14 = vrot.slane %v2399_v18, 2  ;;  %v2327_v53 = vld [vmem:[#allocation2 + $0xc] sm:$0x3] }
 0x575   : > { %v2404_v32 = vrot.slane %v2402_v23, 3  ;;  %v2475_v25 = vor.u32 %v2474_v28, %v2470_v15  ;;  %v3090_v43 = vcombine.low %v2414_v13, %v2415_v22  ;;  %v3091_v11 = vcombine.low %v2416_v31, %v2416_v31  ;;  %v3426_v37 = vld [vmem:[%s4307_s9 + $0x28] sm:$0xff]   ;;  %v3429_v39 = vld [vmem:[%s4307_s9 + $0x78] sm:$0xff]  }
 0x576   : > { %v2397_v47 = vor.u32 %v2396_v41, %v2393_v36  ;;  %v2502_v17 = vrot.slane %v2500_v33, 1  ;;  %v2505_v20 = vrot.slane %v2503_v35, 2  ;;  %v2541_v21 = vsel %vm604_vm4, %v2538_v26, 0  ;;  %3243 = vmatpush3.bf16.msra.mxu1 %v3426_v37  ;;  %v2326_v4 = vld [vmem:[#allocation2 + $0x8] sm:$0xf] }
 0x577   : > { %v2405_v54 = vor.u32 %v2404_v32, %v2401_v14  ;;  %vm4359_vm0 = vsmask.f32 7424  ;;  %v2426_v56 = vshrl.u32 %v3090_v43, 16  ;;  %v2429_v13 = vshll.u32 %v3090_v43, 16  ;;  %3244 = vmatprep.subr.bf16.mxu1 %v3427_v58 }
 0x578   : > { %v2480_v55 = vsel %vm4359_vm0, %v2475_v25, %v2479_v9  ;;  %v2434_v57 = vshrl.u32 %v3091_v11, 16  ;;  %vm4360_vm6 = vsmask.f32 5376  ;;  %v2506_v59 = vor.u32 %v2505_v20, %v2502_v17 }
 0x579   : > { %2481 = vrot.lane.b32.xlu0 %v2480_v55, %s3443_s19  ;;  %v2406_v40 = vsel %vm4360_vm6, %v2397_v47, %v2405_v54  ;;  %v2437_v10 = vshll.u32 %v3091_v11, 16  ;;  %v2542_v60 = vsel %vm605_vm12, %v2539_v12, 0  ;;  %v2428_v9 = vrot.slane %v2426_v56, 3  ;;  %vm4362_vm12 = vmmov %vm4357_vm1  ;;  %v3101_v55 = vld [vmem:[%s4308_s10] ss:$0 sm:$0xff] }
 0x57a   : > { %2407 = vrot.lane.b32.xlu1 %v2406_v40, %s3440_s28  ;;  %v2431_v49 = vrot.slane %v2429_v13, 4  ;;  %v2436_v62 = vrot.slane %v2434_v57, 3  ;;  %v3099_v3 = vcombine.low %v2541_v21, %v2542_v60  ;;  %vm4361_vm4 = vsmask.f32 6400  ;;  %3245 = vmatpush3.bf16.msra.mxu1 %v3428_v30  ;;  %vm4364_vm8 = vmmov %vm4360_vm6 }
 0x57b   : > { %v2515_v61 = vsel %vm4361_vm4, %v2506_v59, %v2514_v27  ;;  %v2439_v45 = vrot.slane %v2437_v10, 4  ;;  %v2531_v63 = vrot.slane %v3412_v52, 2  ;;  %v2330_v5 = vsel %vm3706_vm10, %v2327_v53, 0  ;;  %3246 = vmatprep.subr.bf16.mxu1 %v3429_v39  ;;  %vm4365_vm1 = vmmov %vm4361_vm4  ;;  %v2813_v52 = vld [vmem:[%s4309_s11] sm:$0xf] }
 0x57c   : > { %v2432_v6 = vor.u32 %v2431_v49, %v2428_v9  ;;  %v2553_v15 = vshrl.u32 %v3099_v3, 16  ;;  %v2556_v44 = vshll.u32 %v3099_v3, 16  ;;  %v3085_v16 = vcombine.low %v2330_v5, %v2330_v5  ;;  %v3121_v3 = vld [vmem:[%s4310_s12] ss:$0 sm:$0xff] }
 0x57d   : > { %v2567_v19 = vor.u32 %v4172_v8, %v4170_v38  ;;  %2516 = vrot.lane.b32.xlu0 %v2515_v61, %s3440_s28  ;;  %v2440_v18 = vor.u32 %v2439_v45, %v2436_v62  ;;  %v2329_v42 = vsel %vm4362_vm12, %v2326_v4, 0  ;;  %vm4363_vm10 = vsmask.f32 4352 }
 0x57e   : > { %v2555_v2 = vrot.slane %v2553_v15, 2  ;;  %v2558_v27 = vrot.slane %v2556_v44, 3  ;;  %v2348_v23 = vshrl.u32 %v3085_v16, 16  ;;  %v2351_v24 = vshll.u32 %v3085_v16, 16  ;;  %3247 = vmatpush3.bf16.msra.mxu1 %v3430_v0 }
 0x57f   : > { %v2441_v22 = vsel %vm4363_vm10, %v2432_v6, %v2440_v18  ;;  %v3084_v38 = vcombine.low %v4186_v46, %v2329_v42  ;;  %v2533_v51 = vsel %vm562_vm13, %v2531_v63, %v2532_v50  ;;  %v2825_v53 = vsel %vm2265_vm11, %v2813_v52, 0 }
 0x580   : > { %2442 = vrot.lane.b32.xlu1 %v2441_v22, %s3444_s22  ;;  %v2559_v8 = vor.u32 %v2558_v27, %v2555_v2  ;;  %v2350_v26 = vrot.slane %v2348_v23, 1  ;;  %v2353_v29 = vrot.slane %v2351_v24, 2  ;;  %v2868_v61 = vunpack.c.l.bf16 %v4150_v7 }
 0x581   : > { %2534 = vrot.lane.b32.xlu0 %v2533_v51, %s3444_s22  ;;  %v2340_v28 = vshrl.u32 %v3084_v38, 16  ;;  %v2343_v36 = vshll.u32 %v3084_v38, 16  ;;  %v2869_v15 = vunpack.c.h.bf16 %v4150_v7  ;;  %vm4366_vm13 = vcmask 257024  }
 0x582   : > { %v2568_v41 = vsel %vm4364_vm8, %v2559_v8, %v2567_v19  ;;  %v2354_v31 = vor.u32 %v2353_v29, %v2350_v26 }
 0x583   : > { %2570 = vst.msk [vmem:[#allocation3 + $0x10] sm:$0xff] %vm1297_vm15, %v2568_v41  ;;  %v2342_v46 = vrot.slane %v2340_v28, 1  ;;  %v2345_v14 = vrot.slane %v2343_v36, 2 }
 0x585   : > { %v2346_v32 = vor.u32 %v2345_v14, %v2342_v46 }
 0x587   : > { %v2355_v33 = vsel %vm4365_vm1, %v2346_v32, %v2354_v31 }
 0x588   : > { %2357 = vst.msk [vmem:[#allocation3] sm:$0xff] %vm1297_vm15, %v2355_v33 }
 0x58a   : > { %v2573_v34 = vld [vmem:[#allocation3 + $0x10] sm:$0xff] }
 0x58b   : > { %3298 = vmatmul.mubr.msk.bf16.vlgmr.msra.gmra.mrb[16].mxu0 %vm1297_vm15, %v2573_v34 }
 0x58c   : > { %3303 = vmatprep.mubr.msk.bf16.mxu0 %vm3442_vm14, %v3441_v48  ;;  %3302 = vmatpush3.bf16.msra.mxu0 %v2825_v53  ;;  %vm4367_vm14 = vmmov %vm4366_vm13 }
 0x5e1   : > { %v2373_v50 = vpop.permute.xlu1 %2372 }
 0x5e2   : > { %2375 = vst.msk [vmem:[#allocation3] sm:$0xff] %vm1316_vm3, %v2373_v50 }
 0x5eb   : > { %v2482_v35 = vpop.permute.xlu0 %2481 }
 0x5ec   : > { %2484 = vst.msk [vmem:[#allocation3 + $0x8] sm:$0xff] %vm1316_vm3, %v2482_v35  ;;  %v2408_v25 = vpop.permute.xlu1 %2407 }
 0x5ed   : > { %2410 = vst.msk [vmem:[#allocation3] sm:$0xff] %vm1352_vm2, %v2408_v25 }
 0x5ef   : > { %v2517_v47 = vpop.permute.xlu0 %2516 }
 0x5f0   : > { %2519 = vst.msk [vmem:[#allocation3 + $0x8] sm:$0xff] %vm1352_vm2, %v2517_v47 }
 0x5f2   : > { %v2443_v43 = vpop.permute.xlu1 %2442 }
 0x5f3   : > { %2445 = vst.msk [vmem:[#allocation3] sm:$0xff] %vm1388_vm9, %v2443_v43  ;;  %v2535_v11 = vpop.permute.xlu0 %2534 }
 0x5f4   : > { %2537 = vst.msk [vmem:[#allocation3 + $0x8] sm:$0xff] %vm1388_vm9, %v2535_v11 }
 0x5fa   : > { %v2571_v48 = vld [vmem:[#allocation3] sm:$0xff] }
 0x5fb   : > { %v2572_v12 = vld [vmem:[#allocation3 + $0x8] sm:$0xff] }
 0x5fc   : > { %2760 = vmatprep.mubr.bf16.mxu1 %v2572_v12 }
 0x5fd   : > { %2761 = vmatmul.mubr.bf16.vlgmr.msra.gmra.mrb[16].mxu1 %v2571_v48 }
 0x65e   : > { %v2803_v54 = vpop.f32.mrb[16].mxu0 }
 0x65f   : > { %v3299_v17 = vpop.f32.mrb[17].mxu0 }
 0x660   : > { %v2806_v20 = vpop.f32.mrb[18].mxu0 }
 0x661   : > { %v3300_v21 = vpop.f32.mrb[19].mxu0 }
 0x6d0   : > { %v3248_v37 = vpop.f32.mrb[16].mxu1 }
 0x6d1   : > { %v3249_v56 = vpop.f32.mrb[17].mxu1 }
 0x6d2   : > { %v3250_v13 = vadd.f32 %v3249_v56, %v3248_v37  ;;  %v3251_v57 = vpop.f32.mrb[18].mxu1 }
 0x6d3   : > { %v3252_v58 = vpop.f32.mrb[19].mxu1 }
 0x6d4   : > { %v2763_v40 = vadd.f32 %v3250_v13, %v3101_v55  ;;  %v3253_v59 = vadd.f32 %v3252_v58, %v3251_v57 }
 0x6d6   : > { %v2804_v10 = vadd.f32 %v2803_v54, %v2763_v40  ;;  %v2766_v60 = vadd.f32 %v3253_v59, %v3101_v55 }
 0x6d8   : > { %v2807_v30 = vadd.f32 %v2806_v20, %v2766_v60  ;;  %v2810_v9 = vmax.f32 %v2804_v10, 0.0 }
 0x6da   : > { %v2811_v49 = vmax.f32 %v2807_v30, 0.0 }
 0x6dc   : > { %v2812_v62 = vpack.c.bf16 %v2811_v49, %v2810_v9 }
 0x6de   : > { %3304 = vmatmul.mubr.msk.bf16.vlgmr.msra.gmra.mrb[20].mxu0 %vm2261_vm7, %v2812_v62 }
 0x7b1   : > { %v2861_v4 = vpop.f32.mrb[20].mxu0 }
 0x7b2   : > { %v2862_v39 = vadd.f32 %v3121_v3, %v2861_v4  ;;  %v3305_v45 = vpop.f32.mrb[21].mxu0 }
 0x7b3   : > { %v2864_v63 = vpop.f32.mrb[22].mxu0 }
 0x7b4   : > { %v2870_v5 = vadd.f32 %v2868_v61, %v2862_v39  ;;  %v2865_v6 = vadd.f32 %v3121_v3, %v2864_v63  ;;  %v3306_v44 = vpop.f32.mrb[23].mxu0 }
 0x7b6   : > { %v2871_v16 = vadd.f32 %v2869_v15, %v2865_v6 }
 0x7b8   : > { %v2872_v19 = vpack.c.bf16 %v2871_v16, %v2870_v5 }
 0x7ba   : > { %v2873_v18 = vmax.bf16 %v3439_v1, %v2872_v19 }
 0x7bc   : > { %v3123_v42 = vcombine.low %v2873_v18, %v2873_v18  ;;  %v3124_v0 = vcombine.high %v2873_v18, %v2873_v18 }
 0x7be   : > { %2881 = vst.msk [vmem:[%s440_s18] sm:$0xf] %vm4366_vm13, %v3123_v42 }
 0x7bf   : > { %2882 = vst.msk [vmem:[%s440_s18 + $0x4] sm:$0xf] %vm4367_vm14, %v3124_v0 }
 0x7c0 PF: > { %s23_s25 = sadd.s32 1, %s3437_s25  }
 0x7c1   : > { %p20_p4 = scmp.ge.s32.totalorder %s23_s25, 4  }
 0x7c3   :  { %22 = sbr.rel (!%p20_p4) target bundleno = 1 (0x1), region = 102 }

</bundles_post_ra>
